<compile_context>
chip_gen: v7x
topology: tpu7x:2x2x1
jax: 0.10.0
libtpu: 0.0.40
codegen_flags: <defaults>
</compile_context>

<pallas_src>
import jax
import jax.numpy as jnp
from jax.experimental import pallas as pl
from jax.experimental.pallas import tpu as pltpu

DIM_Z = 16
DIM_T = 8
TRANS_LAYERS = 2
BN_EPS = 1e-5
PAD = 128          # lane-dense padding for narrow (<128 lane) outputs
MAX_TN = 512       # point-tile cap: (TN,1024) f32 activations + 2x-buffered
                   # bf16 weights stay well inside v7x's 64 MiB VMEM


# ----------------------------------------------------------------------------
# helpers
# ----------------------------------------------------------------------------
def _pick_tile(n, cap=MAX_TN):
    """Largest point-tile <= cap that divides N (sublane-multiple), else N."""
    if n <= cap:
        return n
    for t in (cap, 256, 128, 64, 32, 16, 8):
        if n % t == 0:
            return t
    return n


def _const_spec(a):
    nd = a.ndim
    return pl.BlockSpec(a.shape, lambda *args, _nd=nd: (0,) * _nd)


def _nbytes(*arrays):
    return int(sum(int(a.size) * a.dtype.itemsize for a in arrays))


# ----------------------------------------------------------------------------
# Pallas kernels
# ----------------------------------------------------------------------------
def shape_path_kernel(x_ref, w1, b1, w2, b2, w3, b3, fw1, fb1, fw2, fb2,
                      o_ref, acc_ref):
    """PointNetfeat(3,64,128,1024) + max-over-points + fused FC head.

    grid = (B, N//TN).  x_ref: (1, TN, 3).  o_ref: (1, 1, PAD).
    acc_ref: VMEM (1, 1024) running max over point tiles.
    """
    n = pl.program_id(1)

    @pl.when(n == 0)
    def _():
        acc_ref[...] = jnp.full_like(acc_ref, -jnp.inf)

    x = x_ref[0].astype(jnp.bfloat16)                                  # (TN, 3)
    h = jnp.dot(x, w1[...], preferred_element_type=jnp.float32) + b1[...]
    h = jnp.maximum(h, 0.0)                                            # relu(bn1(conv1))
    h = jnp.dot(h.astype(jnp.bfloat16), w2[...],
                preferred_element_type=jnp.float32) + b2[...]
    h = jnp.maximum(h, 0.0)                                            # relu(bn2(conv2))
    h = jnp.dot(h.astype(jnp.bfloat16), w3[...],
                preferred_element_type=jnp.float32) + b3[...]          # bn3(conv3)
    acc_ref[...] = jnp.maximum(acc_ref[...], jnp.max(h, axis=0, keepdims=True))

    @pl.when(n == pl.num_programs(1) - 1)
    def _():
        g = acc_ref[...]                                               # (1, 1024)
        g = jnp.dot(g.astype(jnp.bfloat16), fw1[...],
                    preferred_element_type=jnp.float32) + fb1[...]
        g = jnp.maximum(g, 0.0)                                        # relu(bn(fc1))
        g = jnp.dot(g.astype(jnp.bfloat16), fw2[...],
                    preferred_element_type=jnp.float32) + fb2[...]     # (1, PAD)
        o_ref[0] = g


def make_t_path_kernel(n_extract_hidden):
    """t-path: PointNetfeat(19,...) with split-K first layer + FC + t_extract."""

    def kernel(*refs):
        (x_ref, z_ref, w1x, w1z, b1, w2, b2, w3, b3,
         fw1, fb1, fw2, fb2) = refs[:13]
        n_ext = 2 * (n_extract_hidden + 1)
        ext = refs[13:13 + n_ext]
        t_ref, raw_ref, acc_ref = refs[13 + n_ext:]

        n = pl.program_id(1)

        @pl.when(n == 0)
        def _():
            acc_ref[...] = jnp.full_like(acc_ref, -jnp.inf)

        x = x_ref[0].astype(jnp.bfloat16)                              # (TN, 3)
        z = z_ref[0].astype(jnp.bfloat16)                              # (1, PAD)
        # split-K first layer: cat(x, z) @ W == x @ W[:3] + z @ W[3:]
        zc = jnp.dot(z, w1z[...], preferred_element_type=jnp.float32)  # (1, C1)
        h = jnp.dot(x, w1x[...], preferred_element_type=jnp.float32) + zc + b1[...]
        h = jnp.maximum(h, 0.0)
        h = jnp.dot(h.astype(jnp.bfloat16), w2[...],
                    preferred_element_type=jnp.float32) + b2[...]
        h = jnp.maximum(h, 0.0)
        h = jnp.dot(h.astype(jnp.bfloat16), w3[...],
                    preferred_element_type=jnp.float32) + b3[...]
        acc_ref[...] = jnp.maximum(acc_ref[...],
                                   jnp.max(h, axis=0, keepdims=True))

        @pl.when(n == pl.num_programs(1) - 1)
        def _():
            g = acc_ref[...]                                           # (1, 1024)
            g = jnp.maximum(
                jnp.dot(g.astype(jnp.bfloat16), fw1[...],
                        preferred_element_type=jnp.float32) + fb1[...], 0.0)
            t_pad = jnp.dot(g.astype(jnp.bfloat16), fw2[...],
                            preferred_element_type=jnp.float32) + fb2[...]
            t_ref[0] = t_pad                                           # (1, PAD)
            e = t_pad                                                  # padded lanes are zero
            for i in range(n_extract_hidden):
                e = jnp.maximum(
                    jnp.dot(e.astype(jnp.bfloat16), ext[2 * i][...],
                            preferred_element_type=jnp.float32) + ext[2 * i + 1][...],
                    0.0)
            raw_ref[0] = jnp.dot(e.astype(jnp.bfloat16), ext[-2][...],
                                 preferred_element_type=jnp.float32) + ext[-1][...]

    return kernel


# ----------------------------------------------------------------------------
# pallas_call wrappers
# ----------------------------------------------------------------------------
def run_shape_path(x, p):
    B, N, Cin = x.shape
    TN = _pick_tile(N)
    ce = pl.CostEstimate(
        flops=int(2 * B * N * (Cin * 64 + 64 * 128 + 128 * 1024)
                  + 2 * B * (1024 * 512 + 512 * PAD)),
        transcendentals=0,
        bytes_accessed=_nbytes(x, *p) + B * PAD * 4,
    )
    out = pl.pallas_call(
        shape_path_kernel,
        out_shape=jax.ShapeDtypeStruct((B, 1, PAD), jnp.float32),
        grid=(B, N // TN),
        in_specs=[pl.BlockSpec((1, TN, Cin), lambda b, n: (b, n, 0))]
                 + [_const_spec(a) for a in p],
        out_specs=pl.BlockSpec((1, 1, PAD), lambda b, n: (b, 0, 0)),
        scratch_shapes=[pltpu.VMEM((1, 1024), jnp.float32)],
        compiler_params=pltpu.CompilerParams(
            dimension_semantics=("parallel", "arbitrary")),
        cost_estimate=ce,
    )(x, *p)
    return out.reshape(B, PAD)


def run_t_path(x, z_pad, p):
    B, N, Cin = x.shape
    TN = _pick_tile(N)
    z3 = z_pad.reshape(B, 1, PAD)
    kernel = make_t_path_kernel(TRANS_LAYERS)
    ce = pl.CostEstimate(
        flops=int(2 * B * N * (Cin * 256 + 256 * 512 + 512 * 1024)
                  + 2 * B * (PAD * 256 + 1024 * 512 + 512 * PAD
                             + PAD * 64 + 64 * 64 + 64 * PAD)),
        transcendentals=0,
        bytes_accessed=_nbytes(x, z3, *p) + 2 * B * PAD * 4,
    )
    t_pad, raw_pad = pl.pallas_call(
        kernel,
        out_shape=(jax.ShapeDtypeStruct((B, 1, PAD), jnp.float32),
                   jax.ShapeDtypeStruct((B, 1, PAD), jnp.float32)),
        grid=(B, N // TN),
        in_specs=[pl.BlockSpec((1, TN, Cin), lambda b, n: (b, n, 0)),
                  pl.BlockSpec((1, 1, PAD), lambda b, n: (b, 0, 0))]
                 + [_const_spec(a) for a in p],
        out_specs=(pl.BlockSpec((1, 1, PAD), lambda b, n: (b, 0, 0)),
                   pl.BlockSpec((1, 1, PAD), lambda b, n: (b, 0, 0))),
        scratch_shapes=[pltpu.VMEM((1, 1024), jnp.float32)],
        compiler_params=pltpu.CompilerParams(
            dimension_semantics=("parallel", "arbitrary")),
        cost_estimate=ce,
    )(x, z3, *p)
    return t_pad.reshape(B, PAD), raw_pad.reshape(B, PAD)


# ----------------------------------------------------------------------------
# deterministic parameter construction (eval-mode BN folded into weights)
# ----------------------------------------------------------------------------
def init_linear(key, cin, cout, scale=0.1):
    k1, k2 = jax.random.split(key)
    w = jax.random.normal(k1, (cin, cout), jnp.float32) * scale
    b = jax.random.normal(k2, (1, cout), jnp.float32) * scale
    return w, b


def init_bn(key, c):
    k1, k2, k3, k4 = jax.random.split(key, 4)
    gamma = 1.0 + 0.1 * jax.random.normal(k1, (c,), jnp.float32)
    beta = 0.1 * jax.random.normal(k2, (c,), jnp.float32)
    mean = 0.1 * jax.random.normal(k3, (c,), jnp.float32)
    var = 0.5 + jax.random.uniform(k4, (c,), jnp.float32)
    return gamma, beta, mean, var


def fold_bn(w, b, bn):
    gamma, beta, mean, var = bn
    s = gamma / jnp.sqrt(var + BN_EPS)
    return w * s[None, :], b * s[None, :] + (beta - mean * s)[None, :]


def folded_layer(key, cin, cout):
    k1, k2 = jax.random.split(key)
    w, b = init_linear(k1, cin, cout)
    return fold_bn(w, b, init_bn(k2, cout))


def pad_cols(w, b, to=PAD):
    cout = w.shape[1]
    wp = jnp.zeros((w.shape[0], to), w.dtype).at[:, :cout].set(w)
    bp = jnp.zeros((1, to), b.dtype).at[:, :cout].set(b)
    return wp, bp


def pad_rows(w, to=PAD):
    return jnp.zeros((to, w.shape[1]), w.dtype).at[:w.shape[0], :].set(w)


def _cast_params(lst):
    # weights -> bf16 (halves DMA/VMEM, bf16-native MXU); biases stay f32
    return [a.astype(jnp.float32) if a.shape[0] == 1 else a.astype(jnp.bfloat16)
            for a in lst]


def init_params(key):
    ks = jax.random.split(key, 12)

    # ---- shape path: PointNetfeat(3) + fc(1024->512->dim_z) ----
    w1, b1 = folded_layer(ks[0], 3, 64)
    w2, b2 = folded_layer(ks[1], 64, 128)
    w3, b3 = folded_layer(ks[2], 128, 1024)
    fw1, fb1 = folded_layer(ks[3], 1024, 512)          # Linear + BN
    fw2, fb2 = init_linear(ks[4], 512, DIM_Z)           # plain Linear
    fw2, fb2 = pad_cols(fw2, fb2)                       # lane-dense 128 output
    shape_p = [w1, b1, w2, b2, w3, b3, fw1, fb1, fw2, fb2]

    # ---- t path: PointNetfeat(3+dim_z) + fc(1024->512->dim_t) + t_extract ----
    cat_dim = 3 + DIM_Z
    c1 = max(cat_dim, 256)
    tw1, tb1 = folded_layer(ks[5], cat_dim, c1)
    tw1x = tw1[:3]                                      # x part of split-K
    tw1z = pad_rows(tw1[3:])                            # z part, rows padded to PAD
    tw2, tb2 = folded_layer(ks[6], c1, 512)
    tw3, tb3 = folded_layer(ks[7], 512, 1024)
    tfw1, tfb1 = folded_layer(ks[8], 1024, 512)
    tfw2, tfb2 = init_linear(ks[9], 512, DIM_T)
    tfw2, tfb2 = pad_cols(tfw2, tfb2)                   # t_hide padded to 128 lanes

    ext, cin = [], DIM_T
    ke = jax.random.split(ks[10], TRANS_LAYERS)
    for i in range(TRANS_LAYERS):
        ew, eb = folded_layer(ke[i], cin, 64)
        if i == 0:
            ew = pad_rows(ew)                           # consume padded t_hide directly
        ext += [ew, eb]
        cin = 64
    ewf, ebf = init_linear(ks[11], 64, sum((3, 2)))
    ewf, ebf = pad_cols(ewf, ebf)                       # raw output padded to 128 lanes
    ext += [ewf, ebf]

    t_p = [tw1x, tw1z, tb1, tw2, tb2, tw3, tb3, tfw1, tfb1, tfw2, tfb2] + ext

    return {"shape": _cast_params(shape_p), "t": _cast_params(t_p)}


# ----------------------------------------------------------------------------
# full PointNetDual forward
# ----------------------------------------------------------------------------
@jax.jit
def pointnet_dual_forward(x, params):
    # shape_encoder: PointNetfeat -> fc  => z_shape (B, dim_z), kept 128-padded
    z_pad = run_shape_path(x, params["shape"])              # (B, 128)
    z_shape = z_pad[:, :DIM_Z]
    # t_encoder: PointNetfeat(cat(x, z)) -> fc, plus fused t_extract.
    # The concat is realized inside the kernel via split-K (no z_hide in HBM).
    t_pad, raw_pad = run_t_path(x, z_pad, params["t"])      # (B, 128) x2
    t_hide = t_pad[:, :DIM_T]
    raw = raw_pad[:, :5]
    trnl = raw[:, 0:3]
    angle = raw[:, 3:5]
    nrm = jnp.sqrt(jnp.sum(angle * angle, axis=1, keepdims=True))
    angle = angle / jnp.maximum(nrm, 1e-12)                  # eps guards zero norm
    return z_shape, t_hide, trnl, angle


if __name__ == "__main__":
    key = jax.random.PRNGKey(0)
    kp, kx = jax.random.split(key)
    params = init_params(kp)

    B, N = 2, 16
    x = jax.random.normal(kx, (B, N, 3), jnp.float32)

    z_shape, t_hide, trnl, angle = pointnet_dual_forward(x, params)
    jax.block_until_ready((z_shape, t_hide, trnl, angle))

    assert z_shape.shape == (B, DIM_Z)
    assert t_hide.shape == (B, DIM_T)
    assert trnl.shape == (B, 3)
    assert angle.shape == (B, 2)
    assert bool(jnp.all(jnp.isfinite(z_shape)))
    assert bool(jnp.all(jnp.isfinite(t_hide)))
    # angle rows are unit-normalized
    assert jnp.allclose(jnp.linalg.norm(angle, axis=1), 1.0, atol=1e-3)
    print("KERNEL_OK")
</pallas_src>

<mosaic_0001>
module attributes {stable_mosaic.version = 11 : i64} {
  func.func @kernel(%arg0: i32, %arg1: i32, %arg2: memref<1x16x3xf32, #tpu.memory_space<vmem>>, %arg3: memref<1x1x128xf32, #tpu.memory_space<vmem>>, %arg4: memref<3x256xbf16, #tpu.memory_space<vmem>>, %arg5: memref<128x256xbf16, #tpu.memory_space<vmem>>, %arg6: memref<1x256xf32, #tpu.memory_space<vmem>>, %arg7: memref<256x512xbf16, #tpu.memory_space<vmem>>, %arg8: memref<1x512xf32, #tpu.memory_space<vmem>>, %arg9: memref<512x1024xbf16, #tpu.memory_space<vmem>>, %arg10: memref<1x1024xf32, #tpu.memory_space<vmem>>, %arg11: memref<1024x512xbf16, #tpu.memory_space<vmem>>, %arg12: memref<1x512xf32, #tpu.memory_space<vmem>>, %arg13: memref<512x128xbf16, #tpu.memory_space<vmem>>, %arg14: memref<1x128xf32, #tpu.memory_space<vmem>>, %arg15: memref<128x64xbf16, #tpu.memory_space<vmem>>, %arg16: memref<1x64xf32, #tpu.memory_space<vmem>>, %arg17: memref<64x64xbf16, #tpu.memory_space<vmem>>, %arg18: memref<1x64xf32, #tpu.memory_space<vmem>>, %arg19: memref<64x128xbf16, #tpu.memory_space<vmem>>, %arg20: memref<1x128xf32, #tpu.memory_space<vmem>>, %arg21: memref<1x1x128xf32, #tpu.memory_space<vmem>>, %arg22: memref<1x1x128xf32, #tpu.memory_space<vmem>>, %arg23: memref<1x1024xf32, #tpu.memory_space<vmem>>) attributes {dimension_semantics = [#tpu.dimension_semantics<parallel>, #tpu.dimension_semantics<arbitrary>], iteration_bounds = array<i64: 2, 1>, scalar_prefetch = 0 : i64, scratch_operands = 1 : i64, tpu.core_type = #tpu.core_type<tc>, window_params = [{transform_indices = @transform_0, window_bounds = array<i64: 1, 16, 3>}, {transform_indices = @transform_1, window_bounds = array<i64: 1, 1, 128>}, {pipeline_mode = #tpu.pipeline_mode<synchronous>, transform_indices = @transform_2, window_bounds = array<i64: 3, 256>}, {pipeline_mode = #tpu.pipeline_mode<synchronous>, transform_indices = @transform_3, window_bounds = array<i64: 128, 256>}, {pipeline_mode = #tpu.pipeline_mode<synchronous>, transform_indices = @transform_4, window_bounds = array<i64: 1, 256>}, {pipeline_mode = #tpu.pipeline_mode<synchronous>, transform_indices = @transform_5, window_bounds = array<i64: 256, 512>}, {pipeline_mode = #tpu.pipeline_mode<synchronous>, transform_indices = @transform_6, window_bounds = array<i64: 1, 512>}, {pipeline_mode = #tpu.pipeline_mode<synchronous>, transform_indices = @transform_7, window_bounds = array<i64: 512, 1024>}, {pipeline_mode = #tpu.pipeline_mode<synchronous>, transform_indices = @transform_8, window_bounds = array<i64: 1, 1024>}, {pipeline_mode = #tpu.pipeline_mode<synchronous>, transform_indices = @transform_9, window_bounds = array<i64: 1024, 512>}, {pipeline_mode = #tpu.pipeline_mode<synchronous>, transform_indices = @transform_10, window_bounds = array<i64: 1, 512>}, {pipeline_mode = #tpu.pipeline_mode<synchronous>, transform_indices = @transform_11, window_bounds = array<i64: 512, 128>}, {pipeline_mode = #tpu.pipeline_mode<synchronous>, transform_indices = @transform_12, window_bounds = array<i64: 1, 128>}, {pipeline_mode = #tpu.pipeline_mode<synchronous>, transform_indices = @transform_13, window_bounds = array<i64: 128, 64>}, {pipeline_mode = #tpu.pipeline_mode<synchronous>, transform_indices = @transform_14, window_bounds = array<i64: 1, 64>}, {pipeline_mode = #tpu.pipeline_mode<synchronous>, transform_indices = @transform_15, window_bounds = array<i64: 64, 64>}, {pipeline_mode = #tpu.pipeline_mode<synchronous>, transform_indices = @transform_16, window_bounds = array<i64: 1, 64>}, {pipeline_mode = #tpu.pipeline_mode<synchronous>, transform_indices = @transform_17, window_bounds = array<i64: 64, 128>}, {pipeline_mode = #tpu.pipeline_mode<synchronous>, transform_indices = @transform_18, window_bounds = array<i64: 1, 128>}, {transform_indices = @transform_19, window_bounds = array<i64: 1, 1, 128>}, {transform_indices = @transform_20, window_bounds = array<i64: 1, 1, 128>}]} {
    %c0_i32 = arith.constant 0 : i32
    %0 = arith.cmpi eq, %arg1, %c0_i32 : i32
    %1 = arith.extui %0 : i1 to i32
    %c0_i32_0 = arith.constant 0 : i32
    %2 = arith.cmpi ne, %1, %c0_i32_0 : i32
    scf.if %2 {
      %cst_32 = arith.constant 0xFF800000 : f32
      %42 = vector.broadcast %cst_32 : f32 to vector<1x1024xf32>
      %c0_33 = arith.constant 0 : index
      %c0_34 = arith.constant 0 : index
      %43 = vector.load %arg23[%c0_33, %c0_34] : memref<1x1024xf32, #tpu.memory_space<vmem>>, vector<1x1024xf32>
      tpu.vector_store %arg23[%c0_33, %c0_34], %42 {strides = array<i32>} : memref<1x1024xf32, #tpu.memory_space<vmem>>, vector<1x1024xf32>,
    } else {
    }
    %c0 = arith.constant 0 : index
    %c0_1 = arith.constant 0 : index
    %c0_2 = arith.constant 0 : index
    %3 = vector.load %arg2[%c0, %c0_1, %c0_2] : memref<1x16x3xf32, #tpu.memory_space<vmem>>, vector<1x16x3xf32>
    %4 = vector.shape_cast %3 : vector<1x16x3xf32> to vector<16x3xf32>
    %5 = arith.truncf %4 : vector<16x3xf32> to vector<16x3xbf16>
    %c0_3 = arith.constant 0 : index
    %c0_4 = arith.constant 0 : index
    %c0_5 = arith.constant 0 : index
    %6 = vector.load %arg3[%c0_3, %c0_4, %c0_5] : memref<1x1x128xf32, #tpu.memory_space<vmem>>, vector<1x1x128xf32>
    %7 = vector.shape_cast %6 : vector<1x1x128xf32> to vector<1x128xf32>
    %8 = arith.truncf %7 : vector<1x128xf32> to vector<1x128xbf16>
    %c0_6 = arith.constant 0 : index
    %c0_7 = arith.constant 0 : index
    %9 = vector.load %arg5[%c0_6, %c0_7] : memref<128x256xbf16, #tpu.memory_space<vmem>>, vector<128x256xbf16>
    %cst = arith.constant dense<0.000000e+00> : vector<1x256xf32>
    %10 = tpu.matmul %8, %9, %cst {dimension_numbers = #tpu.dot_dimension_numbers<[1], [0], [0], [1], [0, 0, 1, 1], [], []>} : vector<1x128xbf16>, vector<128x256xbf16>, vector<1x256xf32> -> vector<1x256xf32>
    %c0_8 = arith.constant 0 : index
    %c0_9 = arith.constant 0 : index
    %11 = vector.load %arg4[%c0_8, %c0_9] : memref<3x256xbf16, #tpu.memory_space<vmem>>, vector<3x256xbf16>
    %cst_10 = arith.constant dense<0.000000e+00> : vector<16x256xf32>
    %12 = tpu.matmul %5, %11, %cst_10 {dimension_numbers = #tpu.dot_dimension_numbers<[1], [0], [0], [1], [0, 0, 1, 1], [], []>} : vector<16x3xbf16>, vector<3x256xbf16>, vector<16x256xf32> -> vector<16x256xf32>
    %13 = vector.broadcast %10 : vector<1x256xf32> to vector<16x256xf32>
    %14 = arith.addf %12, %13 : vector<16x256xf32>
    %c0_11 = arith.constant 0 : index
    %c0_12 = arith.constant 0 : index
    %15 = vector.load %arg6[%c0_11, %c0_12] : memref<1x256xf32, #tpu.memory_space<vmem>>, vector<1x256xf32>
    %16 = vector.broadcast %15 : vector<1x256xf32> to vector<16x256xf32>
    %17 = arith.addf %14, %16 : vector<16x256xf32>
    %cst_13 = arith.constant 0.000000e+00 : f32
    %18 = vector.broadcast %cst_13 : f32 to vector<16x256xf32>
    %19 = arith.maximumf %17, %18 : vector<16x256xf32>
    %20 = arith.truncf %19 : vector<16x256xf32> to vector<16x256xbf16>
    %c0_14 = arith.constant 0 : index
    %c0_15 = arith.constant 0 : index
    %21 = vector.load %arg7[%c0_14, %c0_15] : memref<256x512xbf16, #tpu.memory_space<vmem>>, vector<256x512xbf16>
    %cst_16 = arith.constant dense<0.000000e+00> : vector<16x512xf32>
    %22 = tpu.matmul %20, %21, %cst_16 {dimension_numbers = #tpu.dot_dimension_numbers<[1], [0], [0], [1], [0, 0, 1, 1], [], []>} : vector<16x256xbf16>, vector<256x512xbf16>, vector<16x512xf32> -> vector<16x512xf32>
    %c0_17 = arith.constant 0 : index
    %c0_18 = arith.constant 0 : index
    %23 = vector.load %arg8[%c0_17, %c0_18] : memref<1x512xf32, #tpu.memory_space<vmem>>, vector<1x512xf32>
    %24 = vector.broadcast %23 : vector<1x512xf32> to vector<16x512xf32>
    %25 = arith.addf %22, %24 : vector<16x512xf32>
    %cst_19 = arith.constant 0.000000e+00 : f32
    %26 = vector.broadcast %cst_19 : f32 to vector<16x512xf32>
    %27 = arith.maximumf %25, %26 : vector<16x512xf32>
    %28 = arith.truncf %27 : vector<16x512xf32> to vector<16x512xbf16>
    %c0_20 = arith.constant 0 : index
    %c0_21 = arith.constant 0 : index
    %29 = vector.load %arg9[%c0_20, %c0_21] : memref<512x1024xbf16, #tpu.memory_space<vmem>>, vector<512x1024xbf16>
    %cst_22 = arith.constant dense<0.000000e+00> : vector<16x1024xf32>
    %30 = tpu.matmul %28, %29, %cst_22 {dimension_numbers = #tpu.dot_dimension_numbers<[1], [0], [0], [1], [0, 0, 1, 1], [], []>} : vector<16x512xbf16>, vector<512x1024xbf16>, vector<16x1024xf32> -> vector<16x1024xf32>
    %c0_23 = arith.constant 0 : index
    %c0_24 = arith.constant 0 : index
    %31 = vector.load %arg10[%c0_23, %c0_24] : memref<1x1024xf32, #tpu.memory_space<vmem>>, vector<1x1024xf32>
    %32 = vector.broadcast %31 : vector<1x1024xf32> to vector<16x1024xf32>
    %33 = arith.addf %30, %32 : vector<16x1024xf32>
    %c0_25 = arith.constant 0 : index
    %c0_26 = arith.constant 0 : index
    %34 = vector.load %arg23[%c0_25, %c0_26] : memref<1x1024xf32, #tpu.memory_space<vmem>>, vector<1x1024xf32>
    %cst_27 = arith.constant dense<0xFF800000> : vector<1024xf32>
    %35 = vector.multi_reduction <maximumf>, %33, %cst_27 [0] : vector<16x1024xf32> to vector<1024xf32>
    %36 = vector.shape_cast %35 : vector<1024xf32> to vector<1x1024xf32>
    %37 = arith.maximumf %34, %36 : vector<1x1024xf32>
    %c0_28 = arith.constant 0 : index
    %c0_29 = arith.constant 0 : index
    %38 = vector.load %arg23[%c0_28, %c0_29] : memref<1x1024xf32, #tpu.memory_space<vmem>>, vector<1x1024xf32>
    tpu.vector_store %arg23[%c0_28, %c0_29], %37 {strides = array<i32>} : memref<1x1024xf32, #tpu.memory_space<vmem>>, vector<1x1024xf32>,
    %c0_i32_30 = arith.constant 0 : i32
    %39 = arith.cmpi eq, %arg1, %c0_i32_30 : i32
    %40 = arith.extui %39 : i1 to i32
    %c0_i32_31 = arith.constant 0 : i32
    %41 = arith.cmpi ne, %40, %c0_i32_31 : i32
    scf.if %41 {
      %c0_32 = arith.constant 0 : index
      %c0_33 = arith.constant 0 : index
      %42 = vector.load %arg23[%c0_32, %c0_33] : memref<1x1024xf32, #tpu.memory_space<vmem>>, vector<1x1024xf32>
      %43 = arith.truncf %42 : vector<1x1024xf32> to vector<1x1024xbf16>
      %c0_34 = arith.constant 0 : index
      %c0_35 = arith.constant 0 : index
      %44 = vector.load %arg11[%c0_34, %c0_35] : memref<1024x512xbf16, #tpu.memory_space<vmem>>, vector<1024x512xbf16>
      %cst_36 = arith.constant dense<0.000000e+00> : vector<1x512xf32>
      %45 = tpu.matmul %43, %44, %cst_36 {dimension_numbers = #tpu.dot_dimension_numbers<[1], [0], [0], [1], [0, 0, 1, 1], [], []>} : vector<1x1024xbf16>, vector<1024x512xbf16>, vector<1x512xf32> -> vector<1x512xf32>
      %c0_37 = arith.constant 0 : index
      %c0_38 = arith.constant 0 : index
      %46 = vector.load %arg12[%c0_37, %c0_38] : memref<1x512xf32, #tpu.memory_space<vmem>>, vector<1x512xf32>
      %47 = arith.addf %45, %46 : vector<1x512xf32>
      %cst_39 = arith.constant 0.000000e+00 : f32
      %48 = vector.broadcast %cst_39 : f32 to vector<1x512xf32>
      %49 = arith.maximumf %47, %48 : vector<1x512xf32>
      %50 = arith.truncf %49 : vector<1x512xf32> to vector<1x512xbf16>
      %c0_40 = arith.constant 0 : index
      %c0_41 = arith.constant 0 : index
      %51 = vector.load %arg13[%c0_40, %c0_41] : memref<512x128xbf16, #tpu.memory_space<vmem>>, vector<512x128xbf16>
      %cst_42 = arith.constant dense<0.000000e+00> : vector<1x128xf32>
      %52 = tpu.matmul %50, %51, %cst_42 {dimension_numbers = #tpu.dot_dimension_numbers<[1], [0], [0], [1], [0, 0, 1, 1], [], []>} : vector<1x512xbf16>, vector<512x128xbf16>, vector<1x128xf32> -> vector<1x128xf32>
      %c0_43 = arith.constant 0 : index
      %c0_44 = arith.constant 0 : index
      %53 = vector.load %arg14[%c0_43, %c0_44] : memref<1x128xf32, #tpu.memory_space<vmem>>, vector<1x128xf32>
      %54 = arith.addf %52, %53 : vector<1x128xf32>
      %c0_45 = arith.constant 0 : index
      %c0_46 = arith.constant 0 : index
      %c0_47 = arith.constant 0 : index
      %55 = vector.load %arg21[%c0_45, %c0_46, %c0_47] : memref<1x1x128xf32, #tpu.memory_space<vmem>>, vector<1x1x128xf32>
      %56 = vector.shape_cast %55 : vector<1x1x128xf32> to vector<1x128xf32>
      %57 = vector.shape_cast %54 : vector<1x128xf32> to vector<1x1x128xf32>
      tpu.vector_store %arg21[%c0_45, %c0_46, %c0_47], %57 {strides = array<i32>} : memref<1x1x128xf32, #tpu.memory_space<vmem>>, vector<1x1x128xf32>,
      %58 = arith.truncf %54 : vector<1x128xf32> to vector<1x128xbf16>
      %c0_48 = arith.constant 0 : index
      %c0_49 = arith.constant 0 : index
      %59 = vector.load %arg15[%c0_48, %c0_49] : memref<128x64xbf16, #tpu.memory_space<vmem>>, vector<128x64xbf16>
      %cst_50 = arith.constant dense<0.000000e+00> : vector<1x64xf32>
      %60 = tpu.matmul %58, %59, %cst_50 {dimension_numbers = #tpu.dot_dimension_numbers<[1], [0], [0], [1], [0, 0, 1, 1], [], []>} : vector<1x128xbf16>, vector<128x64xbf16>, vector<1x64xf32> -> vector<1x64xf32>
      %c0_51 = arith.constant 0 : index
      %c0_52 = arith.constant 0 : index
      %61 = vector.load %arg16[%c0_51, %c0_52] : memref<1x64xf32, #tpu.memory_space<vmem>>, vector<1x64xf32>
      %62 = arith.addf %60, %61 : vector<1x64xf32>
      %cst_53 = arith.constant 0.000000e+00 : f32
      %63 = vector.broadcast %cst_53 : f32 to vector<1x64xf32>
      %64 = arith.maximumf %62, %63 : vector<1x64xf32>
      %65 = arith.truncf %64 : vector<1x64xf32> to vector<1x64xbf16>
      %c0_54 = arith.constant 0 : index
      %c0_55 = arith.constant 0 : index
      %66 = vector.load %arg17[%c0_54, %c0_55] : memref<64x64xbf16, #tpu.memory_space<vmem>>, vector<64x64xbf16>
      %cst_56 = arith.constant dense<0.000000e+00> : vector<1x64xf32>
      %67 = tpu.matmul %65, %66, %cst_56 {dimension_numbers = #tpu.dot_dimension_numbers<[1], [0], [0], [1], [0, 0, 1, 1], [], []>} : vector<1x64xbf16>, vector<64x64xbf16>, vector<1x64xf32> -> vector<1x64xf32>
      %c0_57 = arith.constant 0 : index
      %c0_58 = arith.constant 0 : index
      %68 = vector.load %arg18[%c0_57, %c0_58] : memref<1x64xf32, #tpu.memory_space<vmem>>, vector<1x64xf32>
      %69 = arith.addf %67, %68 : vector<1x64xf32>
      %cst_59 = arith.constant 0.000000e+00 : f32
      %70 = vector.broadcast %cst_59 : f32 to vector<1x64xf32>
      %71 = arith.maximumf %69, %70 : vector<1x64xf32>
      %72 = arith.truncf %71 : vector<1x64xf32> to vector<1x64xbf16>
      %c0_60 = arith.constant 0 : index
      %c0_61 = arith.constant 0 : index
      %73 = vector.load %arg19[%c0_60, %c0_61] : memref<64x128xbf16, #tpu.memory_space<vmem>>, vector<64x128xbf16>
      %cst_62 = arith.constant dense<0.000000e+00> : vector<1x128xf32>
      %74 = tpu.matmul %72, %73, %cst_62 {dimension_numbers = #tpu.dot_dimension_numbers<[1], [0], [0], [1], [0, 0, 1, 1], [], []>} : vector<1x64xbf16>, vector<64x128xbf16>, vector<1x128xf32> -> vector<1x128xf32>
      %c0_63 = arith.constant 0 : index
      %c0_64 = arith.constant 0 : index
      %75 = vector.load %arg20[%c0_63, %c0_64] : memref<1x128xf32, #tpu.memory_space<vmem>>, vector<1x128xf32>
      %76 = arith.addf %74, %75 : vector<1x128xf32>
      %c0_65 = arith.constant 0 : index
      %c0_66 = arith.constant 0 : index
      %c0_67 = arith.constant 0 : index
      %77 = vector.load %arg22[%c0_65, %c0_66, %c0_67] : memref<1x1x128xf32, #tpu.memory_space<vmem>>, vector<1x1x128xf32>
      %78 = vector.shape_cast %77 : vector<1x1x128xf32> to vector<1x128xf32>
      %79 = vector.shape_cast %76 : vector<1x128xf32> to vector<1x1x128xf32>
      tpu.vector_store %arg22[%c0_65, %c0_66, %c0_67], %79 {strides = array<i32>} : memref<1x1x128xf32, #tpu.memory_space<vmem>>, vector<1x1x128xf32>,
    } else {
    }
    return
  }
  func.func @transform_0(%arg0: i32, %arg1: i32) -> (i32, i32, i32) {
    %c0_i32 = arith.constant 0 : i32
    %c0_i32_0 = arith.constant 0 : i32
    return %arg0, %arg1, %c0_i32 : i32, i32, i32
  }
  func.func @transform_1(%arg0: i32, %arg1: i32) -> (i32, i32, i32) {
    %c0_i32 = arith.constant 0 : i32
    %c0_i32_0 = arith.constant 0 : i32
    %c0_i32_1 = arith.constant 0 : i32
    return %arg0, %c0_i32, %c0_i32_0 : i32, i32, i32
  }
  func.func @transform_2(%arg0: i32, %arg1: i32) -> (i32, i32) {
    %c0_i32 = arith.constant 0 : i32
    %c0_i32_0 = arith.constant 0 : i32
    %c0_i32_1 = arith.constant 0 : i32
    return %c0_i32, %c0_i32_0 : i32, i32
  }
  func.func @transform_3(%arg0: i32, %arg1: i32) -> (i32, i32) {
    %c0_i32 = arith.constant 0 : i32
    %c0_i32_0 = arith.constant 0 : i32
    %c0_i32_1 = arith.constant 0 : i32
    return %c0_i32, %c0_i32_0 : i32, i32
  }
  func.func @transform_4(%arg0: i32, %arg1: i32) -> (i32, i32) {
    %c0_i32 = arith.constant 0 : i32
    %c0_i32_0 = arith.constant 0 : i32
    %c0_i32_1 = arith.constant 0 : i32
    return %c0_i32, %c0_i32_0 : i32, i32
  }
  func.func @transform_5(%arg0: i32, %arg1: i32) -> (i32, i32) {
    %c0_i32 = arith.constant 0 : i32
    %c0_i32_0 = arith.constant 0 : i32
    %c0_i32_1 = arith.constant 0 : i32
    return %c0_i32, %c0_i32_0 : i32, i32
  }
  func.func @transform_6(%arg0: i32, %arg1: i32) -> (i32, i32) {
    %c0_i32 = arith.constant 0 : i32
    %c0_i32_0 = arith.constant 0 : i32
    %c0_i32_1 = arith.constant 0 : i32
    return %c0_i32, %c0_i32_0 : i32, i32
  }
  func.func @transform_7(%arg0: i32, %arg1: i32) -> (i32, i32) {
    %c0_i32 = arith.constant 0 : i32
    %c0_i32_0 = arith.constant 0 : i32
    %c0_i32_1 = arith.constant 0 : i32
    return %c0_i32, %c0_i32_0 : i32, i32
  }
  func.func @transform_8(%arg0: i32, %arg1: i32) -> (i32, i32) {
    %c0_i32 = arith.constant 0 : i32
    %c0_i32_0 = arith.constant 0 : i32
    %c0_i32_1 = arith.constant 0 : i32
    return %c0_i32, %c0_i32_0 : i32, i32
  }
  func.func @transform_9(%arg0: i32, %arg1: i32) -> (i32, i32) {
    %c0_i32 = arith.constant 0 : i32
    %c0_i32_0 = arith.constant 0 : i32
    %c0_i32_1 = arith.constant 0 : i32
    return %c0_i32, %c0_i32_0 : i32, i32
  }
  func.func @transform_10(%arg0: i32, %arg1: i32) -> (i32, i32) {
    %c0_i32 = arith.constant 0 : i32
    %c0_i32_0 = arith.constant 0 : i32
    %c0_i32_1 = arith.constant 0 : i32
    return %c0_i32, %c0_i32_0 : i32, i32
  }
  func.func @transform_11(%arg0: i32, %arg1: i32) -> (i32, i32) {
    %c0_i32 = arith.constant 0 : i32
    %c0_i32_0 = arith.constant 0 : i32
    %c0_i32_1 = arith.constant 0 : i32
    return %c0_i32, %c0_i32_0 : i32, i32
  }
  func.func @transform_12(%arg0: i32, %arg1: i32) -> (i32, i32) {
    %c0_i32 = arith.constant 0 : i32
    %c0_i32_0 = arith.constant 0 : i32
    %c0_i32_1 = arith.constant 0 : i32
    return %c0_i32, %c0_i32_0 : i32, i32
  }
  func.func @transform_13(%arg0: i32, %arg1: i32) -> (i32, i32) {
    %c0_i32 = arith.constant 0 : i32
    %c0_i32_0 = arith.constant 0 : i32
    %c0_i32_1 = arith.constant 0 : i32
    return %c0_i32, %c0_i32_0 : i32, i32
  }
  func.func @transform_14(%arg0: i32, %arg1: i32) -> (i32, i32) {
    %c0_i32 = arith.constant 0 : i32
    %c0_i32_0 = arith.constant 0 : i32
    %c0_i32_1 = arith.constant 0 : i32
    return %c0_i32, %c0_i32_0 : i32, i32
  }
  func.func @transform_15(%arg0: i32, %arg1: i32) -> (i32, i32) {
    %c0_i32 = arith.constant 0 : i32
    %c0_i32_0 = arith.constant 0 : i32
    %c0_i32_1 = arith.constant 0 : i32
    return %c0_i32, %c0_i32_0 : i32, i32
  }
  func.func @transform_16(%arg0: i32, %arg1: i32) -> (i32, i32) {
    %c0_i32 = arith.constant 0 : i32
    %c0_i32_0 = arith.constant 0 : i32
    %c0_i32_1 = arith.constant 0 : i32
    return %c0_i32, %c0_i32_0 : i32, i32
  }
  func.func @transform_17(%arg0: i32, %arg1: i32) -> (i32, i32) {
    %c0_i32 = arith.constant 0 : i32
    %c0_i32_0 = arith.constant 0 : i32
    %c0_i32_1 = arith.constant 0 : i32
    return %c0_i32, %c0_i32_0 : i32, i32
  }
  func.func @transform_18(%arg0: i32, %arg1: i32) -> (i32, i32) {
    %c0_i32 = arith.constant 0 : i32
    %c0_i32_0 = arith.constant 0 : i32
    %c0_i32_1 = arith.constant 0 : i32
    return %c0_i32, %c0_i32_0 : i32, i32
  }
  func.func @transform_19(%arg0: i32, %arg1: i32) -> (i32, i32, i32) {
    %c0_i32 = arith.constant 0 : i32
    %c0_i32_0 = arith.constant 0 : i32
    %c0_i32_1 = arith.constant 0 : i32
    return %arg0, %c0_i32, %c0_i32_0 : i32, i32, i32
  }
  func.func @transform_20(%arg0: i32, %arg1: i32) -> (i32, i32, i32) {
    %c0_i32 = arith.constant 0 : i32
    %c0_i32_0 = arith.constant 0 : i32
    %c0_i32_1 = arith.constant 0 : i32
    return %arg0, %c0_i32, %c0_i32_0 : i32, i32, i32
  }
}

module attributes {stable_mosaic.version = 11 : i64} {
  func.func @shape_path_kernel(%arg0: i32, %arg1: i32, %arg2: memref<1x16x3xf32, #tpu.memory_space<vmem>>, %arg3: memref<3x64xbf16, #tpu.memory_space<vmem>>, %arg4: memref<1x64xf32, #tpu.memory_space<vmem>>, %arg5: memref<64x128xbf16, #tpu.memory_space<vmem>>, %arg6: memref<1x128xf32, #tpu.memory_space<vmem>>, %arg7: memref<128x1024xbf16, #tpu.memory_space<vmem>>, %arg8: memref<1x1024xf32, #tpu.memory_space<vmem>>, %arg9: memref<1024x512xbf16, #tpu.memory_space<vmem>>, %arg10: memref<1x512xf32, #tpu.memory_space<vmem>>, %arg11: memref<512x128xbf16, #tpu.memory_space<vmem>>, %arg12: memref<1x128xf32, #tpu.memory_space<vmem>>, %arg13: memref<1x1x128xf32, #tpu.memory_space<vmem>>, %arg14: memref<1x1024xf32, #tpu.memory_space<vmem>>) attributes {dimension_semantics = [#tpu.dimension_semantics<parallel>, #tpu.dimension_semantics<arbitrary>], iteration_bounds = array<i64: 2, 1>, scalar_prefetch = 0 : i64, scratch_operands = 1 : i64, tpu.core_type = #tpu.core_type<tc>, window_params = [{transform_indices = @transform_0, window_bounds = array<i64: 1, 16, 3>}, {pipeline_mode = #tpu.pipeline_mode<synchronous>, transform_indices = @transform_1, window_bounds = array<i64: 3, 64>}, {pipeline_mode = #tpu.pipeline_mode<synchronous>, transform_indices = @transform_2, window_bounds = array<i64: 1, 64>}, {pipeline_mode = #tpu.pipeline_mode<synchronous>, transform_indices = @transform_3, window_bounds = array<i64: 64, 128>}, {pipeline_mode = #tpu.pipeline_mode<synchronous>, transform_indices = @transform_4, window_bounds = array<i64: 1, 128>}, {pipeline_mode = #tpu.pipeline_mode<synchronous>, transform_indices = @transform_5, window_bounds = array<i64: 128, 1024>}, {pipeline_mode = #tpu.pipeline_mode<synchronous>, transform_indices = @transform_6, window_bounds = array<i64: 1, 1024>}, {pipeline_mode = #tpu.pipeline_mode<synchronous>, transform_indices = @transform_7, window_bounds = array<i64: 1024, 512>}, {pipeline_mode = #tpu.pipeline_mode<synchronous>, transform_indices = @transform_8, window_bounds = array<i64: 1, 512>}, {pipeline_mode = #tpu.pipeline_mode<synchronous>, transform_indices = @transform_9, window_bounds = array<i64: 512, 128>}, {pipeline_mode = #tpu.pipeline_mode<synchronous>, transform_indices = @transform_10, window_bounds = array<i64: 1, 128>}, {transform_indices = @transform_11, window_bounds = array<i64: 1, 1, 128>}]} {
    %c0_i32 = arith.constant 0 : i32
    %0 = arith.cmpi eq, %arg1, %c0_i32 : i32
    %1 = arith.extui %0 : i1 to i32
    %c0_i32_0 = arith.constant 0 : i32
    %2 = arith.cmpi ne, %1, %c0_i32_0 : i32
    scf.if %2 {
      %cst_26 = arith.constant 0xFF800000 : f32
      %35 = vector.broadcast %cst_26 : f32 to vector<1x1024xf32>
      %c0_27 = arith.constant 0 : index
      %c0_28 = arith.constant 0 : index
      %36 = vector.load %arg14[%c0_27, %c0_28] : memref<1x1024xf32, #tpu.memory_space<vmem>>, vector<1x1024xf32>
      tpu.vector_store %arg14[%c0_27, %c0_28], %35 {strides = array<i32>} : memref<1x1024xf32, #tpu.memory_space<vmem>>, vector<1x1024xf32>,
    } else {
    }
    %c0 = arith.constant 0 : index
    %c0_1 = arith.constant 0 : index
    %c0_2 = arith.constant 0 : index
    %3 = vector.load %arg2[%c0, %c0_1, %c0_2] : memref<1x16x3xf32, #tpu.memory_space<vmem>>, vector<1x16x3xf32>
    %4 = vector.shape_cast %3 : vector<1x16x3xf32> to vector<16x3xf32>
    %5 = arith.truncf %4 : vector<16x3xf32> to vector<16x3xbf16>
    %c0_3 = arith.constant 0 : index
    %c0_4 = arith.constant 0 : index
    %6 = vector.load %arg3[%c0_3, %c0_4] : memref<3x64xbf16, #tpu.memory_space<vmem>>, vector<3x64xbf16>
    %cst = arith.constant dense<0.000000e+00> : vector<16x64xf32>
    %7 = tpu.matmul %5, %6, %cst {dimension_numbers = #tpu.dot_dimension_numbers<[1], [0], [0], [1], [0, 0, 1, 1], [], []>} : vector<16x3xbf16>, vector<3x64xbf16>, vector<16x64xf32> -> vector<16x64xf32>
    %c0_5 = arith.constant 0 : index
    %c0_6 = arith.constant 0 : index
    %8 = vector.load %arg4[%c0_5, %c0_6] : memref<1x64xf32, #tpu.memory_space<vmem>>, vector<1x64xf32>
    %9 = vector.broadcast %8 : vector<1x64xf32> to vector<16x64xf32>
    %10 = arith.addf %7, %9 : vector<16x64xf32>
    %cst_7 = arith.constant 0.000000e+00 : f32
    %11 = vector.broadcast %cst_7 : f32 to vector<16x64xf32>
    %12 = arith.maximumf %10, %11 : vector<16x64xf32>
    %13 = arith.truncf %12 : vector<16x64xf32> to vector<16x64xbf16>
    %c0_8 = arith.constant 0 : index
    %c0_9 = arith.constant 0 : index
    %14 = vector.load %arg5[%c0_8, %c0_9] : memref<64x128xbf16, #tpu.memory_space<vmem>>, vector<64x128xbf16>
    %cst_10 = arith.constant dense<0.000000e+00> : vector<16x128xf32>
    %15 = tpu.matmul %13, %14, %cst_10 {dimension_numbers = #tpu.dot_dimension_numbers<[1], [0], [0], [1], [0, 0, 1, 1], [], []>} : vector<16x64xbf16>, vector<64x128xbf16>, vector<16x128xf32> -> vector<16x128xf32>
    %c0_11 = arith.constant 0 : index
    %c0_12 = arith.constant 0 : index
    %16 = vector.load %arg6[%c0_11, %c0_12] : memref<1x128xf32, #tpu.memory_space<vmem>>, vector<1x128xf32>
    %17 = vector.broadcast %16 : vector<1x128xf32> to vector<16x128xf32>
    %18 = arith.addf %15, %17 : vector<16x128xf32>
    %cst_13 = arith.constant 0.000000e+00 : f32
    %19 = vector.broadcast %cst_13 : f32 to vector<16x128xf32>
    %20 = arith.maximumf %18, %19 : vector<16x128xf32>
    %21 = arith.truncf %20 : vector<16x128xf32> to vector<16x128xbf16>
    %c0_14 = arith.constant 0 : index
    %c0_15 = arith.constant 0 : index
    %22 = vector.load %arg7[%c0_14, %c0_15] : memref<128x1024xbf16, #tpu.memory_space<vmem>>, vector<128x1024xbf16>
    %cst_16 = arith.constant dense<0.000000e+00> : vector<16x1024xf32>
    %23 = tpu.matmul %21, %22, %cst_16 {dimension_numbers = #tpu.dot_dimension_numbers<[1], [0], [0], [1], [0, 0, 1, 1], [], []>} : vector<16x128xbf16>, vector<128x1024xbf16>, vector<16x1024xf32> -> vector<16x1024xf32>
    %c0_17 = arith.constant 0 : index
    %c0_18 = arith.constant 0 : index
    %24 = vector.load %arg8[%c0_17, %c0_18] : memref<1x1024xf32, #tpu.memory_space<vmem>>, vector<1x1024xf32>
    %25 = vector.broadcast %24 : vector<1x1024xf32> to vector<16x1024xf32>
    %26 = arith.addf %23, %25 : vector<16x1024xf32>
    %c0_19 = arith.constant 0 : index
    %c0_20 = arith.constant 0 : index
    %27 = vector.load %arg14[%c0_19, %c0_20] : memref<1x1024xf32, #tpu.memory_space<vmem>>, vector<1x1024xf32>
    %cst_21 = arith.constant dense<0xFF800000> : vector<1024xf32>
    %28 = vector.multi_reduction <maximumf>, %26, %cst_21 [0] : vector<16x1024xf32> to vector<1024xf32>
    %29 = vector.shape_cast %28 : vector<1024xf32> to vector<1x1024xf32>
    %30 = arith.maximumf %27, %29 : vector<1x1024xf32>
    %c0_22 = arith.constant 0 : index
    %c0_23 = arith.constant 0 : index
    %31 = vector.load %arg14[%c0_22, %c0_23] : memref<1x1024xf32, #tpu.memory_space<vmem>>, vector<1x1024xf32>
    tpu.vector_store %arg14[%c0_22, %c0_23], %30 {strides = array<i32>} : memref<1x1024xf32, #tpu.memory_space<vmem>>, vector<1x1024xf32>,
    %c0_i32_24 = arith.constant 0 : i32
    %32 = arith.cmpi eq, %arg1, %c0_i32_24 : i32
    %33 = arith.extui %32 : i1 to i32
    %c0_i32_25 = arith.constant 0 : i32
    %34 = arith.cmpi ne, %33, %c0_i32_25 : i32
    scf.if %34 {
      %c0_26 = arith.constant 0 : index
      %c0_27 = arith.constant 0 : index
      %35 = vector.load %arg14[%c0_26, %c0_27] : memref<1x1024xf32, #tpu.memory_space<vmem>>, vector<1x1024xf32>
      %36 = arith.truncf %35 : vector<1x1024xf32> to vector<1x1024xbf16>
      %c0_28 = arith.constant 0 : index
      %c0_29 = arith.constant 0 : index
      %37 = vector.load %arg9[%c0_28, %c0_29] : memref<1024x512xbf16, #tpu.memory_space<vmem>>, vector<1024x512xbf16>
      %cst_30 = arith.constant dense<0.000000e+00> : vector<1x512xf32>
      %38 = tpu.matmul %36, %37, %cst_30 {dimension_numbers = #tpu.dot_dimension_numbers<[1], [0], [0], [1], [0, 0, 1, 1], [], []>} : vector<1x1024xbf16>, vector<1024x512xbf16>, vector<1x512xf32> -> vector<1x512xf32>
      %c0_31 = arith.constant 0 : index
      %c0_32 = arith.constant 0 : index
      %39 = vector.load %arg10[%c0_31, %c0_32] : memref<1x512xf32, #tpu.memory_space<vmem>>, vector<1x512xf32>
      %40 = arith.addf %38, %39 : vector<1x512xf32>
      %cst_33 = arith.constant 0.000000e+00 : f32
      %41 = vector.broadcast %cst_33 : f32 to vector<1x512xf32>
      %42 = arith.maximumf %40, %41 : vector<1x512xf32>
      %43 = arith.truncf %42 : vector<1x512xf32> to vector<1x512xbf16>
      %c0_34 = arith.constant 0 : index
      %c0_35 = arith.constant 0 : index
      %44 = vector.load %arg11[%c0_34, %c0_35] : memref<512x128xbf16, #tpu.memory_space<vmem>>, vector<512x128xbf16>
      %cst_36 = arith.constant dense<0.000000e+00> : vector<1x128xf32>
      %45 = tpu.matmul %43, %44, %cst_36 {dimension_numbers = #tpu.dot_dimension_numbers<[1], [0], [0], [1], [0, 0, 1, 1], [], []>} : vector<1x512xbf16>, vector<512x128xbf16>, vector<1x128xf32> -> vector<1x128xf32>
      %c0_37 = arith.constant 0 : index
      %c0_38 = arith.constant 0 : index
      %46 = vector.load %arg12[%c0_37, %c0_38] : memref<1x128xf32, #tpu.memory_space<vmem>>, vector<1x128xf32>
      %47 = arith.addf %45, %46 : vector<1x128xf32>
      %c0_39 = arith.constant 0 : index
      %c0_40 = arith.constant 0 : index
      %c0_41 = arith.constant 0 : index
      %48 = vector.load %arg13[%c0_39, %c0_40, %c0_41] : memref<1x1x128xf32, #tpu.memory_space<vmem>>, vector<1x1x128xf32>
      %49 = vector.shape_cast %48 : vector<1x1x128xf32> to vector<1x128xf32>
      %50 = vector.shape_cast %47 : vector<1x128xf32> to vector<1x1x128xf32>
      tpu.vector_store %arg13[%c0_39, %c0_40, %c0_41], %50 {strides = array<i32>} : memref<1x1x128xf32, #tpu.memory_space<vmem>>, vector<1x1x128xf32>,
    } else {
    }
    return
  }
  func.func @transform_0(%arg0: i32, %arg1: i32) -> (i32, i32, i32) {
    %c0_i32 = arith.constant 0 : i32
    %c0_i32_0 = arith.constant 0 : i32
    return %arg0, %arg1, %c0_i32 : i32, i32, i32
  }
  func.func @transform_1(%arg0: i32, %arg1: i32) -> (i32, i32) {
    %c0_i32 = arith.constant 0 : i32
    %c0_i32_0 = arith.constant 0 : i32
    %c0_i32_1 = arith.constant 0 : i32
    return %c0_i32, %c0_i32_0 : i32, i32
  }
  func.func @transform_2(%arg0: i32, %arg1: i32) -> (i32, i32) {
    %c0_i32 = arith.constant 0 : i32
    %c0_i32_0 = arith.constant 0 : i32
    %c0_i32_1 = arith.constant 0 : i32
    return %c0_i32, %c0_i32_0 : i32, i32
  }
  func.func @transform_3(%arg0: i32, %arg1: i32) -> (i32, i32) {
    %c0_i32 = arith.constant 0 : i32
    %c0_i32_0 = arith.constant 0 : i32
    %c0_i32_1 = arith.constant 0 : i32
    return %c0_i32, %c0_i32_0 : i32, i32
  }
  func.func @transform_4(%arg0: i32, %arg1: i32) -> (i32, i32) {
    %c0_i32 = arith.constant 0 : i32
    %c0_i32_0 = arith.constant 0 : i32
    %c0_i32_1 = arith.constant 0 : i32
    return %c0_i32, %c0_i32_0 : i32, i32
  }
  func.func @transform_5(%arg0: i32, %arg1: i32) -> (i32, i32) {
    %c0_i32 = arith.constant 0 : i32
    %c0_i32_0 = arith.constant 0 : i32
    %c0_i32_1 = arith.constant 0 : i32
    return %c0_i32, %c0_i32_0 : i32, i32
  }
  func.func @transform_6(%arg0: i32, %arg1: i32) -> (i32, i32) {
    %c0_i32 = arith.constant 0 : i32
    %c0_i32_0 = arith.constant 0 : i32
    %c0_i32_1 = arith.constant 0 : i32
    return %c0_i32, %c0_i32_0 : i32, i32
  }
  func.func @transform_7(%arg0: i32, %arg1: i32) -> (i32, i32) {
    %c0_i32 = arith.constant 0 : i32
    %c0_i32_0 = arith.constant 0 : i32
    %c0_i32_1 = arith.constant 0 : i32
    return %c0_i32, %c0_i32_0 : i32, i32
  }
  func.func @transform_8(%arg0: i32, %arg1: i32) -> (i32, i32) {
    %c0_i32 = arith.constant 0 : i32
    %c0_i32_0 = arith.constant 0 : i32
    %c0_i32_1 = arith.constant 0 : i32
    return %c0_i32, %c0_i32_0 : i32, i32
  }
  func.func @transform_9(%arg0: i32, %arg1: i32) -> (i32, i32) {
    %c0_i32 = arith.constant 0 : i32
    %c0_i32_0 = arith.constant 0 : i32
    %c0_i32_1 = arith.constant 0 : i32
    return %c0_i32, %c0_i32_0 : i32, i32
  }
  func.func @transform_10(%arg0: i32, %arg1: i32) -> (i32, i32) {
    %c0_i32 = arith.constant 0 : i32
    %c0_i32_0 = arith.constant 0 : i32
    %c0_i32_1 = arith.constant 0 : i32
    return %c0_i32, %c0_i32_0 : i32, i32
  }
  func.func @transform_11(%arg0: i32, %arg1: i32) -> (i32, i32, i32) {
    %c0_i32 = arith.constant 0 : i32
    %c0_i32_0 = arith.constant 0 : i32
    %c0_i32_1 = arith.constant 0 : i32
    return %arg0, %c0_i32, %c0_i32_0 : i32, i32, i32
  }
}

</mosaic_0001>

<bundles_post_ra>
// kernel: pointnet_dual_forward.2
= control target key start
LH: loop header
LB: loop body
LE: loop exit
PB: predicated region body
PF: predicated region fallthrough
CT: control target
= control target key end

     0   :  { %s5709_s0 = inlined_call_operand.vmem [shape: f32[2,16,3], index: 0, kind: input, shape index: {}]   ;;  %s5710_s1 = inlined_call_operand.hbm [shape: bf16[3,64], index: 1, kind: input, shape index: {}]   ;;  %s5711_s2 = inlined_call_operand.hbm [shape: f32[1,64], index: 2, kind: input, shape index: {}]   ;;  %s5712_s3 = inlined_call_operand.hbm [shape: bf16[64,128], index: 3, kind: input, shape index: {}]   ;;  %s5713_s4 = inlined_call_operand.hbm [shape: f32[1,128], index: 4, kind: input, shape index: {}]   ;;  %s5714_s5 = inlined_call_operand.hbm [shape: bf16[128,1024], index: 5, kind: input, shape index: {}]   ;;  %s5715_s6 = inlined_call_operand.hbm [shape: f32[1,1024], index: 6, kind: input, shape index: {}]   ;;  %s5716_s7 = inlined_call_operand.hbm [shape: bf16[1024,512], index: 7, kind: input, shape index: {}]   ;;  %s5717_s8 = inlined_call_operand.hbm [shape: f32[1,512], index: 8, kind: input, shape index: {}]   ;;  %s5718_s9 = inlined_call_operand.hbm [shape: bf16[512,128], index: 9, kind: input, shape index: {}]   ;;  %s5719_s10 = inlined_call_operand.hbm [shape: f32[1,128], index: 10, kind: input, shape index: {}]   ;;  %s5720_s11 = inlined_call_operand.vmem [shape: f32[2,1,128], index: 11, kind: output, shape index: {}]  }
   0x1   :  { %5727 = sst [smem:[#allocation26_spill]] %s5710_s1 }
   0x2   :  { %5728 = sst [smem:[#allocation27_spill]] %s5711_s2 }
   0x3   :  { %5729 = sst [smem:[#allocation28_spill]] %s5712_s3 }
   0x4   :  { %5730 = sst [smem:[#allocation29_spill]] %s5713_s4 }
   0x5   :  { %16 = vsyncpa [#allocation4], 0 }
   0x6   :  { %17 = vsyncpa [#allocation6], 0 }
   0x7   :  { %18 = vsyncpa [#allocation9], 0 }
   0x8   :  { %19 = vsyncpa [#allocation12], 0 }
   0x9   :  { %20 = vsyncpa [#allocation15], 0 }
   0xa   :  { %21 = vsyncpa [#allocation18], 0  ;;  %s5316_s17 = smov 0   ;;  %s5318_s18 = smov 0  }
   0xb   :  { %s5320_s19 = smov 0  }
   0xc LB: > { %5731 = sst [smem:[#allocation25_spill]] %s5233_s19  ;;  %s5235_s20 = smov [#allocation5]   ;;  %s5233_s19 = sphi %s5320_s19, %s5749_s19   ;;  %s5229_s18 = sphi %s5318_s18, %s5748_s18   ;;  %s5225_s17 = sphi %s5316_s17, %s5747_s17  }
   0xd   : > { %s332_s21 = sshll.u32 %s5235_s20, 4  ;;  %s3864_s22 = sadd.s32 4294967295, %s5233_s19   ;;  %s5338_s21 = int_to_ptr.vmem [resolvable:$true] %s332_s21 }
   0xe   : > { %p3866_p0 = scmp.ge.s32.totalorder %s5233_s19, 1  ;;  %p308_p1 = scmp.lt.s32.totalorder %s5233_s19, 3 }
   0xf   : > { %p5334_p2 = scmp.eq.s32.totalorder %s3864_s22, 0  ;;  %s5236_s25 = smov [#allocation8]  }
  0x10   : > { %p5340_p3 = pnand %p3866_p0, %p308_p1  ;;  %s356_s26 = sshll.u32 %s5236_s25, 4  ;;  %s5346_s26 = int_to_ptr.vmem [resolvable:$true] %s356_s26 }
  0x11   : > { %s5732_s23 = scalar_select %p5334_p2, 1, 0 }
  0x12   : > { %s5733_s24 = scalar_select %p5340_p3, 1, 0 }
  0x13   : > { %p4391_p4 = pneg %p5340_p3  ;;  %s5237_s27 = smov [#allocation11]  }
  0x14   : > { %s380_s28 = sshll.u32 %s5237_s27, 4  ;;  %s5238_s30 = smov [#allocation14]   ;;  %s5354_s28 = int_to_ptr.vmem [resolvable:$true] %s380_s28 }
  0x15   : > { %p5350_p5 = pnand %p5334_p2, %p4391_p4  ;;  %s404_s12 = sshll.u32 %s5238_s30, 4  ;;  %s5356_s12 = int_to_ptr.vmem [resolvable:$true] %s404_s12 }
  0x16   : > { %s5735_s2 = sld [smem:[#allocation27_spill]] }
  0x17   : > { %p5366_p7 = pneg %p5350_p5 }
  0x1c   : > { %s4907_s15 = scalar_lea.hbm %s5735_s2, 16 }
  0x1d   : > { %p4908_p6 = scmp.ne.s32.totalorder %s5735_s2, %s4907_s15  ;;  %p4914_p10 = scmp.lt.u32.totalorder %s4907_s15, %s5735_s2 }
  0x1f   : > { %p4910_p8 = pnand %p5366_p7, %p4908_p6 }
  0x21   : > { %p4911_p9 = pneg %p4910_p8 }
  0x23   : > { %p4916_p11 = pnand %p4914_p10, %p4911_p9 }
  0x25   : > { %4919 = shalt.err (!%p4916_p11)
}
  0x26   : > { %s4920_s30 = scalar_lea.vmem %s5338_s21, 16  ;;  %s4927_s13 = scalar_lea.vmem %s5338_s21, 32 }
  0x27   : > { %p4921_p12 = scmp.ne.s32.totalorder %s5338_s21, %s4920_s30  ;;  %p4928_p1 = scmp.lt.s32.totalorder %s5338_s21, %s5338_s21 }
  0x28   : > { %p4929_p4 = scmp.lt.s32.totalorder %s4927_s13, %s4920_s30 }
  0x29   : > { %p4923_p13 = pnand %p4921_p12, %p5366_p7 }
  0x2a   : > { %p4930_p6 = por %p4929_p4, %p4928_p1 }
  0x2b   : > { %p4924_p0 = pneg %p4923_p13 }
  0x2d   : > { %p4931_p8 = pnand %p4930_p6, %p4924_p0 }
  0x2f   : > { %4934 = shalt.err (!%p4931_p8)
}
  0x30   : > { %4397 = dma.hbm_to_vmem [thread:$0]  (!%p5350_p5), %s5735_s2, 16, %s5338_s21, [#allocation6]  }
  0x31   : > { %s5737_s4 = sld [smem:[#allocation29_spill]] }
  0x37   : > { %s4935_s25 = scalar_lea.hbm %s5737_s4, 16 }
  0x38   : > { %p4936_p9 = scmp.ne.s32.totalorder %s5737_s4, %s4935_s25  ;;  %p4942_p12 = scmp.lt.u32.totalorder %s4935_s25, %s5737_s4 }
  0x3a   : > { %p4938_p10 = pnand %p4936_p9, %p5366_p7 }
  0x3c   : > { %p4939_p11 = pneg %p4938_p10 }
  0x3e   : > { %p4944_p13 = pnand %p4942_p12, %p4939_p11 }
  0x40   : > { %4947 = shalt.err (!%p4944_p13)
}
  0x41   : > { %s4948_s21 = scalar_lea.vmem %s5346_s26, 16  ;;  %s4955_s19 = scalar_lea.vmem %s5346_s26, 32 }
  0x42   : > { %p4949_p0 = scmp.ne.s32.totalorder %s5346_s26, %s4948_s21  ;;  %p4956_p6 = scmp.lt.s32.totalorder %s5346_s26, %s5346_s26 }
  0x43   : > { %p4957_p8 = scmp.lt.s32.totalorder %s4955_s19, %s4948_s21 }
  0x44   : > { %p4951_p1 = pnand %p4949_p0, %p5366_p7 }
  0x45   : > { %p4958_p9 = por %p4957_p8, %p4956_p6 }
  0x46   : > { %p4952_p4 = pneg %p4951_p1 }
  0x48   : > { %p4959_p10 = pnand %p4958_p9, %p4952_p4 }
  0x4a   : > { %4962 = shalt.err (!%p4959_p10)
}
  0x4b   : > { %4403 = dma.hbm_to_vmem [thread:$0]  (!%p5350_p5), %s5737_s4, 16, %s5346_s26, [#allocation9]  }
  0x4c   : > { %s4963_s25 = scalar_lea.hbm %s5715_s6, 128 }
  0x4d   : > { %p4964_p11 = scmp.ne.s32.totalorder %s5715_s6, %s4963_s25  ;;  %p4970_p0 = scmp.lt.u32.totalorder %s4963_s25, %s5715_s6 }
  0x4f   : > { %p4966_p12 = pnand %p4964_p11, %p5366_p7 }
  0x51   : > { %p4967_p13 = pneg %p4966_p12 }
  0x53   : > { %p4972_p1 = pnand %p4970_p0, %p4967_p13 }
  0x55   : > { %4975 = shalt.err (!%p4972_p1)
}
  0x56   : > { %s4976_s26 = scalar_lea.vmem %s5354_s28, 128  ;;  %p4984_p9 = scmp.lt.s32.totalorder %s5354_s28, %s5354_s28 }
  0x57   : > { %p4977_p4 = scmp.ne.s32.totalorder %s5354_s28, %s4976_s26  ;;  %p4985_p10 = scmp.lt.s32.totalorder %s4976_s26, %s4976_s26 }
  0x59   : > { %p4979_p6 = pnand %p4977_p4, %p5366_p7  ;;  %p4986_p11 = por %p4985_p10, %p4984_p9 }
  0x5b   : > { %p4980_p8 = pneg %p4979_p6 }
  0x5d   : > { %p4987_p12 = pnand %p4986_p11, %p4980_p8 }
  0x5f   : > { %4990 = shalt.err (!%p4987_p12)
}
  0x60   : > { %4409 = dma.hbm_to_vmem [thread:$0]  (!%p5350_p5), %s5715_s6, 128, %s5354_s28, [#allocation12]  }
  0x61   : > { %s4991_s20 = scalar_lea.hbm %s5717_s8, 64 }
  0x62   : > { %p4992_p13 = scmp.ne.s32.totalorder %s5717_s8, %s4991_s20  ;;  %p4998_p4 = scmp.lt.u32.totalorder %s4991_s20, %s5717_s8 }
  0x64   : > { %p4994_p0 = pnand %p4992_p13, %p5366_p7 }
  0x66   : > { %p4995_p1 = pneg %p4994_p0 }
  0x68   : > { %p5000_p6 = pnand %p4998_p4, %p4995_p1 }
  0x6a   : > { %5003 = shalt.err (!%p5000_p6)
}
  0x6b   : > { %s5004_s28 = scalar_lea.vmem %s5356_s12, 64  ;;  %p5012_p11 = scmp.lt.s32.totalorder %s5356_s12, %s5356_s12 }
  0x6c   : > { %p5005_p8 = scmp.ne.s32.totalorder %s5356_s12, %s5004_s28  ;;  %p5013_p12 = scmp.lt.s32.totalorder %s5004_s28, %s5004_s28 }
  0x6e   : > { %p5007_p9 = pnand %p5005_p8, %p5366_p7  ;;  %p5014_p13 = por %p5013_p12, %p5012_p11 }
  0x70   : > { %p5008_p10 = pneg %p5007_p9 }
  0x72   : > { %p5015_p0 = pnand %p5014_p13, %p5008_p10 }
  0x74   : > { %5018 = shalt.err (!%p5015_p0)
}
  0x75   : > { %4415 = dma.hbm_to_vmem [thread:$0]  (!%p5350_p5), %s5717_s8, 64, %s5356_s12, [#allocation15]  }
  0x76   : > { %s39_s19 = sadd.s32 1, %s5229_s18  ;;  %s5239_s14 = smov [#allocation3]  }
  0x77   : > { %s321_s15 = sshll.u32 %s5239_s14, 4  ;;  %p5459_p1 = scmp.ge.s32.totalorder %s39_s19, 2  ;;  %s322_s15 = int_to_ptr.vmem [resolvable:$true] %s321_s15 }
  0x78   : > { %s5739_s1 = sld [smem:[#allocation26_spill]] }
  0x79   : > { %s5738_s16 = scalar_select %p5459_p1, 1, 0 }
  0x7e   : > { %s5019_s27 = scalar_lea.hbm %s5739_s1, 32 }
  0x7f   : > { %p5020_p4 = scmp.ne.s32.totalorder %s5739_s1, %s5019_s27  ;;  %p5026_p9 = scmp.lt.u32.totalorder %s5019_s27, %s5739_s1 }
  0x81   : > { %p5022_p6 = pnand %p5020_p4, %p5366_p7 }
  0x83   : > { %p5023_p8 = pneg %p5022_p6 }
  0x85   : > { %p5028_p10 = pnand %p5026_p9, %p5023_p8 }
  0x87   : > { %5031 = shalt.err (!%p5028_p10)
}
  0x88   : > { %s5032_s21 = scalar_lea.vmem %s322_s15, 32  ;;  %p5040_p0 = scmp.lt.s32.totalorder %s322_s15, %s322_s15 }
  0x89   : > { %p5033_p11 = scmp.ne.s32.totalorder %s322_s15, %s5032_s21  ;;  %p5041_p2 = scmp.lt.s32.totalorder %s5032_s21, %s5032_s21 }
  0x8b   : > { %p5035_p12 = pnand %p5033_p11, %p5366_p7  ;;  %p5042_p3 = por %p5041_p2, %p5040_p0 }
  0x8d   : > { %p5036_p13 = pneg %p5035_p12 }
  0x8f   : > { %p5043_p1 = pnand %p5042_p3, %p5036_p13 }
  0x91   : > { %5046 = shalt.err (!%p5043_p1)
}
  0x92   : > { %4394 = dma.hbm_to_vmem [thread:$0]  (!%p5350_p5), %s5739_s1, 32, %s322_s15, [#allocation4]  }
  0x93   : > { %p5740_p4 = scmp.ne.s32.totalorder %s5738_s16, 0  ;;  %s5240_s20 = smov [#allocation7]  }
  0x94   : > { %s342_s25 = sshll.u32 %s5240_s20, 4  ;;  %s5741_s3 = sld [smem:[#allocation28_spill]]  ;;  %s343_s25 = int_to_ptr.vmem [resolvable:$true] %s342_s25 }
  0x95   : > { %s5751_s19 = smov (%p5740_p4, %s39_s19), 0 }
  0x9a   : > { %s5047_s13 = scalar_lea.hbm %s5741_s3, 512 }
  0x9b   : > { %p5048_p2 = scmp.ne.s32.totalorder %s5741_s3, %s5047_s13  ;;  %p5054_p6 = scmp.lt.u32.totalorder %s5047_s13, %s5741_s3 }
  0x9d   : > { %p5050_p3 = pnand %p5048_p2, %p5366_p7 }
  0x9f   : > { %p5051_p1 = pneg %p5050_p3 }
  0xa1   : > { %p5056_p8 = pnand %p5054_p6, %p5051_p1 }
  0xa3   : > { %5059 = shalt.err (!%p5056_p8)
}
  0xa4   : > { %s5060_s15 = scalar_lea.vmem %s343_s25, 512  ;;  %p5068_p12 = scmp.lt.s32.totalorder %s343_s25, %s343_s25 }
  0xa5   : > { %p5061_p9 = scmp.ne.s32.totalorder %s343_s25, %s5060_s15  ;;  %p5069_p13 = scmp.lt.s32.totalorder %s5060_s15, %s5060_s15 }
  0xa7   : > { %p5063_p10 = pnand %p5061_p9, %p5366_p7  ;;  %p5070_p0 = por %p5069_p13, %p5068_p12 }
  0xa9   : > { %p5064_p11 = pneg %p5063_p10 }
  0xab   : > { %p5071_p4 = pnand %p5070_p0, %p5064_p11 }
  0xad   : > { %5074 = shalt.err (!%p5071_p4)
}
  0xae   : > { %s5725_s16 = smov 64   ;;  %s5726_s14 = smov 4  }
  0xaf   : > { %4400 = dma.hbm_to_vmem [thread:$0]  (!%p5350_p5), %s5741_s3, 512, %s343_s25, [#allocation6], %s5725_s16, %s5725_s16, %s5726_s14  }
  0xb0   : > { %s5243_s30 = smov [#allocation10]   ;;  %s5075_s21 = scalar_lea.hbm %s5714_s5, 8192 }
  0xb1   : > { %s366_s13 = sshll.u32 %s5243_s30, 4  ;;  %p5076_p2 = scmp.ne.s32.totalorder %s5714_s5, %s5075_s21  ;;  %s367_s13 = int_to_ptr.vmem [resolvable:$true] %s366_s13 }
  0xb2   : > { %p5082_p6 = scmp.lt.u32.totalorder %s5075_s21, %s5714_s5 }
  0xb3   : > { %p5078_p3 = pnand %p5076_p2, %p5366_p7 }
  0xb5   : > { %p5079_p1 = pneg %p5078_p3 }
  0xb7   : > { %p5084_p8 = pnand %p5082_p6, %p5079_p1 }
  0xb9   : > { %5087 = shalt.err (!%p5084_p8)
}
  0xba   : > { %s5088_s25 = scalar_lea.vmem %s367_s13, 8192  ;;  %p5096_p12 = scmp.lt.s32.totalorder %s367_s13, %s367_s13 }
  0xbb   : > { %p5089_p9 = scmp.ne.s32.totalorder %s367_s13, %s5088_s25  ;;  %p5097_p13 = scmp.lt.s32.totalorder %s5088_s25, %s5088_s25 }
  0xbd   : > { %p5091_p10 = pnand %p5089_p9, %p5366_p7  ;;  %p5098_p0 = por %p5097_p13, %p5096_p12 }
  0xbf   : > { %p5092_p11 = pneg %p5091_p10 }
  0xc1   : > { %p5099_p4 = pnand %p5098_p0, %p5092_p11 }
  0xc3   : > { %5102 = shalt.err (!%p5099_p4)
}
  0xc4   : > { %s5244_s20 = smov 512   ;;  %s5245_s27 = smov 32  }
  0xc5   : > { %4406 = dma.hbm_to_vmem [thread:$0]  (!%p5350_p5), %s5714_s5, 8192, %s367_s13, [#allocation9], %s5244_s20, %s5244_s20, %s5245_s27  }
  0xc6   : > { %s5246_s30 = smov [#allocation13]   ;;  %s5103_s26 = scalar_lea.hbm %s5716_s7, 32768 }
  0xc7   : > { %s390_s12 = sshll.u32 %s5246_s30, 4  ;;  %p5104_p2 = scmp.ne.s32.totalorder %s5716_s7, %s5103_s26  ;;  %s391_s12 = int_to_ptr.vmem [resolvable:$true] %s390_s12 }
  0xc8   : > { %p5110_p6 = scmp.lt.u32.totalorder %s5103_s26, %s5716_s7 }
  0xc9   : > { %p5106_p3 = pnand %p5104_p2, %p5366_p7 }
  0xcb   : > { %p5107_p1 = pneg %p5106_p3 }
  0xcd   : > { %p5112_p8 = pnand %p5110_p6, %p5107_p1 }
  0xcf   : > { %5115 = shalt.err (!%p5112_p8)
}
  0xd0   : > { %s5116_s13 = scalar_lea.vmem %s391_s12, 32768  ;;  %p5124_p12 = scmp.lt.s32.totalorder %s391_s12, %s391_s12 }
  0xd1   : > { %p5117_p9 = scmp.ne.s32.totalorder %s391_s12, %s5116_s13  ;;  %p5125_p13 = scmp.lt.s32.totalorder %s5116_s13, %s5116_s13 }
  0xd3   : > { %p5119_p10 = pnand %p5117_p9, %p5366_p7  ;;  %p5126_p0 = por %p5125_p13, %p5124_p12 }
  0xd5   : > { %p5120_p11 = pneg %p5119_p10 }
  0xd7   : > { %p5127_p4 = pnand %p5126_p0, %p5120_p11 }
  0xd9   : > { %5130 = shalt.err (!%p5127_p4)
}
  0xda   : > { %s5247_s20 = smov 256   ;;  %s5248_s27 = smov 16  }
  0xdb   : > { %4412 = dma.hbm_to_vmem [thread:$0]  (!%p5350_p5), %s5716_s7, 32768, %s391_s12, [#allocation12], %s5247_s20, %s5247_s20, %s5248_s27  }
  0xdc   : > { %s5249_s1 = smov [#allocation16]   ;;  %s5250_s30 = smov [#allocation17]  }
  0xdd   : > { %s414_s2 = sshll.u32 %s5249_s1, 4  ;;  %s428_s28 = sshll.u32 %s5250_s30, 4  ;;  %s415_s2 = int_to_ptr.vmem [resolvable:$true] %s414_s2  ;;  %s429_s28 = int_to_ptr.vmem [resolvable:$true] %s428_s28 }
  0xde   : > { %s5131_s15 = scalar_lea.hbm %s5718_s9, 4096 }
  0xdf   : > { %p5132_p2 = scmp.ne.s32.totalorder %s5718_s9, %s5131_s15  ;;  %p5138_p6 = scmp.lt.u32.totalorder %s5131_s15, %s5718_s9 }
  0xe1   : > { %p5134_p3 = pnand %p5132_p2, %p5366_p7 }
  0xe3   : > { %p5135_p1 = pneg %p5134_p3 }
  0xe5   : > { %p5140_p8 = pnand %p5138_p6, %p5135_p1 }
  0xe7   : > { %5143 = shalt.err (!%p5140_p8)
}
  0xe8   : > { %s5144_s12 = scalar_lea.vmem %s415_s2, 4096  ;;  %p5152_p12 = scmp.lt.s32.totalorder %s415_s2, %s415_s2 }
  0xe9   : > { %p5145_p9 = scmp.ne.s32.totalorder %s415_s2, %s5144_s12  ;;  %p5153_p13 = scmp.lt.s32.totalorder %s5144_s12, %s5144_s12 }
  0xeb   : > { %p5147_p10 = pnand %p5145_p9, %p5366_p7  ;;  %p5154_p0 = por %p5153_p13, %p5152_p12 }
  0xed   : > { %p5148_p11 = pneg %p5147_p10 }
  0xef   : > { %p5155_p4 = pnand %p5154_p0, %p5148_p11 }
  0xf1   : > { %5158 = shalt.err (!%p5155_p4)
}
  0xf2   : > { %s5742_s20 = smov 4   ;;  %s5743_s27 = smov 64  }
  0xf3   : > { %4418 = dma.hbm_to_vmem [thread:$0]  (!%p5350_p5), %s5718_s9, 4096, %s415_s2, [#allocation15], %s5743_s27, %s5743_s27, %s5742_s20  }
  0xf4   : > { %s5159_s1 = scalar_lea.hbm %s5719_s10, 16 }
  0xf5   : > { %p5160_p2 = scmp.ne.s32.totalorder %s5719_s10, %s5159_s1  ;;  %p5166_p6 = scmp.lt.u32.totalorder %s5159_s1, %s5719_s10 }
  0xf7   : > { %p5162_p3 = pnand %p5160_p2, %p5366_p7 }
  0xf9   : > { %p5163_p1 = pneg %p5162_p3 }
  0xfb   : > { %p5168_p8 = pnand %p5166_p6, %p5163_p1 }
  0xfd   : > { %5171 = shalt.err (!%p5168_p8)
}
  0xfe   : > { %s5172_s25 = scalar_lea.vmem %s429_s28, 16  ;;  %s5179_s2 = scalar_lea.vmem %s429_s28, 32 }
  0xff   : > { %p5173_p9 = scmp.ne.s32.totalorder %s429_s28, %s5172_s25  ;;  %p5180_p12 = scmp.lt.s32.totalorder %s429_s28, %s429_s28 }
 0x100   : > { %p5181_p13 = scmp.lt.s32.totalorder %s5179_s2, %s5172_s25 }
 0x101   : > { %p5175_p10 = pnand %p5173_p9, %p5366_p7 }
 0x102   : > { %p5182_p0 = por %p5181_p13, %p5180_p12 }
 0x103   : > { %p5176_p11 = pneg %p5175_p10 }
 0x105   : > { %p5183_p4 = pnand %p5182_p0, %p5176_p11 }
 0x107   : > { %5186 = shalt.err (!%p5183_p4)
}
 0x108   : > { %4421 = dma.hbm_to_vmem [thread:$0]  (!%p5350_p5), %s5719_s10, 16, %s429_s28, [#allocation18]  }
 0x109   : > { %p5744_p2 = scmp.ne.s32.totalorder %s5733_s24, 0 }
 0x10a   : > { %p5745_p3 = scmp.ne.s32.totalorder (!%p5744_p2), %s5732_s23, 0 }
 0x10b   : > { %454 = sbr.rel (%p5744_p2) target bundleno = 1644 (0x66c), region = 64 }
 0x112   : > { %5200 = dma.done.wait (%p5745_p3), [#allocation4], 32  }
 0x113   : > { %5202 = vsyncadd (%p5745_p3), [#allocation4], 4294967264 }
 0x114   : > { %5204 = dma.done.wait (%p5745_p3), [#allocation6], 528  }
 0x115   : > { %5206 = vsyncadd (%p5745_p3), [#allocation6], 4294966768 }
 0x116   : > { %5208 = dma.done.wait (%p5745_p3), [#allocation9], 8208  }
 0x117   : > { %5210 = vsyncadd (%p5745_p3), [#allocation9], 4294959088 }
 0x118   : > { %5212 = dma.done.wait (%p5745_p3), [#allocation12], 32896  }
 0x119   : > { %5214 = vsyncadd (%p5745_p3), [#allocation12], 4294934400 }
 0x11a   : > { %5216 = dma.done.wait (%p5745_p3), [#allocation15], 4160  }
 0x11b   : > { %5218 = vsyncadd (%p5745_p3), [#allocation15], 4294963136 }
 0x11c   : > { %5220 = dma.done.wait (%p5745_p3), [#allocation18], 16  }
 0x11d   : > { %5222 = vsyncadd (%p5745_p3), [#allocation18], 4294967280  ;;  %vm566_vm0 = vcmask 1040384   ;;  %v5251_v0 = vmov 0.0   ;;  %p533_p5 = scmp.lt.s32.totalorder %s5225_s17, 1  ;;  %vm567_vm1 = vcmask 1041408  }
 0x11e   : > { %4305 = vmatprep.subr.bf16.mxu0 %v5251_v0  ;;  %4311 = vmatprep.subr.bf16.mxu1 %v5251_v0  ;;  %v5252_v1 = vmov 65535   ;;  %vm5253_vm2 = vmmov 0   ;;  %v554_v4 = vld [vmem:[#allocation3] sm:$0x3]  ;;  %v4487_v8 = vld [vmem:[#allocation7] sm:$0xff]   ;;  %vm562_vm3 = vcmask 23552  }
 0x11f   : > { %v568_v2 = vsel %vm566_vm0, 4294967295, %v5252_v1  ;;  %4307 = vmatprep.mubr.msk.bf16.mxu0 %vm5253_vm2, %v5251_v0  ;;  %4319 = vmatprep.mubr.msk.bf16.mxu1 %vm5253_vm2, %v5251_v0  ;;  %s5753_s17 = smov (!%p533_p5, %s5225_s17), 1  ;;  %v4488_v10 = vld [vmem:[#allocation7 + $0x8] sm:$0xff]   ;;  %v4489_v11 = vld [vmem:[#allocation7 + $0x10] sm:$0xff]   ;;  %v4490_v12 = vld [vmem:[#allocation7 + $0x18] sm:$0xff]   ;;  %vm656_vm4 = vcmask 523264  }
 0x120   : > { %v569_v3 = vsel %vm567_vm1, %v568_v2, 0  ;;  %s4253_s24 = sshll.u32 %s5753_s17, 4  ;;  %4312 = vmatpush3.bf16.msra.mxu1 %v4487_v8  ;;  %v704_v13 = vld [vmem:[#allocation10] sm:$0xff]  ;;  %v705_v15 = vld [vmem:[#allocation10 + $0x8] sm:$0xff]  ;;  %v3891_v41 = vld [vmem:[#allocation5] ss:$0 sm:$0xff]  ;;  %s544_s27 = scalar_lea.vmem %s5720_s11, %s5753_s17 }
 0x121   : > { %s540_s22 = scalar_lea.vmem %s5709_s0, %s4253_s24  ;;  %v571_v7 = vand.u32 %v569_v3, %v554_v4  ;;  %4313 = vmatprep.subr.bf16.mxu1 %v5251_v0  ;;  %v708_v14 = vld [vmem:[#allocation10 + $0x20] sm:$0xff]  ;;  %v709_v18 = vld [vmem:[#allocation10 + $0x28] sm:$0xff] }
 0x122   : > { %v551_v5 = vld [vmem:[%s540_s22] sm:$0xff]  ;;  %v552_v6 = vld [vmem:[%s540_s22 + $0x8] sm:$0xff]  ;;  %v3899_v16 = vcombine.low %v704_v13, %v708_v14  ;;  %v3900_v17 = vcombine.high %v704_v13, %v708_v14  ;;  %v3901_v21 = vcombine.low %v705_v15, %v709_v18  ;;  %v3902_v22 = vcombine.high %v705_v15, %v709_v18 }
 0x123   : > { %v553_v9 = vpack.c.bf16 %v552_v6, %v551_v5  ;;  %4306 = vmatpush3.bf16.msra.mxu0 %v571_v7  ;;  %v712_v19 = vld [vmem:[#allocation10 + $0x40] sm:$0xff]  ;;  %v713_v48 = vld [vmem:[#allocation10 + $0x48] sm:$0xff] }
 0x124   : > { %4314 = vmatpush3.bf16.msra.mxu1 %v4488_v10  ;;  %v716_v20 = vld [vmem:[#allocation10 + $0x60] sm:$0xff]  ;;  %1130 = vmatprep.subr.bf16.mxu0 %v3900_v17  ;;  %v717_v49 = vld [vmem:[#allocation10 + $0x68] sm:$0xff] }
 0x125   : > { %4315 = vmatprep.subr.bf16.mxu1 %v5251_v0  ;;  %v3908_v23 = vcombine.high %v712_v19, %v716_v20  ;;  %v3907_v24 = vcombine.low %v712_v19, %v716_v20  ;;  %v720_v25 = vld [vmem:[#allocation10 + $0x80] sm:$0xff]  ;;  %v3910_v53 = vcombine.high %v713_v48, %v717_v49  ;;  %v721_v54 = vld [vmem:[#allocation10 + $0x88] sm:$0xff]  ;;  %v3909_v56 = vcombine.low %v713_v48, %v717_v49  ;;  %v722_v48 = vld [vmem:[#allocation10 + $0x90] sm:$0xff] }
 0x126   : > { %4308 = vmatmul.mubr.msk.bf16.vlgmr.msra.gmra.mrb[0].mxu0 %vm562_vm3, %v553_v9  ;;  %v724_v26 = vld [vmem:[#allocation10 + $0xa0] sm:$0xff]  ;;  %v725_v55 = vld [vmem:[#allocation10 + $0xa8] sm:$0xff]  ;;  %v726_v49 = vld [vmem:[#allocation10 + $0xb0] sm:$0xff] }
 0x127   : > { %1131 = vmatpush1.bf16.msra.mxu0 %v3899_v16  ;;  %v3916_v27 = vcombine.high %v720_v25, %v724_v26  ;;  %v3915_v28 = vcombine.low %v720_v25, %v724_v26  ;;  %v728_v29 = vld [vmem:[#allocation10 + $0xc0] sm:$0xff]  ;;  %v3918_v57 = vcombine.high %v721_v54, %v725_v55  ;;  %v729_v58 = vld [vmem:[#allocation10 + $0xc8] sm:$0xff]  ;;  %v3917_v60 = vcombine.low %v721_v54, %v725_v55  ;;  %v707_v25 = vld [vmem:[#allocation10 + $0x18] sm:$0xff] }
 0x128   : > { %4316 = vmatpush3.bf16.msra.mxu1 %v4489_v11  ;;  %1132 = vmatprep.subr.bf16.mxu0 %v3908_v23  ;;  %v732_v30 = vld [vmem:[#allocation10 + $0xe0] sm:$0xff]  ;;  %v733_v59 = vld [vmem:[#allocation10 + $0xe8] sm:$0xff]  ;;  %v706_v23 = vld [vmem:[#allocation10 + $0x10] sm:$0xff]  ;;  %v3920_v54 = vcombine.high %v722_v48, %v726_v49 }
 0x129   : > { %4317 = vmatprep.subr.bf16.mxu1 %v5251_v0  ;;  %v3924_v31 = vcombine.high %v728_v29, %v732_v30  ;;  %v3923_v32 = vcombine.low %v728_v29, %v732_v30  ;;  %v736_v33 = vld [vmem:[#allocation10 + $0x100] sm:$0xff]  ;;  %v3926_v61 = vcombine.high %v729_v58, %v733_v59  ;;  %v737_v62 = vld [vmem:[#allocation10 + $0x108] sm:$0xff]  ;;  %v3925_v0 = vcombine.low %v729_v58, %v733_v59  ;;  %v731_v58 = vld [vmem:[#allocation10 + $0xd8] sm:$0xff] }
 0x12a   : > { %v740_v34 = vld [vmem:[#allocation10 + $0x120] sm:$0xff]  ;;  %v741_v63 = vld [vmem:[#allocation10 + $0x128] sm:$0xff]  ;;  %v735_v59 = vld [vmem:[#allocation10 + $0xf8] sm:$0xff] }
 0x12b   : > { %1133 = vmatpush1.bf16.msra.mxu0 %v3907_v24  ;;  %v3932_v35 = vcombine.high %v736_v33, %v740_v34  ;;  %v3931_v36 = vcombine.low %v736_v33, %v740_v34  ;;  %v744_v37 = vld [vmem:[#allocation10 + $0x140] sm:$0xff]  ;;  %v3934_v1 = vcombine.high %v737_v62, %v741_v63  ;;  %v745_v2 = vld [vmem:[#allocation10 + $0x148] sm:$0xff]  ;;  %v3933_v4 = vcombine.low %v737_v62, %v741_v63  ;;  %v710_v24 = vld [vmem:[#allocation10 + $0x30] sm:$0xff] }
 0x12c   : > { %4318 = vmatpush3.bf16.msra.mxu1 %v4490_v12  ;;  %1134 = vmatprep.subr.bf16.mxu0 %v3916_v27  ;;  %v748_v38 = vld [vmem:[#allocation10 + $0x160] sm:$0xff]  ;;  %v749_v3 = vld [vmem:[#allocation10 + $0x168] sm:$0xff]  ;;  %v3904_v26 = vcombine.high %v706_v23, %v710_v24  ;;  %v711_v27 = vld [vmem:[#allocation10 + $0x38] sm:$0xff]  ;;  %v3930_v63 = vcombine.high %v731_v58, %v735_v59 }
 0x12d   : > { %1173 = vmatprep.subr.bf16.mxu1 %v3902_v22  ;;  %v3940_v39 = vcombine.high %v744_v37, %v748_v38  ;;  %v3939_v40 = vcombine.low %v744_v37, %v748_v38  ;;  %v3942_v5 = vcombine.high %v745_v2, %v749_v3  ;;  %v3941_v6 = vcombine.low %v745_v2, %v749_v3  ;;  %v752_v7 = vld [vmem:[#allocation10 + $0x180] sm:$0xff]  ;;  %v753_v9 = vld [vmem:[#allocation10 + $0x188] sm:$0xff]  ;;  %v739_v2 = vld [vmem:[#allocation10 + $0x118] sm:$0xff] }
 0x12e   : > { %v756_v8 = vld [vmem:[#allocation10 + $0x1a0] sm:$0xff]  ;;  %v757_v11 = vld [vmem:[#allocation10 + $0x1a8] sm:$0xff]  ;;  %v3905_v29 = vcombine.low %v707_v25, %v711_v27  ;;  %v3906_v30 = vcombine.high %v707_v25, %v711_v27  ;;  %v743_v3 = vld [vmem:[#allocation10 + $0x138] sm:$0xff] }
 0x12f   : > { %1135 = vmatpush1.bf16.msra.mxu0 %v3915_v28  ;;  %v3948_v10 = vcombine.high %v752_v7, %v756_v8  ;;  %v3947_v12 = vcombine.low %v752_v7, %v756_v8  ;;  %v3949_v13 = vcombine.low %v753_v9, %v757_v11  ;;  %v3950_v14 = vcombine.high %v753_v9, %v757_v11  ;;  %v760_v15 = vld [vmem:[#allocation10 + $0x1c0] sm:$0xff]  ;;  %v761_v17 = vld [vmem:[#allocation10 + $0x1c8] sm:$0xff]  ;;  %v746_v8 = vld [vmem:[#allocation10 + $0x150] sm:$0xff] }
 0x130   : > { %1136 = vmatprep.subr.bf16.mxu0 %v3924_v31  ;;  %v764_v16 = vld [vmem:[#allocation10 + $0x1e0] sm:$0xff]  ;;  %v765_v19 = vld [vmem:[#allocation10 + $0x1e8] sm:$0xff]  ;;  %v3903_v28 = vcombine.low %v706_v23, %v710_v24  ;;  %v5254_v31 = vmov 0   ;;  %v3938_v7 = vcombine.high %v739_v2, %v743_v3  ;;  %v750_v9 = vld [vmem:[#allocation10 + $0x170] sm:$0xff] }
 0x131   : > { %v3956_v18 = vcombine.high %v760_v15, %v764_v16  ;;  %v3955_v20 = vcombine.low %v760_v15, %v764_v16  ;;  %v3958_v22 = vcombine.high %v761_v17, %v765_v19  ;;  %1162 = vmatprep.mubr.bf16.mxu0 %v5254_v31  ;;  %v751_v11 = vld [vmem:[#allocation10 + $0x178] sm:$0xff]  ;;  %v754_v16 = vld [vmem:[#allocation10 + $0x190] sm:$0xff] }
 0x132   : > { %v762_v24 = vld [vmem:[#allocation10 + $0x1d0] sm:$0xff]  ;;  %v767_v27 = vld [vmem:[#allocation10 + $0x1f8] sm:$0xff] }
 0x133   : > { %1137 = vmatpush1.bf16.msra.mxu0 %v3923_v32  ;;  %v3893_v32 = vld [vmem:[#allocation8] ss:$0 sm:$0xff]  ;;  %v766_v25 = vld [vmem:[#allocation10 + $0x1f0] sm:$0xff] }
 0x134   : > { %1138 = vmatprep.subr.bf16.mxu0 %v3932_v35 }
 0x137   : > { %1139 = vmatpush1.bf16.msra.mxu0 %v3931_v36 }
 0x138   : > { %1140 = vmatprep.subr.bf16.mxu0 %v3940_v39  ;;  %v714_v39 = vld [vmem:[#allocation10 + $0x50] sm:$0xff] }
 0x13b   : > { %1141 = vmatpush1.bf16.msra.mxu0 %v3939_v40  ;;  %v718_v40 = vld [vmem:[#allocation10 + $0x70] sm:$0xff] }
 0x13c   : > { %1142 = vmatprep.subr.bf16.mxu0 %v3948_v10  ;;  %v747_v10 = vld [vmem:[#allocation10 + $0x158] sm:$0xff] }
 0x13d   : > { %v3946_v15 = vcombine.high %v747_v10, %v751_v11 }
 0x13f   : > { %1143 = vmatpush1.bf16.msra.mxu0 %v3947_v12 }
 0x140   : > { %1144 = vmatprep.subr.bf16.mxu0 %v3956_v18  ;;  %v755_v18 = vld [vmem:[#allocation10 + $0x198] sm:$0xff] }
 0x143   : > { %1145 = vmatpush1.bf16.msra.mxu0 %v3955_v20  ;;  %v3943_v20 = vcombine.low %v746_v8, %v750_v9 }
 0x144   : > { %1216 = vmatprep.subr.bf16.mxu0 %v3904_v26  ;;  %v763_v26 = vld [vmem:[#allocation10 + $0x1d8] sm:$0xff] }
 0x1f9   : > { %v607_v42 = vpop.f32.mrb[0].mxu0 }
 0x1fa   : > { %v608_v43 = vadd.f32 %v3891_v41, %v607_v42  ;;  %v4309_v44 = vpop.f32.mrb[1].mxu0  ;;  %v719_v42 = vld [vmem:[#allocation10 + $0x78] sm:$0xff] }
 0x1fb   : > { %v610_v45 = vpop.f32.mrb[2].mxu0 }
 0x1fc   : > { %v611_v46 = vadd.f32 %v3891_v41, %v610_v45  ;;  %v4310_v47 = vpop.f32.mrb[3].mxu0  ;;  %v614_v50 = vmax.f32 %v608_v43, 0.0  ;;  %v715_v41 = vld [vmem:[#allocation10 + $0x58] sm:$0xff] }
 0x1fd   : > { %v3914_v47 = vcombine.high %v715_v41, %v719_v42 }
 0x1fe   : > { %v615_v51 = vmax.f32 %v611_v46, 0.0  ;;  %v3912_v46 = vcombine.high %v714_v39, %v718_v40 }
 0x200   : > { %v616_v52 = vpack.c.bf16 %v615_v51, %v614_v50  ;;  %v723_v50 = vld [vmem:[#allocation10 + $0x98] sm:$0xff] }
 0x201   : > { %v727_v51 = vld [vmem:[#allocation10 + $0xb8] sm:$0xff] }
 0x202   : > { %4320 = vmatmul.mubr.msk.bf16.vlgmr.msra.gmra.mrb[0].mxu1 %vm656_vm4, %v616_v52  ;;  %v3911_v52 = vcombine.low %v714_v39, %v718_v40  ;;  %v3922_v55 = vcombine.high %v723_v50, %v727_v51  ;;  %v4502_v39 = vld [vmem:[#allocation13 + $0x2c] ss:$16 sps:$4 sm:$0xff]   ;;  %v4497_v40 = vld [vmem:[#allocation13 + $0x20] ss:$16 sps:$4 sm:$0xff]  }
 0x203   : > { %1174 = vmatpush1.bf16.msra.mxu1 %v3901_v21  ;;  %v3957_v21 = vcombine.low %v761_v17, %v765_v19  ;;  %1205 = vmatprep.mubr.bf16.mxu1 %v5254_v31  ;;  %v758_v17 = vld [vmem:[#allocation10 + $0x1b0] sm:$0xff]  ;;  %v759_v19 = vld [vmem:[#allocation10 + $0x1b8] sm:$0xff] }
 0x204   : > { %1175 = vmatprep.subr.bf16.mxu1 %v3910_v53  ;;  %v3913_v53 = vcombine.low %v715_v41, %v719_v42  ;;  %v3954_v23 = vcombine.high %v755_v18, %v759_v19  ;;  %v4500_v41 = vld [vmem:[#allocation13 + $0x28] ss:$16 sps:$4 sm:$0xff]   ;;  %v4505_v42 = vld [vmem:[#allocation13 + $0x44] ss:$16 sps:$4 sm:$0xff]  }
 0x207   : > { %1176 = vmatpush1.bf16.msra.mxu1 %v3909_v56  ;;  %v730_v56 = vld [vmem:[#allocation10 + $0xd0] sm:$0xff] }
 0x208   : > { %1177 = vmatprep.subr.bf16.mxu1 %v3918_v57  ;;  %v734_v57 = vld [vmem:[#allocation10 + $0xf0] sm:$0xff] }
 0x209   : > { %v3928_v62 = vcombine.high %v730_v56, %v734_v57 }
 0x20b   : > { %1178 = vmatpush1.bf16.msra.mxu1 %v3917_v60  ;;  %v3919_v60 = vcombine.low %v722_v48, %v726_v49  ;;  %v4509_v48 = vld [vmem:[#allocation13 + $0x60] ss:$16 sps:$4 sm:$0xff]   ;;  %v4512_v49 = vld [vmem:[#allocation13 + $0x68] ss:$16 sps:$4 sm:$0xff]  }
 0x20c   : > { %1179 = vmatprep.subr.bf16.mxu1 %v3926_v61  ;;  %v3921_v61 = vcombine.low %v723_v50, %v727_v51  ;;  %v4517_v50 = vld [vmem:[#allocation13 + $0x84] ss:$16 sps:$4 sm:$0xff]   ;;  %v4520_v51 = vld [vmem:[#allocation13 + $0x8c] ss:$16 sps:$4 sm:$0xff]  }
 0x20f   : > { %1180 = vmatpush1.bf16.msra.mxu1 %v3925_v0  ;;  %v738_v0 = vld [vmem:[#allocation10 + $0x110] sm:$0xff] }
 0x210   : > { %1181 = vmatprep.subr.bf16.mxu1 %v3934_v1  ;;  %v742_v1 = vld [vmem:[#allocation10 + $0x130] sm:$0xff] }
 0x211   : > { %v3935_v12 = vcombine.low %v738_v0, %v742_v1 }
 0x213   : > { %1182 = vmatpush1.bf16.msra.mxu1 %v3933_v4  ;;  %v3927_v4 = vcombine.low %v730_v56, %v734_v57  ;;  %v4521_v56 = vld [vmem:[#allocation13 + $0xa0] ss:$16 sps:$4 sm:$0xff]   ;;  %v4524_v57 = vld [vmem:[#allocation13 + $0xa8] ss:$16 sps:$4 sm:$0xff]  }
 0x214   : > { %1183 = vmatprep.subr.bf16.mxu1 %v3942_v5  ;;  %v3929_v5 = vcombine.low %v731_v58, %v735_v59  ;;  %v4529_v58 = vld [vmem:[#allocation13 + $0xc4] ss:$16 sps:$4 sm:$0xff]   ;;  %v4532_v59 = vld [vmem:[#allocation13 + $0xcc] ss:$16 sps:$4 sm:$0xff]  }
 0x217   : > { %1184 = vmatpush1.bf16.msra.mxu1 %v3941_v6  ;;  %v3936_v6 = vcombine.high %v738_v0, %v742_v1  ;;  %v4536_v0 = vld [vmem:[#allocation13 + $0xe8] ss:$16 sps:$4 sm:$0xff]   ;;  %v4538_v1 = vld [vmem:[#allocation13 + $0xec] ss:$16 sps:$4 sm:$0xff]  }
 0x218   : > { %1185 = vmatprep.subr.bf16.mxu1 %v3950_v14  ;;  %v3944_v14 = vcombine.high %v746_v8, %v750_v9  ;;  %v4545_v8 = vld [vmem:[#allocation13 + $0x120] ss:$16 sps:$4 sm:$0xff]   ;;  %v4548_v9 = vld [vmem:[#allocation13 + $0x128] ss:$16 sps:$4 sm:$0xff]  }
 0x21b   : > { %1186 = vmatpush1.bf16.msra.mxu1 %v3949_v13  ;;  %v3937_v13 = vcombine.low %v739_v2, %v743_v3  ;;  %v4541_v2 = vld [vmem:[#allocation13 + $0x104] ss:$16 sps:$4 sm:$0xff]   ;;  %v4544_v3 = vld [vmem:[#allocation13 + $0x10c] ss:$16 sps:$4 sm:$0xff]  }
 0x21c   : > { %1187 = vmatprep.subr.bf16.mxu1 %v3958_v22  ;;  %v3952_v22 = vcombine.high %v754_v16, %v758_v17 }
 0x21f   : > { %1188 = vmatpush1.bf16.msra.mxu1 %v3957_v21  ;;  %v3945_v21 = vcombine.low %v747_v10, %v751_v11  ;;  %v4553_v10 = vld [vmem:[#allocation13 + $0x144] ss:$16 sps:$4 sm:$0xff]   ;;  %v4556_v11 = vld [vmem:[#allocation13 + $0x14c] ss:$16 sps:$4 sm:$0xff]  }
 0x220   : > { %1259 = vmatprep.subr.bf16.mxu1 %v3906_v30  ;;  %v3960_v30 = vcombine.high %v762_v24, %v766_v25 }
 0x2d5   : > { %v694_v33 = vpop.f32.mrb[0].mxu1 }
 0x2d6   : > { %v695_v34 = vadd.f32 %v3893_v32, %v694_v33  ;;  %v4321_v35 = vpop.f32.mrb[1].mxu1  ;;  %v3961_v33 = vcombine.low %v763_v26, %v767_v27 }
 0x2d7   : > { %v697_v36 = vpop.f32.mrb[2].mxu1  ;;  %v4496_v35 = vld [vmem:[#allocation13 + $0xc] ss:$16 sps:$4 sm:$0xff]  }
 0x2d8   : > { %v698_v37 = vadd.f32 %v3893_v32, %v697_v36  ;;  %v4322_v38 = vpop.f32.mrb[3].mxu1  ;;  %v701_v43 = vmax.f32 %v695_v34, 0.0  ;;  %v3959_v32 = vcombine.low %v762_v24, %v766_v25  ;;  %v4493_v34 = vld [vmem:[#allocation13 + $0x4] ss:$16 sps:$4 sm:$0xff]   ;;  %v4491_v36 = vld [vmem:[#allocation13] ss:$16 sps:$4 sm:$0xff]  }
 0x2d9   : > { %v4499_v38 = vld [vmem:[#allocation13 + $0x24] ss:$16 sps:$4 sm:$0xff]   ;;  %v4569_v24 = vld [vmem:[#allocation13 + $0x1a0] ss:$16 sps:$4 sm:$0xff]   ;;  %v4572_v25 = vld [vmem:[#allocation13 + $0x1a8] ss:$16 sps:$4 sm:$0xff]  }
 0x2da   : > { %v702_v44 = vmax.f32 %v698_v37, 0.0  ;;  %v4494_v37 = vld [vmem:[#allocation13 + $0x8] ss:$16 sps:$4 sm:$0xff]  }
 0x2dc   : > { %v5615_v45 = vpack.c.bf16 %v702_v44, %v701_v43  ;;  %v4508_v43 = vld [vmem:[#allocation13 + $0x4c] ss:$16 sps:$4 sm:$0xff]   ;;  %v4503_v44 = vld [vmem:[#allocation13 + $0x40] ss:$16 sps:$4 sm:$0xff]  }
 0x2de   : > { %1163 = vmatmul.mubr.bf16.vlgmr.msra.gmra.mrb[4].mxu0 %v5615_v45  ;;  %1206 = vmatmul.mubr.bf16.vlgmr.msra.gmra.mrb[4].mxu1 %v5615_v45 }
 0x2df   : > { %1217 = vmatpush1.bf16.msra.mxu0 %v3903_v28  ;;  %1260 = vmatpush1.bf16.msra.mxu1 %v3905_v29  ;;  %v3951_v28 = vcombine.low %v754_v16, %v758_v17  ;;  %v3953_v29 = vcombine.low %v755_v18, %v759_v19  ;;  %v4557_v16 = vld [vmem:[#allocation13 + $0x160] ss:$16 sps:$4 sm:$0xff]   ;;  %v4560_v17 = vld [vmem:[#allocation13 + $0x168] ss:$16 sps:$4 sm:$0xff]   ;;  %v4565_v18 = vld [vmem:[#allocation13 + $0x184] ss:$16 sps:$4 sm:$0xff]  }
 0x2e0   : > { %1218 = vmatprep.subr.bf16.mxu0 %v3912_v46  ;;  %1261 = vmatprep.subr.bf16.mxu1 %v3914_v47  ;;  %v4511_v46 = vld [vmem:[#allocation13 + $0x64] ss:$16 sps:$4 sm:$0xff]   ;;  %v4514_v47 = vld [vmem:[#allocation13 + $0x6c] ss:$16 sps:$4 sm:$0xff]  }
 0x2e1   : > { %1248 = vmatprep.mubr.bf16.mxu0 %v5254_v31  ;;  %1291 = vmatprep.mubr.bf16.mxu1 %v5254_v31  ;;  %v3962_v31 = vcombine.high %v763_v26, %v767_v27  ;;  %v4568_v19 = vld [vmem:[#allocation13 + $0x18c] ss:$16 sps:$4 sm:$0xff]   ;;  %v4577_v26 = vld [vmem:[#allocation13 + $0x1c4] ss:$16 sps:$4 sm:$0xff]  }
 0x2e2   : > { %v4580_v27 = vld [vmem:[#allocation13 + $0x1cc] ss:$16 sps:$4 sm:$0xff]  }
 0x2e3   : > { %1219 = vmatpush1.bf16.msra.mxu0 %v3911_v52  ;;  %1262 = vmatpush1.bf16.msra.mxu1 %v3913_v53  ;;  %v4515_v52 = vld [vmem:[#allocation13 + $0x80] ss:$16 sps:$4 sm:$0xff]   ;;  %v4518_v53 = vld [vmem:[#allocation13 + $0x88] ss:$16 sps:$4 sm:$0xff]  }
 0x2e4   : > { %1220 = vmatprep.subr.bf16.mxu0 %v3920_v54  ;;  %1263 = vmatprep.subr.bf16.mxu1 %v3922_v55  ;;  %v4523_v54 = vld [vmem:[#allocation13 + $0xa4] ss:$16 sps:$4 sm:$0xff]   ;;  %v4526_v55 = vld [vmem:[#allocation13 + $0xac] ss:$16 sps:$4 sm:$0xff]  }
 0x2e7   : > { %1221 = vmatpush1.bf16.msra.mxu0 %v3919_v60  ;;  %1264 = vmatpush1.bf16.msra.mxu1 %v3921_v61  ;;  %v4527_v60 = vld [vmem:[#allocation13 + $0xc0] ss:$16 sps:$4 sm:$0xff]   ;;  %v4530_v61 = vld [vmem:[#allocation13 + $0xc8] ss:$16 sps:$4 sm:$0xff]  }
 0x2e8   : > { %1222 = vmatprep.subr.bf16.mxu0 %v3928_v62  ;;  %1265 = vmatprep.subr.bf16.mxu1 %v3930_v63  ;;  %v4535_v62 = vld [vmem:[#allocation13 + $0xe4] ss:$16 sps:$4 sm:$0xff]   ;;  %v4533_v63 = vld [vmem:[#allocation13 + $0xe0] ss:$16 sps:$4 sm:$0xff]  }
 0x2eb   : > { %1223 = vmatpush1.bf16.msra.mxu0 %v3927_v4  ;;  %1266 = vmatpush1.bf16.msra.mxu1 %v3929_v5  ;;  %v4539_v4 = vld [vmem:[#allocation13 + $0x100] ss:$16 sps:$4 sm:$0xff]   ;;  %v4542_v5 = vld [vmem:[#allocation13 + $0x108] ss:$16 sps:$4 sm:$0xff]  }
 0x2ec   : > { %1224 = vmatprep.subr.bf16.mxu0 %v3936_v6  ;;  %1267 = vmatprep.subr.bf16.mxu1 %v3938_v7  ;;  %v4547_v6 = vld [vmem:[#allocation13 + $0x124] ss:$16 sps:$4 sm:$0xff]   ;;  %v4550_v7 = vld [vmem:[#allocation13 + $0x12c] ss:$16 sps:$4 sm:$0xff]  }
 0x2ef   : > { %1225 = vmatpush1.bf16.msra.mxu0 %v3935_v12  ;;  %1268 = vmatpush1.bf16.msra.mxu1 %v3937_v13  ;;  %v4551_v12 = vld [vmem:[#allocation13 + $0x140] ss:$16 sps:$4 sm:$0xff]   ;;  %v4554_v13 = vld [vmem:[#allocation13 + $0x148] ss:$16 sps:$4 sm:$0xff]  }
 0x2f0   : > { %1226 = vmatprep.subr.bf16.mxu0 %v3944_v14  ;;  %1269 = vmatprep.subr.bf16.mxu1 %v3946_v15  ;;  %v4559_v14 = vld [vmem:[#allocation13 + $0x164] ss:$16 sps:$4 sm:$0xff]   ;;  %v4562_v15 = vld [vmem:[#allocation13 + $0x16c] ss:$16 sps:$4 sm:$0xff]  }
 0x2f3   : > { %1227 = vmatpush1.bf16.msra.mxu0 %v3943_v20  ;;  %1270 = vmatpush1.bf16.msra.mxu1 %v3945_v21  ;;  %v4563_v20 = vld [vmem:[#allocation13 + $0x180] ss:$16 sps:$4 sm:$0xff]   ;;  %v4566_v21 = vld [vmem:[#allocation13 + $0x188] ss:$16 sps:$4 sm:$0xff]  }
 0x2f4   : > { %1228 = vmatprep.subr.bf16.mxu0 %v3952_v22  ;;  %1271 = vmatprep.subr.bf16.mxu1 %v3954_v23  ;;  %v4571_v22 = vld [vmem:[#allocation13 + $0x1a4] ss:$16 sps:$4 sm:$0xff]   ;;  %v4574_v23 = vld [vmem:[#allocation13 + $0x1ac] ss:$16 sps:$4 sm:$0xff]  }
 0x2f7   : > { %1229 = vmatpush1.bf16.msra.mxu0 %v3951_v28  ;;  %1272 = vmatpush1.bf16.msra.mxu1 %v3953_v29  ;;  %v4575_v28 = vld [vmem:[#allocation13 + $0x1c0] ss:$16 sps:$4 sm:$0xff]   ;;  %v4578_v29 = vld [vmem:[#allocation13 + $0x1c8] ss:$16 sps:$4 sm:$0xff]  }
 0x2f8   : > { %1230 = vmatprep.subr.bf16.mxu0 %v3960_v30  ;;  %1273 = vmatprep.subr.bf16.mxu1 %v3962_v31  ;;  %v4581_v30 = vld [vmem:[#allocation13 + $0x1e0] ss:$16 sps:$4 sm:$0xff]   ;;  %v4583_v31 = vld [vmem:[#allocation13 + $0x1e4] ss:$16 sps:$4 sm:$0xff]  }
 0x2fb   : > { %1231 = vmatpush1.bf16.msra.mxu0 %v3959_v32  ;;  %1274 = vmatpush1.bf16.msra.mxu1 %v3961_v33  ;;  %v4584_v32 = vld [vmem:[#allocation13 + $0x1e8] ss:$16 sps:$4 sm:$0xff]   ;;  %v4586_v33 = vld [vmem:[#allocation13 + $0x1ec] ss:$16 sps:$4 sm:$0xff]  }
 0x2fc   : > { %3030 = vmatprep.subr.bf16.mxu0 %v4493_v34  ;;  %3194 = vmatprep.subr.bf16.mxu1 %v4496_v35  ;;  %v4589_v34 = vld [vmem:[#allocation13 + $0x204] ss:$16 sps:$4 sm:$0xff]   ;;  %v4592_v35 = vld [vmem:[#allocation13 + $0x20c] ss:$16 sps:$4 sm:$0xff]  }
 0x2fe   : > { %1249 = vmatmul.mubr.bf16.vlgmr.msra.gmra.mrb[8].mxu0 %v5615_v45  ;;  %1292 = vmatmul.mubr.bf16.vlgmr.msra.gmra.mrb[8].mxu1 %v5615_v45  ;;  %v4506_v45 = vld [vmem:[#allocation13 + $0x48] ss:$16 sps:$4 sm:$0xff]  }
 0x2ff   : > { %3031 = vmatpush1.bf16.msra.mxu0 %v4491_v36  ;;  %3195 = vmatpush1.bf16.msra.mxu1 %v4494_v37  ;;  %v770_v36 = vlaneseq }
 0x300   : > { %3032 = vmatprep.subr.bf16.mxu0 %v4499_v38  ;;  %3196 = vmatprep.subr.bf16.mxu1 %v4502_v39 }
 0x301   : > { %v5621_v37 = vshrl.u32 %v770_v36, 7 }
 0x303   : > { %3033 = vmatpush1.bf16.msra.mxu0 %v4497_v40  ;;  %3197 = vmatpush1.bf16.msra.mxu1 %v4500_v41  ;;  %v5624_v38 = vsub.s32 0, %v5621_v37  ;;  %v5627_v39 = vsub.s32 2, %v5621_v37  ;;  %v5629_v40 = vld [vmem:[#allocation11] sm:$0xff]  ;;  %v5632_v41 = vsub.s32 1, %v5621_v37  ;;  %v788_v36 = vsub.s32 4, %v5621_v37 }
 0x304   : > { %3034 = vmatprep.subr.bf16.mxu0 %v4505_v42  ;;  %3198 = vmatprep.subr.bf16.mxu1 %v4508_v43  ;;  %v5635_v42 = vsub.s32 3, %v5621_v37 }
 0x305   : > { %v773_v43 = vrot.slane %v5629_v40, %v5624_v38 }
 0x307   : > { %3035 = vmatpush1.bf16.msra.mxu0 %v4503_v44  ;;  %3199 = vmatpush1.bf16.msra.mxu1 %v4506_v45  ;;  %v781_v44 = vrot.slane %v5629_v40, %v5627_v39 }
 0x308   : > { %3036 = vmatprep.subr.bf16.mxu0 %v4511_v46  ;;  %3200 = vmatprep.subr.bf16.mxu1 %v4514_v47  ;;  %v777_v47 = vrot.slane %v5629_v40, %v5632_v41 }
 0x30b   : > { %3037 = vmatpush1.bf16.msra.mxu0 %v4509_v48  ;;  %3201 = vmatpush1.bf16.msra.mxu1 %v4512_v49  ;;  %v785_v48 = vrot.slane %v5629_v40, %v5635_v42 }
 0x30c   : > { %3038 = vmatprep.subr.bf16.mxu0 %v4517_v50  ;;  %3202 = vmatprep.subr.bf16.mxu1 %v4520_v51 }
 0x30f   : > { %3039 = vmatpush1.bf16.msra.mxu0 %v4515_v52  ;;  %3203 = vmatpush1.bf16.msra.mxu1 %v4518_v53 }
 0x310   : > { %3040 = vmatprep.subr.bf16.mxu0 %v4523_v54  ;;  %3204 = vmatprep.subr.bf16.mxu1 %v4526_v55 }
 0x313   : > { %3041 = vmatpush1.bf16.msra.mxu0 %v4521_v56  ;;  %3205 = vmatpush1.bf16.msra.mxu1 %v4524_v57 }
 0x314   : > { %3042 = vmatprep.subr.bf16.mxu0 %v4529_v58  ;;  %3206 = vmatprep.subr.bf16.mxu1 %v4532_v59 }
 0x317   : > { %3043 = vmatpush1.bf16.msra.mxu0 %v4527_v60  ;;  %3207 = vmatpush1.bf16.msra.mxu1 %v4530_v61 }
 0x318   : > { %3044 = vmatprep.subr.bf16.mxu0 %v4535_v62  ;;  %3208 = vmatprep.subr.bf16.mxu1 %v4538_v1 }
 0x31b   : > { %3045 = vmatpush1.bf16.msra.mxu0 %v4533_v63  ;;  %3209 = vmatpush1.bf16.msra.mxu1 %v4536_v0 }
 0x31c   : > { %3046 = vmatprep.subr.bf16.mxu0 %v4541_v2  ;;  %3210 = vmatprep.subr.bf16.mxu1 %v4544_v3 }
 0x31f   : > { %3047 = vmatpush1.bf16.msra.mxu0 %v4539_v4  ;;  %3211 = vmatpush1.bf16.msra.mxu1 %v4542_v5 }
 0x320   : > { %3048 = vmatprep.subr.bf16.mxu0 %v4547_v6  ;;  %3212 = vmatprep.subr.bf16.mxu1 %v4550_v7 }
 0x323   : > { %3049 = vmatpush1.bf16.msra.mxu0 %v4545_v8  ;;  %3213 = vmatpush1.bf16.msra.mxu1 %v4548_v9 }
 0x324   : > { %3050 = vmatprep.subr.bf16.mxu0 %v4553_v10  ;;  %3214 = vmatprep.subr.bf16.mxu1 %v4556_v11  ;;  %v5255_v10 = vmov 1966171168  }
 0x325   : > { %v1372_v11 = vunpack.c.l.s4 %v5255_v10 }
 0x327   : > { %3051 = vmatpush1.bf16.msra.mxu0 %v4551_v12  ;;  %3215 = vmatpush1.bf16.msra.mxu1 %v4554_v13 }
 0x328   : > { %3052 = vmatprep.subr.bf16.mxu0 %v4559_v14  ;;  %3216 = vmatprep.subr.bf16.mxu1 %v4562_v15 }
 0x32b   : > { %3053 = vmatpush1.bf16.msra.mxu0 %v4557_v16  ;;  %3217 = vmatpush1.bf16.msra.mxu1 %v4560_v17 }
 0x32c   : > { %3054 = vmatprep.subr.bf16.mxu0 %v4565_v18  ;;  %3218 = vmatprep.subr.bf16.mxu1 %v4568_v19 }
 0x32f   : > { %3055 = vmatpush1.bf16.msra.mxu0 %v4563_v20  ;;  %3219 = vmatpush1.bf16.msra.mxu1 %v4566_v21  ;;  %v1373_v20 = vunpack.c.0.s8 %v1372_v11 }
 0x330   : > { %3056 = vmatprep.subr.bf16.mxu0 %v4571_v22  ;;  %3220 = vmatprep.subr.bf16.mxu1 %v4574_v23 }
 0x333   : > { %3057 = vmatpush1.bf16.msra.mxu0 %v4569_v24  ;;  %3221 = vmatpush1.bf16.msra.mxu1 %v4572_v25 }
 0x334   : > { %3058 = vmatprep.subr.bf16.mxu0 %v4577_v26  ;;  %3222 = vmatprep.subr.bf16.mxu1 %v4580_v27 }
 0x337   : > { %3059 = vmatpush1.bf16.msra.mxu0 %v4575_v28  ;;  %3223 = vmatpush1.bf16.msra.mxu1 %v4578_v29  ;;  %v5646_v29 = vsub.s32 %v1373_v20, %v5621_v37 }
 0x338   : > { %3060 = vmatprep.subr.bf16.mxu0 %v4583_v31  ;;  %3224 = vmatprep.subr.bf16.mxu1 %v4586_v33 }
 0x33b   : > { %3061 = vmatpush1.bf16.msra.mxu0 %v4581_v30  ;;  %3225 = vmatpush1.bf16.msra.mxu1 %v4584_v32 }
 0x33c   : > { %3071 = vmatprep.subr.bf16.mxu0 %v4589_v34  ;;  %3235 = vmatprep.subr.bf16.mxu1 %v4592_v35 }
 0x3b1   : > { %v1164_v45 = vpop.f32.mrb[4].mxu0  ;;  %v1207_v46 = vpop.f32.mrb[4].mxu1 }
 0x3b2   : > { %v1166_v49 = vpop.f32.mrb[5].mxu0  ;;  %v1209_v50 = vpop.f32.mrb[5].mxu1  ;;  %v1165_v53 = vadd.f32 %v1164_v45, %v773_v43  ;;  %v1208_v54 = vadd.f32 %v1207_v46, %v781_v44  ;;  %v800_v45 = vsub.s32 7, %v5621_v37  ;;  %v789_v46 = vrot.slane %v5629_v40, %v788_v36 }
 0x3b3   : > { %v1168_v51 = vpop.f32.mrb[6].mxu0  ;;  %v1211_v52 = vpop.f32.mrb[6].mxu1  ;;  %v1167_v59 = vadd.f32 %v1166_v49, %v777_v47  ;;  %v1210_v60 = vadd.f32 %v1209_v50, %v785_v48 }
 0x3b4   : > { %v1169_v55 = vadd.f32 %v1168_v51, %v773_v43  ;;  %v1212_v56 = vadd.f32 %v1211_v52, %v781_v44  ;;  %v1170_v57 = vpop.f32.mrb[7].mxu0  ;;  %v1213_v58 = vpop.f32.mrb[7].mxu1  ;;  %v796_v43 = vsub.s32 6, %v5621_v37  ;;  %v792_v44 = vsub.s32 5, %v5621_v37  ;;  %v4882_v37 = vld [vmem:[#allocation16 + $0x88] sm:$0xff]  }
 0x3b5   : > { %v1171_v61 = vadd.f32 %v1170_v57, %v777_v47  ;;  %v1214_v62 = vadd.f32 %v1213_v58, %v785_v48  ;;  %v801_v51 = vrot.slane %v5629_v40, %v800_v45 }
 0x3b6   : > { %v1303_v63 = vmax.f32 %v1165_v53, %v1169_v55  ;;  %v1317_v0 = vmax.f32 %v1208_v54, %v1212_v56  ;;  %v797_v47 = vrot.slane %v5629_v40, %v796_v43  ;;  %v793_v50 = vrot.slane %v5629_v40, %v792_v44 }
 0x3b7   : > { %v1310_v1 = vmax.f32 %v1167_v59, %v1171_v61  ;;  %v1324_v2 = vmax.f32 %v1210_v60, %v1214_v62 }
 0x3b8   : > { %v1304_v3 = vrot.slane %v1303_v63, 4  ;;  %v1318_v4 = vrot.slane %v1317_v0, 4 }
 0x3b9   : > { %v1311_v5 = vrot.slane %v1310_v1, 4  ;;  %v1325_v6 = vrot.slane %v1324_v2, 4 }
 0x3ba   : > { %v1305_v7 = vmax.f32 %v1303_v63, %v1304_v3  ;;  %v1319_v8 = vmax.f32 %v1317_v0, %v1318_v4 }
 0x3bb   : > { %v1312_v9 = vmax.f32 %v1310_v1, %v1311_v5  ;;  %v1326_v12 = vmax.f32 %v1324_v2, %v1325_v6 }
 0x3bc   : > { %v1306_v13 = vrot.slane %v1305_v7, 2  ;;  %v1320_v14 = vrot.slane %v1319_v8, 2 }
 0x3bd   : > { %v1313_v15 = vrot.slane %v1312_v9, 2  ;;  %v1327_v16 = vrot.slane %v1326_v12, 2 }
 0x3be   : > { %v1307_v17 = vmax.f32 %v1305_v7, %v1306_v13  ;;  %v1321_v18 = vmax.f32 %v1319_v8, %v1320_v14 }
 0x3bf   : > { %v1314_v19 = vmax.f32 %v1312_v9, %v1313_v15  ;;  %v1328_v21 = vmax.f32 %v1326_v12, %v1327_v16 }
 0x3c0   : > { %v1308_v22 = vrot.slane %v1307_v17, 1  ;;  %v1322_v23 = vrot.slane %v1321_v18, 1 }
 0x3c1   : > { %v1315_v24 = vrot.slane %v1314_v19, 1  ;;  %v1329_v25 = vrot.slane %v1328_v21, 1 }
 0x3c2   : > { %v1309_v26 = vmax.f32 %v1307_v17, %v1308_v22  ;;  %v1323_v27 = vmax.f32 %v1321_v18, %v1322_v23 }
 0x3c3   : > { %v1316_v28 = vmax.f32 %v1314_v19, %v1315_v24  ;;  %v1330_v30 = vmax.f32 %v1328_v21, %v1329_v25 }
 0x3c5   : > { %v1367_v31 = vcombine.low %v1309_v26, %v1316_v28  ;;  %v1368_v32 = vcombine.low %v1323_v27, %v1330_v30 }
 0x3c7   : > { %v1377_v33 = vrot.slane %v1367_v31, %v5646_v29  ;;  %v1384_v34 = vrot.slane %v1368_v32, %v5646_v29 }
 0x3c9   : > { %v1399_v35 = vcombine.low %v1377_v33, %v1384_v34 }
 0x3d1   : > { %v1250_v48 = vpop.f32.mrb[8].mxu0  ;;  %v1293_v49 = vpop.f32.mrb[8].mxu1 }
 0x3d2   : > { %v1252_v52 = vpop.f32.mrb[9].mxu0  ;;  %v1295_v53 = vpop.f32.mrb[9].mxu1  ;;  %v1251_v56 = vadd.f32 %v1250_v48, %v789_v46  ;;  %v1294_v57 = vadd.f32 %v1293_v49, %v797_v47 }
 0x3d3   : > { %v1254_v54 = vpop.f32.mrb[10].mxu0  ;;  %v1297_v55 = vpop.f32.mrb[10].mxu1  ;;  %v1253_v62 = vadd.f32 %v1252_v52, %v793_v50  ;;  %v1296_v63 = vadd.f32 %v1295_v53, %v801_v51  ;;  %v4587_v53 = vld [vmem:[#allocation13 + $0x200] ss:$16 sps:$4 sm:$0xff]  }
 0x3d4   : > { %v1255_v58 = vadd.f32 %v1254_v54, %v789_v46  ;;  %v1298_v59 = vadd.f32 %v1297_v55, %v797_v47  ;;  %v1256_v60 = vpop.f32.mrb[11].mxu0  ;;  %v1299_v61 = vpop.f32.mrb[11].mxu1  ;;  %v1407_v46 = vrot.slane %v1399_v35, %v5646_v29  ;;  %v4590_v54 = vld [vmem:[#allocation13 + $0x208] ss:$16 sps:$4 sm:$0xff]   ;;  %v4595_v35 = vld [vmem:[#allocation13 + $0x224] ss:$16 sps:$4 sm:$0xff]  }
 0x3d5   : > { %v1257_v0 = vadd.f32 %v1256_v60, %v793_v50  ;;  %v1300_v1 = vadd.f32 %v1299_v61, %v801_v51  ;;  %v4604_v60 = vld [vmem:[#allocation13 + $0x24c] ss:$16 sps:$4 sm:$0xff]   ;;  %v4599_v61 = vld [vmem:[#allocation13 + $0x240] ss:$16 sps:$4 sm:$0xff]  }
 0x3d6   : > { %v1331_v2 = vmax.f32 %v1251_v56, %v1255_v58  ;;  %v1345_v3 = vmax.f32 %v1294_v57, %v1298_v59  ;;  %v4598_v56 = vld [vmem:[#allocation13 + $0x22c] ss:$16 sps:$4 sm:$0xff]   ;;  %v4593_v57 = vld [vmem:[#allocation13 + $0x220] ss:$16 sps:$4 sm:$0xff]   ;;  %v4596_v58 = vld [vmem:[#allocation13 + $0x228] ss:$16 sps:$4 sm:$0xff]  }
 0x3d7   : > { %v1338_v4 = vmax.f32 %v1253_v62, %v1257_v0  ;;  %v1352_v5 = vmax.f32 %v1296_v63, %v1300_v1  ;;  %v4601_v59 = vld [vmem:[#allocation13 + $0x244] ss:$16 sps:$4 sm:$0xff]   ;;  %v4602_v62 = vld [vmem:[#allocation13 + $0x248] ss:$16 sps:$4 sm:$0xff]   ;;  %v4610_v0 = vld [vmem:[#allocation13 + $0x26c] ss:$16 sps:$4 sm:$0xff]  }
 0x3d8   : > { %v1332_v6 = vrot.slane %v1331_v2, 4  ;;  %v1346_v40 = vrot.slane %v1345_v3, 4  ;;  %v4607_v63 = vld [vmem:[#allocation13 + $0x264] ss:$16 sps:$4 sm:$0xff]   ;;  %v4605_v1 = vld [vmem:[#allocation13 + $0x260] ss:$16 sps:$4 sm:$0xff]  }
 0x3d9   : > { %v1339_v7 = vrot.slane %v1338_v4, 4  ;;  %v1353_v8 = vrot.slane %v1352_v5, 4 }
 0x3da   : > { %v1333_v9 = vmax.f32 %v1331_v2, %v1332_v6  ;;  %v1347_v10 = vmax.f32 %v1345_v3, %v1346_v40  ;;  %v4608_v2 = vld [vmem:[#allocation13 + $0x268] ss:$16 sps:$4 sm:$0xff]   ;;  %v4613_v3 = vld [vmem:[#allocation13 + $0x284] ss:$16 sps:$4 sm:$0xff]  }
 0x3db   : > { %v1340_v11 = vmax.f32 %v1338_v4, %v1339_v7  ;;  %v1354_v12 = vmax.f32 %v1352_v5, %v1353_v8  ;;  %v4616_v4 = vld [vmem:[#allocation13 + $0x28c] ss:$16 sps:$4 sm:$0xff]   ;;  %v4611_v5 = vld [vmem:[#allocation13 + $0x280] ss:$16 sps:$4 sm:$0xff]   ;;  %v4614_v6 = vld [vmem:[#allocation13 + $0x288] ss:$16 sps:$4 sm:$0xff]  }
 0x3dc   : > { %v1334_v13 = vrot.slane %v1333_v9, 2  ;;  %v1348_v14 = vrot.slane %v1347_v10, 2  ;;  %v4619_v40 = vld [vmem:[#allocation13 + $0x2a4] ss:$16 sps:$4 sm:$0xff]   ;;  %v4622_v7 = vld [vmem:[#allocation13 + $0x2ac] ss:$16 sps:$4 sm:$0xff]  }
 0x3dd   : > { %v1341_v15 = vrot.slane %v1340_v11, 2  ;;  %v1355_v16 = vrot.slane %v1354_v12, 2  ;;  %v4617_v8 = vld [vmem:[#allocation13 + $0x2a0] ss:$16 sps:$4 sm:$0xff]  }
 0x3de   : > { %v1335_v17 = vmax.f32 %v1333_v9, %v1334_v13  ;;  %v1349_v18 = vmax.f32 %v1347_v10, %v1348_v14  ;;  %v4620_v9 = vld [vmem:[#allocation13 + $0x2a8] ss:$16 sps:$4 sm:$0xff]   ;;  %v4625_v10 = vld [vmem:[#allocation13 + $0x2c4] ss:$16 sps:$4 sm:$0xff]  }
 0x3df   : > { %v1342_v19 = vmax.f32 %v1340_v11, %v1341_v15  ;;  %v1356_v20 = vmax.f32 %v1354_v12, %v1355_v16  ;;  %v4628_v11 = vld [vmem:[#allocation13 + $0x2cc] ss:$16 sps:$4 sm:$0xff]   ;;  %v4623_v12 = vld [vmem:[#allocation13 + $0x2c0] ss:$16 sps:$4 sm:$0xff]   ;;  %v4626_v13 = vld [vmem:[#allocation13 + $0x2c8] ss:$16 sps:$4 sm:$0xff]  }
 0x3e0   : > { %v1336_v21 = vrot.slane %v1335_v17, 1  ;;  %v1350_v22 = vrot.slane %v1349_v18, 1  ;;  %v4631_v14 = vld [vmem:[#allocation13 + $0x2e4] ss:$16 sps:$4 sm:$0xff]   ;;  %v4634_v15 = vld [vmem:[#allocation13 + $0x2ec] ss:$16 sps:$4 sm:$0xff]  }
 0x3e1   : > { %v1343_v23 = vrot.slane %v1342_v19, 1  ;;  %v1357_v24 = vrot.slane %v1356_v20, 1  ;;  %v4629_v16 = vld [vmem:[#allocation13 + $0x2e0] ss:$16 sps:$4 sm:$0xff]  }
 0x3e2   : > { %v1337_v25 = vmax.f32 %v1335_v17, %v1336_v21  ;;  %v1351_v26 = vmax.f32 %v1349_v18, %v1350_v22  ;;  %v4632_v17 = vld [vmem:[#allocation13 + $0x2e8] ss:$16 sps:$4 sm:$0xff]   ;;  %v4637_v18 = vld [vmem:[#allocation13 + $0x304] ss:$16 sps:$4 sm:$0xff]  }
 0x3e3   : > { %v1344_v27 = vmax.f32 %v1342_v19, %v1343_v23  ;;  %v1358_v28 = vmax.f32 %v1356_v20, %v1357_v24  ;;  %v4640_v19 = vld [vmem:[#allocation13 + $0x30c] ss:$16 sps:$4 sm:$0xff]   ;;  %v4635_v20 = vld [vmem:[#allocation13 + $0x300] ss:$16 sps:$4 sm:$0xff]   ;;  %v4638_v21 = vld [vmem:[#allocation13 + $0x308] ss:$16 sps:$4 sm:$0xff]  }
 0x3e4   : > { %v4643_v22 = vld [vmem:[#allocation13 + $0x324] ss:$16 sps:$4 sm:$0xff]   ;;  %v4646_v23 = vld [vmem:[#allocation13 + $0x32c] ss:$16 sps:$4 sm:$0xff]   ;;  %v4641_v24 = vld [vmem:[#allocation13 + $0x320] ss:$16 sps:$4 sm:$0xff]  }
 0x3e5   : > { %v1369_v30 = vcombine.low %v1337_v25, %v1344_v27  ;;  %v1370_v31 = vcombine.low %v1351_v26, %v1358_v28  ;;  %v4644_v25 = vld [vmem:[#allocation13 + $0x328] ss:$16 sps:$4 sm:$0xff]   ;;  %v4649_v26 = vld [vmem:[#allocation13 + $0x344] ss:$16 sps:$4 sm:$0xff]   ;;  %v4652_v27 = vld [vmem:[#allocation13 + $0x34c] ss:$16 sps:$4 sm:$0xff]  }
 0x3e6   : > { %v4647_v28 = vld [vmem:[#allocation13 + $0x340] ss:$16 sps:$4 sm:$0xff]  }
 0x3e7   : > { %v1391_v32 = vrot.slane %v1369_v30, %v5646_v29  ;;  %v1398_v33 = vrot.slane %v1370_v31, %v5646_v29  ;;  %v4650_v30 = vld [vmem:[#allocation13 + $0x348] ss:$16 sps:$4 sm:$0xff]   ;;  %v4655_v31 = vld [vmem:[#allocation13 + $0x364] ss:$16 sps:$4 sm:$0xff]  }
 0x3e9   : > { %v1400_v34 = vcombine.low %v1391_v32, %v1398_v33  ;;  %v4658_v32 = vld [vmem:[#allocation13 + $0x36c] ss:$16 sps:$4 sm:$0xff]   ;;  %v4653_v33 = vld [vmem:[#allocation13 + $0x360] ss:$16 sps:$4 sm:$0xff]  }
 0x3eb   : > { %v1414_v47 = vrot.slane %v1400_v34, %v5646_v29  ;;  %v4656_v34 = vld [vmem:[#allocation13 + $0x368] ss:$16 sps:$4 sm:$0xff]  }
 0x3ed   : > { %v5670_v48 = vcombine.low %v1407_v46, %v1414_v47  ;;  %v4661_v46 = vld [vmem:[#allocation13 + $0x384] ss:$16 sps:$4 sm:$0xff]   ;;  %v4664_v47 = vld [vmem:[#allocation13 + $0x38c] ss:$16 sps:$4 sm:$0xff]  }
 0x3ef   : > { %v1431_v49 = vrot.slane %v5670_v48, %v5632_v41  ;;  %v1427_v50 = vrot.slane %v5670_v48, %v5624_v38  ;;  %v1439_v51 = vrot.slane %v5670_v48, %v5635_v42 }
 0x3f1   : > { %v1465_v52 = vpack.c.bf16 %v1431_v49, %v1431_v49  ;;  %v1464_v55 = vpack.c.bf16 %v1427_v50, %v1427_v50  ;;  %v1467_v29 = vpack.c.bf16 %v1439_v51, %v1439_v51  ;;  %v4659_v49 = vld [vmem:[#allocation13 + $0x380] ss:$16 sps:$4 sm:$0xff]   ;;  %v4662_v50 = vld [vmem:[#allocation13 + $0x388] ss:$16 sps:$4 sm:$0xff]   ;;  %v4667_v51 = vld [vmem:[#allocation13 + $0x3a4] ss:$16 sps:$4 sm:$0xff]  }
 0x3f3   : > { %3062 = vmatprep.mubr.bf16.mxu0 %v1465_v52  ;;  %3226 = vmatprep.mubr.bf16.mxu1 %v1465_v52  ;;  %v4670_v52 = vld [vmem:[#allocation13 + $0x3ac] ss:$16 sps:$4 sm:$0xff]  }
 0x3f4   : > { %3063 = vmatmul.mubr.bf16.vlgmr.msra.gmra.mrb[12].mxu0 %v1464_v55  ;;  %3227 = vmatmul.mubr.bf16.vlgmr.msra.gmra.mrb[12].mxu1 %v1464_v55  ;;  %v4673_v55 = vld [vmem:[#allocation13 + $0x3c4] ss:$16 sps:$4 sm:$0xff]  }
 0x3f5   : > { %3072 = vmatpush1.bf16.msra.mxu0 %v4587_v53  ;;  %3236 = vmatpush1.bf16.msra.mxu1 %v4590_v54  ;;  %v4665_v53 = vld [vmem:[#allocation13 + $0x3a0] ss:$16 sps:$4 sm:$0xff]   ;;  %v4668_v54 = vld [vmem:[#allocation13 + $0x3a8] ss:$16 sps:$4 sm:$0xff]  }
 0x3f6   : > { %3103 = vmatprep.mubr.bf16.mxu0 %v1467_v29  ;;  %3267 = vmatprep.mubr.bf16.mxu1 %v1467_v29  ;;  %v4674_v29 = vld [vmem:[#allocation13 + $0x3c8] ss:$16 sps:$4 sm:$0xff]  }
 0x3f7   : > { %3073 = vmatprep.subr.bf16.mxu0 %v4595_v35  ;;  %3237 = vmatprep.subr.bf16.mxu1 %v4598_v56  ;;  %v4676_v35 = vld [vmem:[#allocation13 + $0x3cc] ss:$16 sps:$4 sm:$0xff]   ;;  %v4671_v56 = vld [vmem:[#allocation13 + $0x3c0] ss:$16 sps:$4 sm:$0xff]  }
 0x3f9   : > { %3074 = vmatpush1.bf16.msra.mxu0 %v4593_v57  ;;  %3238 = vmatpush1.bf16.msra.mxu1 %v4596_v58  ;;  %v4679_v57 = vld [vmem:[#allocation13 + $0x3e4] ss:$16 sps:$4 sm:$0xff]   ;;  %v4682_v58 = vld [vmem:[#allocation13 + $0x3ec] ss:$16 sps:$4 sm:$0xff]  }
 0x3fa   : > { %3075 = vmatprep.subr.bf16.mxu0 %v4601_v59  ;;  %3239 = vmatprep.subr.bf16.mxu1 %v4604_v60  ;;  %v4677_v59 = vld [vmem:[#allocation13 + $0x3e0] ss:$16 sps:$4 sm:$0xff]   ;;  %v4680_v60 = vld [vmem:[#allocation13 + $0x3e8] ss:$16 sps:$4 sm:$0xff]  }
 0x3fd   : > { %3076 = vmatpush1.bf16.msra.mxu0 %v4599_v61  ;;  %3240 = vmatpush1.bf16.msra.mxu1 %v4602_v62  ;;  %v1435_v61 = vrot.slane %v5670_v48, %v5627_v39  ;;  %v4685_v62 = vld [vmem:[#allocation13 + $0x404] ss:$16 sps:$4 sm:$0xff]  }
 0x3fe   : > { %3077 = vmatprep.subr.bf16.mxu0 %v4607_v63  ;;  %3241 = vmatprep.subr.bf16.mxu1 %v4610_v0  ;;  %v4688_v63 = vld [vmem:[#allocation13 + $0x40c] ss:$16 sps:$4 sm:$0xff]   ;;  %v1447_v0 = vrot.slane %v5670_v48, %v792_v44 }
 0x3ff   : > { %v4700_v44 = vld [vmem:[#allocation13 + $0x44c] ss:$16 sps:$4 sm:$0xff]  }
 0x401   : > { %3078 = vmatpush1.bf16.msra.mxu0 %v4605_v1  ;;  %3242 = vmatpush1.bf16.msra.mxu1 %v4608_v2  ;;  %v4683_v1 = vld [vmem:[#allocation13 + $0x400] ss:$16 sps:$4 sm:$0xff]   ;;  %v1466_v2 = vpack.c.bf16 %v1435_v61, %v1435_v61  ;;  %v4758_v61 = vld [vmem:[#allocation13 + $0x588] ss:$16 sps:$4 sm:$0xff]  }
 0x402   : > { %3079 = vmatprep.subr.bf16.mxu0 %v4613_v3  ;;  %3243 = vmatprep.subr.bf16.mxu1 %v4616_v4  ;;  %v4686_v3 = vld [vmem:[#allocation13 + $0x408] ss:$16 sps:$4 sm:$0xff]   ;;  %v1469_v4 = vpack.c.bf16 %v1447_v0, %v1447_v0  ;;  %v4761_v0 = vld [vmem:[#allocation13 + $0x5a0] ss:$16 sps:$4 sm:$0xff]  }
 0x405   : > { %3080 = vmatpush1.bf16.msra.mxu0 %v4611_v5  ;;  %3244 = vmatpush1.bf16.msra.mxu1 %v4614_v6  ;;  %v4691_v5 = vld [vmem:[#allocation13 + $0x424] ss:$16 sps:$4 sm:$0xff]   ;;  %v4694_v6 = vld [vmem:[#allocation13 + $0x42c] ss:$16 sps:$4 sm:$0xff]  }
 0x406   : > { %3081 = vmatprep.subr.bf16.mxu0 %v4619_v40  ;;  %3245 = vmatprep.subr.bf16.mxu1 %v4622_v7  ;;  %v4689_v40 = vld [vmem:[#allocation13 + $0x420] ss:$16 sps:$4 sm:$0xff]   ;;  %v4692_v7 = vld [vmem:[#allocation13 + $0x428] ss:$16 sps:$4 sm:$0xff]  }
 0x409   : > { %3082 = vmatpush1.bf16.msra.mxu0 %v4617_v8  ;;  %3246 = vmatpush1.bf16.msra.mxu1 %v4620_v9  ;;  %v4697_v8 = vld [vmem:[#allocation13 + $0x444] ss:$16 sps:$4 sm:$0xff]   ;;  %v4695_v9 = vld [vmem:[#allocation13 + $0x440] ss:$16 sps:$4 sm:$0xff]  }
 0x40a   : > { %3083 = vmatprep.subr.bf16.mxu0 %v4625_v10  ;;  %3247 = vmatprep.subr.bf16.mxu1 %v4628_v11  ;;  %v4698_v10 = vld [vmem:[#allocation13 + $0x448] ss:$16 sps:$4 sm:$0xff]   ;;  %v4703_v11 = vld [vmem:[#allocation13 + $0x464] ss:$16 sps:$4 sm:$0xff]  }
 0x40d   : > { %3084 = vmatpush1.bf16.msra.mxu0 %v4623_v12  ;;  %3248 = vmatpush1.bf16.msra.mxu1 %v4626_v13  ;;  %v4706_v12 = vld [vmem:[#allocation13 + $0x46c] ss:$16 sps:$4 sm:$0xff]   ;;  %v4701_v13 = vld [vmem:[#allocation13 + $0x460] ss:$16 sps:$4 sm:$0xff]  }
 0x40e   : > { %3085 = vmatprep.subr.bf16.mxu0 %v4631_v14  ;;  %3249 = vmatprep.subr.bf16.mxu1 %v4634_v15  ;;  %v4704_v14 = vld [vmem:[#allocation13 + $0x468] ss:$16 sps:$4 sm:$0xff]   ;;  %v4709_v15 = vld [vmem:[#allocation13 + $0x484] ss:$16 sps:$4 sm:$0xff]  }
 0x411   : > { %3086 = vmatpush1.bf16.msra.mxu0 %v4629_v16  ;;  %3250 = vmatpush1.bf16.msra.mxu1 %v4632_v17  ;;  %v4712_v16 = vld [vmem:[#allocation13 + $0x48c] ss:$16 sps:$4 sm:$0xff]   ;;  %v4707_v17 = vld [vmem:[#allocation13 + $0x480] ss:$16 sps:$4 sm:$0xff]  }
 0x412   : > { %3087 = vmatprep.subr.bf16.mxu0 %v4637_v18  ;;  %3251 = vmatprep.subr.bf16.mxu1 %v4640_v19  ;;  %v4710_v18 = vld [vmem:[#allocation13 + $0x488] ss:$16 sps:$4 sm:$0xff]   ;;  %v4715_v19 = vld [vmem:[#allocation13 + $0x4a4] ss:$16 sps:$4 sm:$0xff]  }
 0x415   : > { %3088 = vmatpush1.bf16.msra.mxu0 %v4635_v20  ;;  %3252 = vmatpush1.bf16.msra.mxu1 %v4638_v21  ;;  %v4718_v20 = vld [vmem:[#allocation13 + $0x4ac] ss:$16 sps:$4 sm:$0xff]   ;;  %v4713_v21 = vld [vmem:[#allocation13 + $0x4a0] ss:$16 sps:$4 sm:$0xff]  }
 0x416   : > { %3089 = vmatprep.subr.bf16.mxu0 %v4643_v22  ;;  %3253 = vmatprep.subr.bf16.mxu1 %v4646_v23  ;;  %v4716_v22 = vld [vmem:[#allocation13 + $0x4a8] ss:$16 sps:$4 sm:$0xff]   ;;  %v4721_v23 = vld [vmem:[#allocation13 + $0x4c4] ss:$16 sps:$4 sm:$0xff]  }
 0x419   : > { %3090 = vmatpush1.bf16.msra.mxu0 %v4641_v24  ;;  %3254 = vmatpush1.bf16.msra.mxu1 %v4644_v25  ;;  %v4724_v24 = vld [vmem:[#allocation13 + $0x4cc] ss:$16 sps:$4 sm:$0xff]   ;;  %v4719_v25 = vld [vmem:[#allocation13 + $0x4c0] ss:$16 sps:$4 sm:$0xff]  }
 0x41a   : > { %3091 = vmatprep.subr.bf16.mxu0 %v4649_v26  ;;  %3255 = vmatprep.subr.bf16.mxu1 %v4652_v27  ;;  %v4722_v26 = vld [vmem:[#allocation13 + $0x4c8] ss:$16 sps:$4 sm:$0xff]   ;;  %v4727_v27 = vld [vmem:[#allocation13 + $0x4e4] ss:$16 sps:$4 sm:$0xff]  }
 0x41d   : > { %3092 = vmatpush1.bf16.msra.mxu0 %v4647_v28  ;;  %3256 = vmatpush1.bf16.msra.mxu1 %v4650_v30  ;;  %v4730_v28 = vld [vmem:[#allocation13 + $0x4ec] ss:$16 sps:$4 sm:$0xff]   ;;  %v4725_v30 = vld [vmem:[#allocation13 + $0x4e0] ss:$16 sps:$4 sm:$0xff]  }
 0x41e   : > { %3093 = vmatprep.subr.bf16.mxu0 %v4655_v31  ;;  %3257 = vmatprep.subr.bf16.mxu1 %v4658_v32  ;;  %v4728_v31 = vld [vmem:[#allocation13 + $0x4e8] ss:$16 sps:$4 sm:$0xff]   ;;  %v4733_v32 = vld [vmem:[#allocation13 + $0x504] ss:$16 sps:$4 sm:$0xff]  }
 0x421   : > { %3094 = vmatpush1.bf16.msra.mxu0 %v4653_v33  ;;  %3258 = vmatpush1.bf16.msra.mxu1 %v4656_v34  ;;  %v4736_v33 = vld [vmem:[#allocation13 + $0x50c] ss:$16 sps:$4 sm:$0xff]   ;;  %v4731_v34 = vld [vmem:[#allocation13 + $0x500] ss:$16 sps:$4 sm:$0xff]  }
 0x422   : > { %3095 = vmatprep.subr.bf16.mxu0 %v4661_v46  ;;  %3259 = vmatprep.subr.bf16.mxu1 %v4664_v47  ;;  %v4734_v46 = vld [vmem:[#allocation13 + $0x508] ss:$16 sps:$4 sm:$0xff]   ;;  %v4739_v47 = vld [vmem:[#allocation13 + $0x524] ss:$16 sps:$4 sm:$0xff]  }
 0x425   : > { %3096 = vmatpush1.bf16.msra.mxu0 %v4659_v49  ;;  %3260 = vmatpush1.bf16.msra.mxu1 %v4662_v50  ;;  %v4742_v49 = vld [vmem:[#allocation13 + $0x52c] ss:$16 sps:$4 sm:$0xff]   ;;  %v4737_v50 = vld [vmem:[#allocation13 + $0x520] ss:$16 sps:$4 sm:$0xff]  }
 0x426   : > { %3097 = vmatprep.subr.bf16.mxu0 %v4667_v51  ;;  %3261 = vmatprep.subr.bf16.mxu1 %v4670_v52  ;;  %v4740_v51 = vld [vmem:[#allocation13 + $0x528] ss:$16 sps:$4 sm:$0xff]   ;;  %v4745_v52 = vld [vmem:[#allocation13 + $0x544] ss:$16 sps:$4 sm:$0xff]  }
 0x429   : > { %3098 = vmatpush1.bf16.msra.mxu0 %v4665_v53  ;;  %3262 = vmatpush1.bf16.msra.mxu1 %v4668_v54  ;;  %v4748_v53 = vld [vmem:[#allocation13 + $0x54c] ss:$16 sps:$4 sm:$0xff]   ;;  %v4743_v54 = vld [vmem:[#allocation13 + $0x540] ss:$16 sps:$4 sm:$0xff]  }
 0x42a   : > { %3099 = vmatprep.subr.bf16.mxu0 %v4673_v55  ;;  %3263 = vmatprep.subr.bf16.mxu1 %v4676_v35  ;;  %v4746_v55 = vld [vmem:[#allocation13 + $0x548] ss:$16 sps:$4 sm:$0xff]   ;;  %v4751_v35 = vld [vmem:[#allocation13 + $0x564] ss:$16 sps:$4 sm:$0xff]  }
 0x42d   : > { %3100 = vmatpush1.bf16.msra.mxu0 %v4671_v56  ;;  %3264 = vmatpush1.bf16.msra.mxu1 %v4674_v29  ;;  %v4754_v56 = vld [vmem:[#allocation13 + $0x56c] ss:$16 sps:$4 sm:$0xff]   ;;  %v4749_v29 = vld [vmem:[#allocation13 + $0x560] ss:$16 sps:$4 sm:$0xff]  }
 0x42e   : > { %3101 = vmatprep.subr.bf16.mxu0 %v4679_v57  ;;  %3265 = vmatprep.subr.bf16.mxu1 %v4682_v58  ;;  %v4752_v57 = vld [vmem:[#allocation13 + $0x568] ss:$16 sps:$4 sm:$0xff]   ;;  %v4757_v58 = vld [vmem:[#allocation13 + $0x584] ss:$16 sps:$4 sm:$0xff]  }
 0x431   : > { %3102 = vmatpush1.bf16.msra.mxu0 %v4677_v59  ;;  %3266 = vmatpush1.bf16.msra.mxu1 %v4680_v60  ;;  %v4760_v59 = vld [vmem:[#allocation13 + $0x58c] ss:$16 sps:$4 sm:$0xff]   ;;  %v4755_v60 = vld [vmem:[#allocation13 + $0x580] ss:$16 sps:$4 sm:$0xff]  }
 0x432   : > { %3112 = vmatprep.subr.bf16.mxu0 %v4685_v62  ;;  %3276 = vmatprep.subr.bf16.mxu1 %v4688_v63  ;;  %v4763_v62 = vld [vmem:[#allocation13 + $0x5a4] ss:$16 sps:$4 sm:$0xff]   ;;  %v4766_v63 = vld [vmem:[#allocation13 + $0x5ac] ss:$16 sps:$4 sm:$0xff]  }
 0x434   : > { %3104 = vmatmul.mubr.bf16.vlgmr.msra.gmra.mrb[12].mxu0 %v1466_v2  ;;  %3268 = vmatmul.mubr.bf16.vlgmr.msra.gmra.mrb[12].mxu1 %v1466_v2  ;;  %v4769_v2 = vld [vmem:[#allocation13 + $0x5c4] ss:$16 sps:$4 sm:$0xff]  }
 0x435   : > { %3113 = vmatpush1.bf16.msra.mxu0 %v4683_v1  ;;  %3144 = vmatprep.mubr.bf16.mxu0 %v1469_v4  ;;  %v4764_v1 = vld [vmem:[#allocation13 + $0x5a8] ss:$16 sps:$4 sm:$0xff]  }
 0x436   : > { %3277 = vmatpush1.bf16.msra.mxu1 %v4686_v3  ;;  %3308 = vmatprep.mubr.bf16.mxu1 %v1469_v4  ;;  %v4772_v3 = vld [vmem:[#allocation13 + $0x5cc] ss:$16 sps:$4 sm:$0xff]   ;;  %v4767_v4 = vld [vmem:[#allocation13 + $0x5c0] ss:$16 sps:$4 sm:$0xff]  }
 0x437   : > { %3114 = vmatprep.subr.bf16.mxu0 %v4691_v5  ;;  %3278 = vmatprep.subr.bf16.mxu1 %v4694_v6  ;;  %v4770_v5 = vld [vmem:[#allocation13 + $0x5c8] ss:$16 sps:$4 sm:$0xff]   ;;  %v4775_v6 = vld [vmem:[#allocation13 + $0x5e4] ss:$16 sps:$4 sm:$0xff]  }
 0x439   : > { %3115 = vmatpush1.bf16.msra.mxu0 %v4689_v40  ;;  %v4778_v40 = vld [vmem:[#allocation13 + $0x5ec] ss:$16 sps:$4 sm:$0xff]  }
 0x43a   : > { %3279 = vmatpush1.bf16.msra.mxu1 %v4692_v7  ;;  %3116 = vmatprep.subr.bf16.mxu0 %v4697_v8  ;;  %v4773_v7 = vld [vmem:[#allocation13 + $0x5e0] ss:$16 sps:$4 sm:$0xff]   ;;  %v4776_v8 = vld [vmem:[#allocation13 + $0x5e8] ss:$16 sps:$4 sm:$0xff]  }
 0x43b   : > { %3280 = vmatprep.subr.bf16.mxu1 %v4700_v44  ;;  %v1443_v44 = vrot.slane %v5670_v48, %v788_v36  ;;  %v4785_v36 = vld [vmem:[#allocation13 + $0x620] ss:$16 sps:$4 sm:$0xff]  }
 0x43d   : > { %3117 = vmatpush1.bf16.msra.mxu0 %v4695_v9  ;;  %v4781_v9 = vld [vmem:[#allocation13 + $0x604] ss:$16 sps:$4 sm:$0xff]  }
 0x43e   : > { %3281 = vmatpush1.bf16.msra.mxu1 %v4698_v10  ;;  %3118 = vmatprep.subr.bf16.mxu0 %v4703_v11  ;;  %v4784_v10 = vld [vmem:[#allocation13 + $0x60c] ss:$16 sps:$4 sm:$0xff]   ;;  %v1455_v11 = vrot.slane %v5670_v48, %v800_v45 }
 0x43f   : > { %3282 = vmatprep.subr.bf16.mxu1 %v4706_v12  ;;  %v4779_v12 = vld [vmem:[#allocation13 + $0x600] ss:$16 sps:$4 sm:$0xff]   ;;  %v4796_v45 = vld [vmem:[#allocation13 + $0x64c] ss:$16 sps:$4 sm:$0xff]  }
 0x441   : > { %3119 = vmatpush1.bf16.msra.mxu0 %v4701_v13  ;;  %v1468_v13 = vpack.c.bf16 %v1443_v44, %v1443_v44  ;;  %v4862_v44 = vld [vmem:[#allocation13 + $0x7ac] ss:$16 sps:$4 sm:$0xff]  }
 0x442   : > { %3283 = vmatpush1.bf16.msra.mxu1 %v4704_v14  ;;  %3120 = vmatprep.subr.bf16.mxu0 %v4709_v15  ;;  %v4782_v14 = vld [vmem:[#allocation13 + $0x608] ss:$16 sps:$4 sm:$0xff]   ;;  %v4787_v15 = vld [vmem:[#allocation13 + $0x624] ss:$16 sps:$4 sm:$0xff]  }
 0x443   : > { %3284 = vmatprep.subr.bf16.mxu1 %v4712_v16  ;;  %v1471_v16 = vpack.c.bf16 %v1455_v11, %v1455_v11  ;;  %v4865_v11 = vld [vmem:[#allocation13 + $0x7c4] ss:$16 sps:$4 sm:$0xff]  }
 0x445   : > { %3121 = vmatpush1.bf16.msra.mxu0 %v4707_v17  ;;  %v4790_v17 = vld [vmem:[#allocation13 + $0x62c] ss:$16 sps:$4 sm:$0xff]  }
 0x446   : > { %3285 = vmatpush1.bf16.msra.mxu1 %v4710_v18  ;;  %3122 = vmatprep.subr.bf16.mxu0 %v4715_v19  ;;  %v4788_v18 = vld [vmem:[#allocation13 + $0x628] ss:$16 sps:$4 sm:$0xff]   ;;  %v4793_v19 = vld [vmem:[#allocation13 + $0x644] ss:$16 sps:$4 sm:$0xff]  }
 0x447   : > { %3286 = vmatprep.subr.bf16.mxu1 %v4718_v20  ;;  %v4791_v20 = vld [vmem:[#allocation13 + $0x640] ss:$16 sps:$4 sm:$0xff]  }
 0x449   : > { %3123 = vmatpush1.bf16.msra.mxu0 %v4713_v21  ;;  %v4794_v21 = vld [vmem:[#allocation13 + $0x648] ss:$16 sps:$4 sm:$0xff]  }
 0x44a   : > { %3287 = vmatpush1.bf16.msra.mxu1 %v4716_v22  ;;  %3124 = vmatprep.subr.bf16.mxu0 %v4721_v23  ;;  %v4799_v22 = vld [vmem:[#allocation13 + $0x664] ss:$16 sps:$4 sm:$0xff]   ;;  %v4802_v23 = vld [vmem:[#allocation13 + $0x66c] ss:$16 sps:$4 sm:$0xff]  }
 0x44b   : > { %3288 = vmatprep.subr.bf16.mxu1 %v4724_v24  ;;  %v4797_v24 = vld [vmem:[#allocation13 + $0x660] ss:$16 sps:$4 sm:$0xff]  }
 0x44d   : > { %3125 = vmatpush1.bf16.msra.mxu0 %v4719_v25  ;;  %v4800_v25 = vld [vmem:[#allocation13 + $0x668] ss:$16 sps:$4 sm:$0xff]  }
 0x44e   : > { %3289 = vmatpush1.bf16.msra.mxu1 %v4722_v26  ;;  %3126 = vmatprep.subr.bf16.mxu0 %v4727_v27  ;;  %v4805_v26 = vld [vmem:[#allocation13 + $0x684] ss:$16 sps:$4 sm:$0xff]   ;;  %v4808_v27 = vld [vmem:[#allocation13 + $0x68c] ss:$16 sps:$4 sm:$0xff]  }
 0x44f   : > { %3290 = vmatprep.subr.bf16.mxu1 %v4730_v28  ;;  %v4803_v28 = vld [vmem:[#allocation13 + $0x680] ss:$16 sps:$4 sm:$0xff]  }
 0x451   : > { %3127 = vmatpush1.bf16.msra.mxu0 %v4725_v30  ;;  %v4806_v30 = vld [vmem:[#allocation13 + $0x688] ss:$16 sps:$4 sm:$0xff]  }
 0x452   : > { %3291 = vmatpush1.bf16.msra.mxu1 %v4728_v31  ;;  %3128 = vmatprep.subr.bf16.mxu0 %v4733_v32  ;;  %v4811_v31 = vld [vmem:[#allocation13 + $0x6a4] ss:$16 sps:$4 sm:$0xff]   ;;  %v4814_v32 = vld [vmem:[#allocation13 + $0x6ac] ss:$16 sps:$4 sm:$0xff]  }
 0x453   : > { %3292 = vmatprep.subr.bf16.mxu1 %v4736_v33  ;;  %v4809_v33 = vld [vmem:[#allocation13 + $0x6a0] ss:$16 sps:$4 sm:$0xff]  }
 0x455   : > { %3129 = vmatpush1.bf16.msra.mxu0 %v4731_v34  ;;  %v4812_v34 = vld [vmem:[#allocation13 + $0x6a8] ss:$16 sps:$4 sm:$0xff]  }
 0x456   : > { %3293 = vmatpush1.bf16.msra.mxu1 %v4734_v46  ;;  %3130 = vmatprep.subr.bf16.mxu0 %v4739_v47  ;;  %v4817_v46 = vld [vmem:[#allocation13 + $0x6c4] ss:$16 sps:$4 sm:$0xff]   ;;  %v4820_v47 = vld [vmem:[#allocation13 + $0x6cc] ss:$16 sps:$4 sm:$0xff]  }
 0x457   : > { %3294 = vmatprep.subr.bf16.mxu1 %v4742_v49  ;;  %v4815_v49 = vld [vmem:[#allocation13 + $0x6c0] ss:$16 sps:$4 sm:$0xff]  }
 0x459   : > { %3131 = vmatpush1.bf16.msra.mxu0 %v4737_v50  ;;  %v4818_v50 = vld [vmem:[#allocation13 + $0x6c8] ss:$16 sps:$4 sm:$0xff]  }
 0x45a   : > { %3295 = vmatpush1.bf16.msra.mxu1 %v4740_v51  ;;  %3132 = vmatprep.subr.bf16.mxu0 %v4745_v52  ;;  %v4823_v51 = vld [vmem:[#allocation13 + $0x6e4] ss:$16 sps:$4 sm:$0xff]   ;;  %v4826_v52 = vld [vmem:[#allocation13 + $0x6ec] ss:$16 sps:$4 sm:$0xff]  }
 0x45b   : > { %3296 = vmatprep.subr.bf16.mxu1 %v4748_v53  ;;  %v4821_v53 = vld [vmem:[#allocation13 + $0x6e0] ss:$16 sps:$4 sm:$0xff]  }
 0x45d   : > { %3133 = vmatpush1.bf16.msra.mxu0 %v4743_v54  ;;  %v4824_v54 = vld [vmem:[#allocation13 + $0x6e8] ss:$16 sps:$4 sm:$0xff]  }
 0x45e   : > { %3297 = vmatpush1.bf16.msra.mxu1 %v4746_v55  ;;  %3134 = vmatprep.subr.bf16.mxu0 %v4751_v35  ;;  %v4829_v55 = vld [vmem:[#allocation13 + $0x704] ss:$16 sps:$4 sm:$0xff]   ;;  %v4832_v35 = vld [vmem:[#allocation13 + $0x70c] ss:$16 sps:$4 sm:$0xff]  }
 0x45f   : > { %3298 = vmatprep.subr.bf16.mxu1 %v4754_v56  ;;  %v4827_v56 = vld [vmem:[#allocation13 + $0x700] ss:$16 sps:$4 sm:$0xff]  }
 0x461   : > { %3135 = vmatpush1.bf16.msra.mxu0 %v4749_v29  ;;  %v4830_v29 = vld [vmem:[#allocation13 + $0x708] ss:$16 sps:$4 sm:$0xff]  }
 0x462   : > { %3299 = vmatpush1.bf16.msra.mxu1 %v4752_v57  ;;  %3136 = vmatprep.subr.bf16.mxu0 %v4757_v58  ;;  %v4835_v57 = vld [vmem:[#allocation13 + $0x724] ss:$16 sps:$4 sm:$0xff]   ;;  %v4838_v58 = vld [vmem:[#allocation13 + $0x72c] ss:$16 sps:$4 sm:$0xff]  }
 0x463   : > { %3300 = vmatprep.subr.bf16.mxu1 %v4760_v59  ;;  %v4833_v59 = vld [vmem:[#allocation13 + $0x720] ss:$16 sps:$4 sm:$0xff]  }
 0x465   : > { %3137 = vmatpush1.bf16.msra.mxu0 %v4755_v60  ;;  %v4836_v60 = vld [vmem:[#allocation13 + $0x728] ss:$16 sps:$4 sm:$0xff]  }
 0x466   : > { %3301 = vmatpush1.bf16.msra.mxu1 %v4758_v61  ;;  %3138 = vmatprep.subr.bf16.mxu0 %v4763_v62  ;;  %v4841_v61 = vld [vmem:[#allocation13 + $0x744] ss:$16 sps:$4 sm:$0xff]   ;;  %v4844_v62 = vld [vmem:[#allocation13 + $0x74c] ss:$16 sps:$4 sm:$0xff]  }
 0x467   : > { %3302 = vmatprep.subr.bf16.mxu1 %v4766_v63  ;;  %v4839_v63 = vld [vmem:[#allocation13 + $0x740] ss:$16 sps:$4 sm:$0xff]  }
 0x469   : > { %3139 = vmatpush1.bf16.msra.mxu0 %v4761_v0  ;;  %v4842_v0 = vld [vmem:[#allocation13 + $0x748] ss:$16 sps:$4 sm:$0xff]  }
 0x46a   : > { %3303 = vmatpush1.bf16.msra.mxu1 %v4764_v1  ;;  %3140 = vmatprep.subr.bf16.mxu0 %v4769_v2  ;;  %v4847_v1 = vld [vmem:[#allocation13 + $0x764] ss:$16 sps:$4 sm:$0xff]   ;;  %v4850_v2 = vld [vmem:[#allocation13 + $0x76c] ss:$16 sps:$4 sm:$0xff]  }
 0x46b   : > { %3304 = vmatprep.subr.bf16.mxu1 %v4772_v3  ;;  %v4845_v3 = vld [vmem:[#allocation13 + $0x760] ss:$16 sps:$4 sm:$0xff]  }
 0x46d   : > { %3141 = vmatpush1.bf16.msra.mxu0 %v4767_v4  ;;  %v4848_v4 = vld [vmem:[#allocation13 + $0x768] ss:$16 sps:$4 sm:$0xff]  }
 0x46e   : > { %3305 = vmatpush1.bf16.msra.mxu1 %v4770_v5  ;;  %3142 = vmatprep.subr.bf16.mxu0 %v4775_v6  ;;  %v4853_v5 = vld [vmem:[#allocation13 + $0x784] ss:$16 sps:$4 sm:$0xff]   ;;  %v4856_v6 = vld [vmem:[#allocation13 + $0x78c] ss:$16 sps:$4 sm:$0xff]  }
 0x46f   : > { %3306 = vmatprep.subr.bf16.mxu1 %v4778_v40  ;;  %v4851_v40 = vld [vmem:[#allocation13 + $0x780] ss:$16 sps:$4 sm:$0xff]  }
 0x471   : > { %3143 = vmatpush1.bf16.msra.mxu0 %v4773_v7  ;;  %v4854_v7 = vld [vmem:[#allocation13 + $0x788] ss:$16 sps:$4 sm:$0xff]  }
 0x472   : > { %3307 = vmatpush1.bf16.msra.mxu1 %v4776_v8  ;;  %3153 = vmatprep.subr.bf16.mxu0 %v4781_v9  ;;  %v4859_v8 = vld [vmem:[#allocation13 + $0x7a4] ss:$16 sps:$4 sm:$0xff]   ;;  %v4857_v9 = vld [vmem:[#allocation13 + $0x7a0] ss:$16 sps:$4 sm:$0xff]  }
 0x473   : > { %3317 = vmatprep.subr.bf16.mxu1 %v4784_v10  ;;  %v4860_v10 = vld [vmem:[#allocation13 + $0x7a8] ss:$16 sps:$4 sm:$0xff]  }
 0x474   : > { %3145 = vmatmul.mubr.bf16.vlgmr.msra.gmra.mrb[12].mxu0 %v1468_v13 }
 0x475   : > { %3309 = vmatmul.mubr.bf16.vlgmr.msra.gmra.mrb[12].mxu1 %v1468_v13  ;;  %3154 = vmatpush1.bf16.msra.mxu0 %v4779_v12  ;;  %v4868_v12 = vld [vmem:[#allocation13 + $0x7cc] ss:$16 sps:$4 sm:$0xff]   ;;  %v4863_v13 = vld [vmem:[#allocation13 + $0x7c0] ss:$16 sps:$4 sm:$0xff]  }
 0x476   : > { %3185 = vmatprep.mubr.bf16.mxu0 %v1471_v16  ;;  %3318 = vmatpush1.bf16.msra.mxu1 %v4782_v14  ;;  %v4866_v14 = vld [vmem:[#allocation13 + $0x7c8] ss:$16 sps:$4 sm:$0xff]  }
 0x477   : > { %3349 = vmatprep.mubr.bf16.mxu1 %v1471_v16  ;;  %3155 = vmatprep.subr.bf16.mxu0 %v4787_v15  ;;  %v4871_v15 = vld [vmem:[#allocation13 + $0x7e4] ss:$16 sps:$4 sm:$0xff]   ;;  %v4874_v16 = vld [vmem:[#allocation13 + $0x7ec] ss:$16 sps:$4 sm:$0xff]  }
 0x478   : > { %3319 = vmatprep.subr.bf16.mxu1 %v4790_v17  ;;  %v4869_v17 = vld [vmem:[#allocation13 + $0x7e0] ss:$16 sps:$4 sm:$0xff]  }
 0x479   : > { %3156 = vmatpush1.bf16.msra.mxu0 %v4785_v36  ;;  %v4872_v36 = vld [vmem:[#allocation13 + $0x7e8] ss:$16 sps:$4 sm:$0xff]  }
 0x47a   : > { %3320 = vmatpush1.bf16.msra.mxu1 %v4788_v18  ;;  %3157 = vmatprep.subr.bf16.mxu0 %v4793_v19  ;;  %v1451_v18 = vrot.slane %v5670_v48, %v796_v43  ;;  %v4875_v19 = vld [vmem:[#allocation16 + $0x40] sm:$0xff]   ;;  %v4883_v43 = vld [vmem:[#allocation16 + $0x50] sm:$0xff]  }
 0x47b   : > { %3321 = vmatprep.subr.bf16.mxu1 %v4796_v45  ;;  %v4876_v45 = vld [vmem:[#allocation16 + $0xc0] sm:$0xff]   ;;  %v4884_v48 = vld [vmem:[#allocation16 + $0xd0] sm:$0xff]  }
 0x47d   : > { %3158 = vmatpush1.bf16.msra.mxu0 %v4791_v20  ;;  %v4877_v20 = vld [vmem:[#allocation16] sm:$0xff]  }
 0x47e   : > { %3322 = vmatpush1.bf16.msra.mxu1 %v4794_v21  ;;  %3159 = vmatprep.subr.bf16.mxu0 %v4799_v22  ;;  %v1470_v21 = vpack.c.bf16 %v1451_v18, %v1451_v18  ;;  %v4878_v22 = vld [vmem:[#allocation16 + $0x80] sm:$0xff]  }
 0x47f   : > { %3323 = vmatprep.subr.bf16.mxu1 %v4802_v23  ;;  %v4879_v23 = vld [vmem:[#allocation16 + $0x48] sm:$0xff]  }
 0x481   : > { %3160 = vmatpush1.bf16.msra.mxu0 %v4797_v24  ;;  %v4880_v24 = vld [vmem:[#allocation16 + $0xc8] sm:$0xff]  }
 0x482   : > { %3324 = vmatpush1.bf16.msra.mxu1 %v4800_v25  ;;  %3161 = vmatprep.subr.bf16.mxu0 %v4805_v26  ;;  %v4881_v25 = vld [vmem:[#allocation16 + $0x8] sm:$0xff]   ;;  %v4885_v26 = vld [vmem:[#allocation16 + $0x10] sm:$0xff]  }
 0x483   : > { %3325 = vmatprep.subr.bf16.mxu1 %v4808_v27  ;;  %v4886_v27 = vld [vmem:[#allocation16 + $0x90] sm:$0xff]  }
 0x485   : > { %3162 = vmatpush1.bf16.msra.mxu0 %v4803_v28  ;;  %v4887_v28 = vld [vmem:[#allocation16 + $0x58] sm:$0xff]  }
 0x486   : > { %3326 = vmatpush1.bf16.msra.mxu1 %v4806_v30  ;;  %3163 = vmatprep.subr.bf16.mxu0 %v4811_v31  ;;  %v4888_v30 = vld [vmem:[#allocation16 + $0xd8] sm:$0xff]  }
 0x487   : > { %3327 = vmatprep.subr.bf16.mxu1 %v4814_v32  ;;  %v4889_v31 = vld [vmem:[#allocation16 + $0x18] sm:$0xff]  }
 0x488   : > { %v4890_v32 = vld [vmem:[#allocation16 + $0x98] sm:$0xff]  }
 0x489   : > { %3164 = vmatpush1.bf16.msra.mxu0 %v4809_v33  ;;  %v4891_v33 = vld [vmem:[#allocation16 + $0x60] sm:$0xff]  }
 0x48a   : > { %3328 = vmatpush1.bf16.msra.mxu1 %v4812_v34  ;;  %3165 = vmatprep.subr.bf16.mxu0 %v4817_v46  ;;  %v4892_v34 = vld [vmem:[#allocation16 + $0xe0] sm:$0xff]  }
 0x48b   : > { %3329 = vmatprep.subr.bf16.mxu1 %v4820_v47  ;;  %v4893_v46 = vld [vmem:[#allocation16 + $0x20] sm:$0xff]  }
 0x48c   : > { %v4894_v47 = vld [vmem:[#allocation16 + $0xa0] sm:$0xff]  }
 0x48d   : > { %3166 = vmatpush1.bf16.msra.mxu0 %v4815_v49  ;;  %v4895_v49 = vld [vmem:[#allocation16 + $0x68] sm:$0xff]  }
 0x48e   : > { %3330 = vmatpush1.bf16.msra.mxu1 %v4818_v50  ;;  %3167 = vmatprep.subr.bf16.mxu0 %v4823_v51  ;;  %v4896_v50 = vld [vmem:[#allocation16 + $0xe8] sm:$0xff]  }
 0x48f   : > { %3331 = vmatprep.subr.bf16.mxu1 %v4826_v52  ;;  %v4897_v51 = vld [vmem:[#allocation16 + $0x28] sm:$0xff]  }
 0x490   : > { %v4898_v52 = vld [vmem:[#allocation16 + $0xa8] sm:$0xff]  }
 0x491   : > { %3168 = vmatpush1.bf16.msra.mxu0 %v4821_v53  ;;  %v4899_v53 = vld [vmem:[#allocation16 + $0x70] sm:$0xff]  }
 0x492   : > { %3332 = vmatpush1.bf16.msra.mxu1 %v4824_v54  ;;  %3169 = vmatprep.subr.bf16.mxu0 %v4829_v55  ;;  %v4900_v54 = vld [vmem:[#allocation16 + $0xf0] sm:$0xff]  }
 0x493   : > { %3333 = vmatprep.subr.bf16.mxu1 %v4832_v35  ;;  %v4901_v55 = vld [vmem:[#allocation16 + $0x30] sm:$0xff]  }
 0x494   : > { %v4902_v35 = vld [vmem:[#allocation16 + $0xb0] sm:$0xff]  }
 0x495   : > { %3170 = vmatpush1.bf16.msra.mxu0 %v4827_v56  ;;  %v4903_v56 = vld [vmem:[#allocation16 + $0x78] sm:$0xff]  }
 0x496   : > { %3334 = vmatpush1.bf16.msra.mxu1 %v4830_v29  ;;  %3171 = vmatprep.subr.bf16.mxu0 %v4835_v57  ;;  %v4904_v29 = vld [vmem:[#allocation16 + $0xf8] sm:$0xff]  }
 0x497   : > { %3335 = vmatprep.subr.bf16.mxu1 %v4838_v58  ;;  %v4905_v57 = vld [vmem:[#allocation16 + $0x38] sm:$0xff]  }
 0x498   : > { %v4906_v58 = vld [vmem:[#allocation16 + $0xb8] sm:$0xff]  }
 0x499   : > { %3172 = vmatpush1.bf16.msra.mxu0 %v4833_v59  ;;  %v1728_v59 = vld [vmem:[#allocation14] sm:$0xf] }
 0x49a   : > { %3336 = vmatpush1.bf16.msra.mxu1 %v4836_v60  ;;  %3173 = vmatprep.subr.bf16.mxu0 %v4841_v61  ;;  %v3013_v60 = vrot.slane %v1728_v59, %v5624_v38  ;;  %v3021_v61 = vrot.slane %v1728_v59, %v5627_v39 }
 0x49b   : > { %3337 = vmatprep.subr.bf16.mxu1 %v4844_v62  ;;  %v3017_v62 = vrot.slane %v1728_v59, %v5632_v41 }
 0x49d   : > { %3174 = vmatpush1.bf16.msra.mxu0 %v4839_v63  ;;  %v3025_v63 = vrot.slane %v1728_v59, %v5635_v42 }
 0x49e   : > { %3338 = vmatpush1.bf16.msra.mxu1 %v4842_v0  ;;  %3175 = vmatprep.subr.bf16.mxu0 %v4847_v1 }
 0x49f   : > { %3339 = vmatprep.subr.bf16.mxu1 %v4850_v2 }
 0x4a1   : > { %3176 = vmatpush1.bf16.msra.mxu0 %v4845_v3 }
 0x4a2   : > { %3340 = vmatpush1.bf16.msra.mxu1 %v4848_v4  ;;  %3177 = vmatprep.subr.bf16.mxu0 %v4853_v5 }
 0x4a3   : > { %3341 = vmatprep.subr.bf16.mxu1 %v4856_v6 }
 0x4a5   : > { %3178 = vmatpush1.bf16.msra.mxu0 %v4851_v40 }
 0x4a6   : > { %3342 = vmatpush1.bf16.msra.mxu1 %v4854_v7  ;;  %3179 = vmatprep.subr.bf16.mxu0 %v4859_v8 }
 0x4a7   : > { %3343 = vmatprep.subr.bf16.mxu1 %v4862_v44 }
 0x4a9   : > { %3180 = vmatpush1.bf16.msra.mxu0 %v4857_v9 }
 0x4aa   : > { %3344 = vmatpush1.bf16.msra.mxu1 %v4860_v10  ;;  %3181 = vmatprep.subr.bf16.mxu0 %v4865_v11 }
 0x4ab   : > { %3345 = vmatprep.subr.bf16.mxu1 %v4868_v12 }
 0x4ad   : > { %3182 = vmatpush1.bf16.msra.mxu0 %v4863_v13 }
 0x4ae   : > { %3346 = vmatpush1.bf16.msra.mxu1 %v4866_v14  ;;  %3183 = vmatprep.subr.bf16.mxu0 %v4871_v15 }
 0x4af   : > { %3347 = vmatprep.subr.bf16.mxu1 %v4874_v16  ;;  %v3430_v16 = vld [vmem:[#allocation17] sm:$0x1] }
 0x4b1   : > { %3184 = vmatpush1.bf16.msra.mxu0 %v4869_v17 }
 0x4b2   : > { %3348 = vmatpush1.bf16.msra.mxu1 %v4872_v36  ;;  %4261 = vmatprep.subr.bf16.mxu0 %v4875_v19 }
 0x4b3   : > { %4283 = vmatprep.subr.bf16.mxu1 %v4876_v45 }
 0x4b4   : > { %3186 = vmatmul.mubr.bf16.vlgmr.msra.gmra.mrb[12].mxu0 %v1470_v21 }
 0x4b5   : > { %3350 = vmatmul.mubr.bf16.vlgmr.msra.gmra.mrb[12].mxu1 %v1470_v21  ;;  %4262 = vmatpush3.bf16.msra.mxu0 %v4877_v20 }
 0x4b6   : > { %4284 = vmatpush3.bf16.msra.mxu1 %v4878_v22  ;;  %4263 = vmatprep.subr.bf16.mxu0 %v4879_v23 }
 0x4b7   : > { %4285 = vmatprep.subr.bf16.mxu1 %v4880_v24 }
 0x4b9   : > { %4264 = vmatpush3.bf16.msra.mxu0 %v4881_v25 }
 0x4ba   : > { %4286 = vmatpush3.bf16.msra.mxu1 %v4882_v37  ;;  %4265 = vmatprep.subr.bf16.mxu0 %v4883_v43 }
 0x4bb   : > { %4287 = vmatprep.subr.bf16.mxu1 %v4884_v48 }
 0x4bd   : > { %4266 = vmatpush3.bf16.msra.mxu0 %v4885_v26 }
 0x4be   : > { %4288 = vmatpush3.bf16.msra.mxu1 %v4886_v27  ;;  %4267 = vmatprep.subr.bf16.mxu0 %v4887_v28 }
 0x4bf   : > { %4289 = vmatprep.subr.bf16.mxu1 %v4888_v30 }
 0x4c1   : > { %4268 = vmatpush3.bf16.msra.mxu0 %v4889_v31 }
 0x4c2   : > { %4290 = vmatpush3.bf16.msra.mxu1 %v4890_v32  ;;  %4269 = vmatprep.subr.bf16.mxu0 %v4891_v33 }
 0x4c3   : > { %4291 = vmatprep.subr.bf16.mxu1 %v4892_v34 }
 0x4c5   : > { %4270 = vmatpush3.bf16.msra.mxu0 %v4893_v46 }
 0x4c6   : > { %4292 = vmatpush3.bf16.msra.mxu1 %v4894_v47  ;;  %4271 = vmatprep.subr.bf16.mxu0 %v4895_v49 }
 0x4c7   : > { %4293 = vmatprep.subr.bf16.mxu1 %v4896_v50 }
 0x4c9   : > { %4272 = vmatpush3.bf16.msra.mxu0 %v4897_v51 }
 0x4ca   : > { %4294 = vmatpush3.bf16.msra.mxu1 %v4898_v52  ;;  %4273 = vmatprep.subr.bf16.mxu0 %v4899_v53 }
 0x4cb   : > { %4295 = vmatprep.subr.bf16.mxu1 %v4900_v54 }
 0x4cd   : > { %4274 = vmatpush3.bf16.msra.mxu0 %v4901_v55 }
 0x4ce   : > { %4296 = vmatpush3.bf16.msra.mxu1 %v4902_v35  ;;  %4275 = vmatprep.subr.bf16.mxu0 %v4903_v56 }
 0x4cf   : > { %4297 = vmatprep.subr.bf16.mxu1 %v4904_v29 }
 0x4d1   : > { %4276 = vmatpush3.bf16.msra.mxu0 %v4905_v57 }
 0x4d2   : > { %4298 = vmatpush3.bf16.msra.mxu1 %v4906_v58 }
 0x587   : > { %v3187_v0 = vpop.f32.mrb[12].mxu0 }
 0x588   : > { %v4323_v1 = vadd.f32 %v3187_v0, %v3013_v60  ;;  %v3351_v2 = vpop.f32.mrb[12].mxu1  ;;  %v3189_v3 = vpop.f32.mrb[13].mxu0 }
 0x589   : > { %v4325_v4 = vadd.f32 %v3351_v2, %v3021_v61  ;;  %v4324_v5 = vadd.f32 %v3189_v3, %v3017_v62  ;;  %v3353_v6 = vpop.f32.mrb[13].mxu1  ;;  %v3191_v40 = vpop.f32.mrb[14].mxu0 }
 0x58a   : > { %v3358_v7 = vmax.f32 %v4323_v1, 0.0  ;;  %v4326_v8 = vadd.f32 %v3353_v6, %v3025_v63  ;;  %v3355_v44 = vpop.f32.mrb[14].mxu1  ;;  %v3192_v9 = vpop.f32.mrb[15].mxu0 }
 0x58b   : > { %v3360_v10 = vmax.f32 %v4325_v4, 0.0  ;;  %v3359_v38 = vmax.f32 %v4324_v5, 0.0  ;;  %v3356_v11 = vpop.f32.mrb[15].mxu1 }
 0x58c   : > { %v3361_v39 = vmax.f32 %v4326_v8, 0.0  ;;  %v3362_v41 = vpack.c.bf16 %v3358_v7, %v3358_v7 }
 0x58d   : > { %v3363_v12 = vpack.c.bf16 %v3359_v38, %v3359_v38  ;;  %v3364_v42 = vpack.c.bf16 %v3360_v10, %v3360_v10 }
 0x58e   : > { %v3365_v13 = vpack.c.bf16 %v3361_v39, %v3361_v39 }
 0x58f   : > { %3655 = vmatprep.mubr.bf16.mxu0 %v3363_v12 }
 0x590   : > { %3695 = vmatprep.mubr.bf16.mxu1 %v3365_v13  ;;  %3656 = vmatmul.mubr.bf16.vlgmr.msra.gmra.mrb[16].mxu0 %v3362_v41 }
 0x591   : > { %3696 = vmatmul.mubr.bf16.vlgmr.msra.gmra.mrb[16].mxu1 %v3364_v42 }
 0x663   : > { %v4277_v14 = vpop.f32.mrb[16].mxu0 }
 0x664   : > { %v4299_v15 = vpop.f32.mrb[16].mxu1  ;;  %v4278_v17 = vpop.f32.mrb[17].mxu0 }
 0x665   : > { %v4279_v36 = vadd.f32 %v4278_v17, %v4277_v14  ;;  %v4300_v18 = vpop.f32.mrb[17].mxu1  ;;  %v4280_v19 = vpop.f32.mrb[18].mxu0 }
 0x666   : > { %v4301_v45 = vadd.f32 %v4300_v18, %v4299_v15  ;;  %v4302_v20 = vpop.f32.mrb[18].mxu1  ;;  %v4281_v21 = vpop.f32.mrb[19].mxu0 }
 0x667   : > { %v3658_v22 = vadd.f32 %v4279_v36, %v3430_v16  ;;  %v4303_v23 = vpop.f32.mrb[19].mxu1 }
 0x669   : > { %v3698_v24 = vadd.f32 %v4301_v45, %v3658_v22 }
 0x66b   : > { %3703 = vst [vmem:[%s544_s27] sm:$0x1] %v3698_v24 }
 0x66c PF: > { %s5746_s3 = sld [smem:[#allocation25_spill]]  ;;  %s5747_s17 = smov %s5229_s18 }
 0x66d   : > { %s5748_s18 = smov %s5751_s19 }
 0x672   : > { %s27_s4 = sadd.s32 1, %s5746_s3  }
 0x673   : > { %p24_p7 = scmp.ge.s32.totalorder %s27_s4, 4   ;;  %s5749_s19 = smov %s27_s4 }
 0x675   :  { %26 = sbr.rel (!%p24_p7) target bundleno = 12 (0xc), region = 143 }
 0x67c   :  { %3721 = vsyncpa [#allocation4], 1 }
 0x67d   :  { %3723 = vsyncpa [#allocation4 + $0x1], 1 }
 0x67e   :  { %3724 = vsyncpa [#allocation6], 1 }
 0x67f   :  { %3725 = vsyncpa [#allocation9], 1 }
 0x680   :  { %3726 = vsyncpa [#allocation12], 1 }
 0x681   :  { %3727 = vsyncpa [#allocation15], 1 }
 0x682   :  { %3728 = vsyncpa [#allocation18], 1 }

// kernel: pointnet_dual_forward.3
= control target key start
LH: loop header
LB: loop body
LE: loop exit
PB: predicated region body
PF: predicated region fallthrough
CT: control target
= control target key end

     0   :  { %s9315_s0 = inlined_call_operand.vmem [shape: f32[2,16,3], index: 0, kind: input, shape index: {}]   ;;  %s9316_s1 = inlined_call_operand.vmem [shape: f32[2,1,128], index: 1, kind: input, shape index: {}]   ;;  %s9317_s2 = inlined_call_operand.vmem [shape: bf16[3,256], index: 2, kind: input, shape index: {}]   ;;  %s9318_s3 = inlined_call_operand.vmem [shape: bf16[128,256], index: 3, kind: input, shape index: {}]   ;;  %s9319_s4 = inlined_call_operand.vmem [shape: f32[1,256], index: 4, kind: input, shape index: {}]   ;;  %s9320_s5 = inlined_call_operand.vmem [shape: bf16[256,512], index: 5, kind: input, shape index: {}]   ;;  %s9321_s6 = inlined_call_operand.vmem [shape: f32[1,512], index: 6, kind: input, shape index: {}]   ;;  %s9322_s7 = inlined_call_operand.vmem [shape: bf16[512,1024], index: 7, kind: input, shape index: {}]   ;;  %s9323_s8 = inlined_call_operand.vmem [shape: f32[1,1024], index: 8, kind: input, shape index: {}]   ;;  %s9324_s9 = inlined_call_operand.hbm [shape: bf16[1024,512], index: 9, kind: input, shape index: {}]   ;;  %s9325_s10 = inlined_call_operand.vmem [shape: f32[1,512], index: 10, kind: input, shape index: {}]   ;;  %s9326_s11 = inlined_call_operand.vmem [shape: bf16[512,128], index: 11, kind: input, shape index: {}]   ;;  %s9327_s12 = inlined_call_operand.vmem [shape: f32[1,128], index: 12, kind: input, shape index: {}]   ;;  %s9328_s13 = inlined_call_operand.vmem [shape: bf16[128,64], index: 13, kind: input, shape index: {}]   ;;  %s9329_s14 = inlined_call_operand.vmem [shape: f32[1,64], index: 14, kind: input, shape index: {}]   ;;  %s9330_s15 = inlined_call_operand.vmem [shape: bf16[64,64], index: 15, kind: input, shape index: {}]   ;;  %s9331_s16 = inlined_call_operand.vmem [shape: f32[1,64], index: 16, kind: input, shape index: {}]   ;;  %s9332_s17 = inlined_call_operand.vmem [shape: bf16[64,128], index: 17, kind: input, shape index: {}]   ;;  %s9333_s18 = inlined_call_operand.vmem [shape: f32[1,128], index: 18, kind: input, shape index: {}]   ;;  %s9334_s19 = inlined_call_operand.hbm [shape: f32[2,1,128], index: 19, kind: output, shape index: {0}]   ;;  %s9335_s20 = inlined_call_operand.vmem [shape: f32[2,1,128], index: 20, kind: output, shape index: {1}]  }
   0x1   :  { %9349 = sst [smem:[#allocation16_spill]] %s9315_s0 }
   0x2   :  { %9350 = sst [smem:[#allocation17_spill]] %s9316_s1 }
   0x3   :  { %9351 = sst [smem:[#allocation18_spill]] %s9317_s2 }
   0x4   :  { %9352 = sst [smem:[#allocation19_spill]] %s9318_s3 }
   0x5   :  { %9353 = sst [smem:[#allocation20_spill]] %s9319_s4 }
   0x6   :  { %9354 = sst [smem:[#allocation21_spill]] %s9324_s9 }
   0x7   :  { %9355 = sst [smem:[#allocation22_spill]] %s9333_s18 }
   0x8   :  { %9356 = sst [smem:[#allocation23_spill]] %s9334_s19 }
   0x9   :  { %9357 = sst [smem:[#allocation24_spill]] %s9335_s20 }
   0xa   :  { %26 = vsyncpa [#allocation4], 0 }
   0xb   :  { %27 = vsyncpa [#allocation5], 0 }
   0xc   :  { %29 = vsyncpa [#allocation5 + $0x1], 0  ;;  %s7833_s1 = smov 0   ;;  %s7835_s22 = smov 0  }
   0xd   :  { %s7837_s23 = smov 0   ;;  %s7839_s24 = smov 0  }
   0xe   :  { %s7841_s2 = smov 0   ;;  %s7843_s25 = smov 0  }
   0xf LB: > { %9358 = sst [smem:[#allocation9_spill]] %s7697_s1  ;;  %s6158_s3 = sadd.s32 4294967295, %s7717_s25   ;;  %s7717_s25 = sphi %s7843_s25, %s35_s25   ;;  %s7713_s2 = sphi %s7841_s2, %s9389_s2   ;;  %s7709_s24 = sphi %s7839_s24, %s9388_s24   ;;  %s7705_s23 = sphi %s7837_s23, %s9387_s23   ;;  %s7701_s22 = sphi %s7835_s22, %s9391_s22   ;;  %s7697_s1 = sphi %s7833_s1, %s9390_s1  }
  0x10   : > { %9359 = sst [smem:[#allocation10_spill]] %s7705_s23  ;;  %s6159_s26 = sadd.s32 4294967294, %s7717_s25  }
  0x11   : > { %9360 = sst [smem:[#allocation11_spill]] %s7713_s2  ;;  %s47_s27 = sadd.s32 1, %s7713_s2 }
  0x12   : > { %9361 = sst [smem:[#allocation12_spill]] %s7717_s25  ;;  %s465_s28 = sadd.s32 1, %s7705_s23 }
  0x13   : > { %p49_p0 = scmp.ge.s32.totalorder %s47_s27, 2  ;;  %p475_p1 = scmp.ne.s32.totalorder %s7705_s23, %s7701_s22 }
  0x14   : > { %p476_p2 = scmp.eq.s32.totalorder %s6158_s3, 1  ;;  %p481_p3 = scmp.ne.s32.totalorder %s7701_s22, %s7697_s1 }
  0x15   : > { %s9393_s27 = smov (%p49_p0, %s47_s27), 0  ;;  %p482_p5 = scmp.eq.s32.totalorder %s6159_s26, 1 }
  0x16   : > { %9362 = sst [smem:[#allocation13_spill]] %s9393_s27  ;;  %p7873_p4 = por %p476_p2, %p475_p1 }
  0x17   : > { %s462_s29 = ssub.s32 %s7713_s2, %s9393_s27  ;;  %p6160_p6 = scmp.ge.s32.totalorder %s7717_s25, 1 }
  0x18   : > { %s9363_s4 = scalar_select %p7873_p4, 1, 0 }
  0x19   : > { %p463_p7 = scmp.eq.s32.totalorder %s462_s29, 0  ;;  %p7880_p8 = por %p482_p5, %p481_p3 }
  0x1a   : > { %p515_p9 = scmp.lt.s32.totalorder %s7717_s25, 3  ;;  %p7892_p11 = scmp.eq.s32.totalorder %s6158_s3, 0 }
  0x1b   : > { %s9364_s30 = scalar_select %p7880_p8, 1, 0 }
  0x1c   : > { %s7886_s0 = scalar_select %p463_p7, %s7705_s23, %s465_s28  }
  0x1d   : > { %9365 = sst [smem:[#allocation14_spill]] %s9364_s30  ;;  %p7888_p10 = pnand %p6160_p6, %p515_p9 }
  0x1e   : > { %9366 = sst [smem:[#allocation15_spill]] %s7886_s0  ;;  %s7719_s26 = smov [#allocation3]  }
  0x1f   : > { %s9367_s21 = scalar_select %p7888_p10, 1, 0 }
  0x20   : > { %s9368_s1 = scalar_select %p7892_p11, 1, 0 }
  0x21   : > { %p6988_p12 = pneg %p7888_p10  ;;  %s548_s29 = sshll.u32 %s7719_s26, 4  ;;  %s549_s29 = int_to_ptr.vmem [resolvable:$true] %s548_s29 }
  0x22   : > { %s9370_s9 = sld [smem:[#allocation21_spill]] }
  0x23   : > { %p7900_p13 = pnand %p7892_p11, %p6988_p12 }
  0x25   : > { %p7609_p1 = pneg %p7900_p13 }
  0x28   : > { %s7607_s0 = scalar_lea.hbm %s9370_s9, 32768 }
  0x29   : > { %p7608_p0 = scmp.ne.s32.totalorder %s9370_s9, %s7607_s0  ;;  %p7614_p5 = scmp.lt.u32.totalorder %s7607_s0, %s9370_s9 }
  0x2b   : > { %p7610_p2 = pnand %p7609_p1, %p7608_p0 }
  0x2d   : > { %p7611_p3 = pneg %p7610_p2 }
  0x2f   : > { %p7616_p6 = pnand %p7614_p5, %p7611_p3 }
  0x31   : > { %7619 = shalt.err (!%p7616_p6)
}
  0x32   : > { %s7620_s25 = scalar_lea.vmem %s549_s29, 32768  ;;  %p7628_p8 = scmp.lt.s32.totalorder %s549_s29, %s549_s29 }
  0x33   : > { %p7621_p7 = scmp.ne.s32.totalorder %s549_s29, %s7620_s25  ;;  %p7629_p4 = scmp.lt.s32.totalorder %s7620_s25, %s7620_s25 }
  0x35   : > { %p7623_p9 = pnand %p7621_p7, %p7609_p1  ;;  %p7630_p11 = por %p7629_p4, %p7628_p8 }
  0x37   : > { %p7624_p12 = pneg %p7623_p9 }
  0x39   : > { %p7631_p10 = pnand %p7630_p11, %p7624_p12 }
  0x3b   : > { %7634 = shalt.err (!%p7631_p10)
}
  0x3c   : > { %s7720_s23 = smov 256   ;;  %s7721_s2 = smov 16  }
  0x3d   : > { %6991 = dma.hbm_to_vmem [thread:$0]  (!%p7900_p13), %s9370_s9, 32768, %s549_s29, [#allocation4], %s7720_s23, %s7720_s23, %s7721_s2  }
  0x3e   : > { %p9371_p0 = scmp.ne.s32.totalorder %s9367_s21, 0 }
  0x3f   : > { %p9372_p2 = scmp.ne.s32.totalorder (!%p9371_p0), %s9368_s1, 0 }
  0x40   : > { %610 = sbr.rel (%p9371_p0) target bundleno = 2280 (0x8e8), region = 96 }
  0x47   : > { %7688 = dma.done.wait (%p9372_p2), [#allocation4], 32768  }
  0x48   : > { %7690 = vsyncadd (%p9372_p2), [#allocation4], 4294934528  ;;  %v7722_v0 = vmov 0   ;;  %p678_p4 = scmp.lt.s32.totalorder %s7709_s24, 1  ;;  %s9373_s30 = sld [smem:[#allocation19_spill]]  ;;  %vm863_vm0 = vcmask 1040384  }
  0x49   : > { %905 = vmatprep.mubr.bf16.mxu1 %v7722_v0  ;;  %832 = vmatprep.mubr.bf16.mxu0 %v7722_v0  ;;  %vm864_vm1 = vcmask 1041408   ;;  %v7723_v6 = vmov 65535   ;;  %s9374_s2 = sld [smem:[#allocation16_spill]]  ;;  %s9375_s20 = sld [smem:[#allocation18_spill]]  ;;  %v7081_v19 = vld [vmem:[%s9320_s5 + $0x4] ss:$16 sps:$4 sm:$0xff]  }
  0x4a   : > { %s7934_s21 = scalar_select %p678_p4, %s7709_s24, 1  ;;  %v865_v7 = vsel %vm863_vm0, 4294967295, %v7723_v6  ;;  %vm859_vm2 = vcmask 23552   ;;  %v7079_v23 = vld [vmem:[%s9320_s5] ss:$16 sps:$4 sm:$0xff]   ;;  %vm7726_vm3 = vmmov 0  }
  0x4b   : > { %v866_v10 = vsel %vm864_vm1, %v865_v7, 0  ;;  %v7087_v24 = vld [vmem:[%s9320_s5 + $0x24] ss:$16 sps:$4 sm:$0xff]   ;;  %v7085_v27 = vld [vmem:[%s9320_s5 + $0x20] ss:$16 sps:$4 sm:$0xff]   ;;  %s9377_s9 = sld [smem:[#allocation20_spill]] }
  0x4c   : > { %s6814_s25 = sshll.u32 %s7934_s21, 4  ;;  %v7093_v28 = vld [vmem:[%s9320_s5 + $0x44] ss:$16 sps:$4 sm:$0xff]   ;;  %v7091_v31 = vld [vmem:[%s9320_s5 + $0x40] ss:$16 sps:$4 sm:$0xff]   ;;  %s670_s27 = sand.u32 1, %s7701_s22  }
  0x4d   : > { %v7099_v32 = vld [vmem:[%s9320_s5 + $0x64] ss:$16 sps:$4 sm:$0xff]   ;;  %v7084_v35 = vld [vmem:[%s9320_s5 + $0xc] ss:$16 sps:$4 sm:$0xff]   ;;  %v7097_v36 = vld [vmem:[%s9320_s5 + $0x60] ss:$16 sps:$4 sm:$0xff]  }
  0x4e   : > { %v7055_v1 = vld [vmem:[%s9373_s30 + $0x4] ss:$8 sps:$4 sm:$0xff]   ;;  %v7057_v2 = vld [vmem:[%s9373_s30] ss:$8 sps:$4 sm:$0xff]   ;;  %v7058_v3 = vld [vmem:[%s9373_s30 + $0x14] ss:$8 sps:$4 sm:$0xff]  }
  0x4f   : > { %800 = vmatprep.subr.bf16.mxu0 %v7055_v1  ;;  %v7060_v4 = vld [vmem:[%s9373_s30 + $0x10] ss:$8 sps:$4 sm:$0xff]   ;;  %v7061_v5 = vld [vmem:[%s9373_s30 + $0x24] ss:$8 sps:$4 sm:$0xff]   ;;  %v7063_v8 = vld [vmem:[%s9373_s30 + $0x20] ss:$8 sps:$4 sm:$0xff]   ;;  %s685_s28 = scalar_lea.vmem %s9374_s2, %s6814_s25 }
  0x50   : > { %801 = vmatpush1.bf16.msra.mxu0 %v7057_v2  ;;  %v7064_v9 = vld [vmem:[%s9373_s30 + $0x34] ss:$8 sps:$4 sm:$0xff]   ;;  %v6183_v11 = vld.sshfl [vmem:[%s9375_s20] sm:$0x33 pattern:$0x76325410] }
  0x51   : > { %802 = vmatprep.subr.bf16.mxu0 %v7058_v3  ;;  %v858_v12 = vcombine.high %v6183_v11, %v6183_v11  ;;  %v7066_v13 = vld [vmem:[%s9373_s30 + $0x30] ss:$8 sps:$4 sm:$0xff]   ;;  %v868_v14 = vand.u32 %v6183_v11, %v866_v10  ;;  %v699_v15 = vld [vmem:[%s685_s28] sm:$0xff]  ;;  %v700_v16 = vld [vmem:[%s685_s28 + $0x8] sm:$0xff]  ;;  %s9376_s28 = sld [smem:[#allocation17_spill]]  ;;  %vm5907_vm4 = vcmask 523264  }
  0x52   : > { %v7067_v17 = vld [vmem:[%s9373_s30 + $0x44] ss:$8 sps:$4 sm:$0xff]   ;;  %v7069_v20 = vld [vmem:[%s9373_s30 + $0x40] ss:$8 sps:$4 sm:$0xff]   ;;  %v7070_v21 = vld [vmem:[%s9373_s30 + $0x54] ss:$8 sps:$4 sm:$0xff]   ;;  %v701_v22 = vpack.c.bf16 %v700_v16, %v699_v15 }
  0x53   : > { %v871_v18 = vand.u32 %v866_v10, %v858_v12  ;;  %v7072_v25 = vld [vmem:[%s9373_s30 + $0x50] ss:$8 sps:$4 sm:$0xff]   ;;  %v7073_v26 = vld [vmem:[%s9373_s30 + $0x64] ss:$8 sps:$4 sm:$0xff]   ;;  %v7075_v29 = vld [vmem:[%s9373_s30 + $0x60] ss:$8 sps:$4 sm:$0xff]  }
  0x54   : > { %803 = vmatpush1.bf16.msra.mxu0 %v7060_v4  ;;  %v7076_v30 = vld [vmem:[%s9373_s30 + $0x74] ss:$8 sps:$4 sm:$0xff]   ;;  %v7078_v33 = vld [vmem:[%s9373_s30 + $0x70] ss:$8 sps:$4 sm:$0xff]   ;;  %s6811_s20 = sshll.u32 %s7709_s24, 4  ;;  %s9378_s19 = sld [smem:[#allocation23_spill]] }
  0x55   : > { %804 = vmatprep.subr.bf16.mxu0 %v7061_v5  ;;  %873 = vmatprep.subr.bf16.mxu1 %v871_v18  ;;  %v7105_v37 = vld [vmem:[%s9320_s5 + $0x84] ss:$16 sps:$4 sm:$0xff]   ;;  %v7082_v39 = vld [vmem:[%s9320_s5 + $0x8] ss:$16 sps:$4 sm:$0xff]   ;;  %v7090_v40 = vld [vmem:[%s9320_s5 + $0x2c] ss:$16 sps:$4 sm:$0xff]  }
  0x56   : > { %874 = vmatpush1.bf16.msra.mxu1 %v868_v14  ;;  %v7103_v41 = vld [vmem:[%s9320_s5 + $0x80] ss:$16 sps:$4 sm:$0xff]   ;;  %v7111_v42 = vld [vmem:[%s9320_s5 + $0xa4] ss:$16 sps:$4 sm:$0xff]   ;;  %v7088_v43 = vld [vmem:[%s9320_s5 + $0x28] ss:$16 sps:$4 sm:$0xff]  }
  0x57   : > { %1344 = vmatprep.subr.bf16.mxu1 %v7081_v19  ;;  %s689_s3 = scalar_lea.vmem %s9376_s28, %s7934_s21  ;;  %v7096_v44 = vld [vmem:[%s9320_s5 + $0x4c] ss:$16 sps:$4 sm:$0xff]   ;;  %v7109_v45 = vld [vmem:[%s9320_s5 + $0xa0] ss:$16 sps:$4 sm:$0xff]   ;;  %v7117_v46 = vld [vmem:[%s9320_s5 + $0xc4] ss:$16 sps:$4 sm:$0xff]  }
  0x58   : > { %805 = vmatpush1.bf16.msra.mxu0 %v7063_v8  ;;  %v702_v34 = vld [vmem:[%s689_s3] sm:$0x1]  ;;  %v7094_v47 = vld [vmem:[%s9320_s5 + $0x48] ss:$16 sps:$4 sm:$0xff]   ;;  %v7102_v48 = vld [vmem:[%s9320_s5 + $0x6c] ss:$16 sps:$4 sm:$0xff]  }
  0x59   : > { %806 = vmatprep.subr.bf16.mxu0 %v7064_v9  ;;  %6184 = vmatmul.mubr.msk.bf16.vlgmr.msra.gmra.mrb[0].mxu1 %vm859_vm2, %v701_v22  ;;  %v703_v38 = vpack.c.bf16 %v702_v34, %v702_v34  ;;  %v7115_v49 = vld [vmem:[%s9320_s5 + $0xc0] ss:$16 sps:$4 sm:$0xff]   ;;  %v7123_v50 = vld [vmem:[%s9320_s5 + $0xe4] ss:$16 sps:$4 sm:$0xff]   ;;  %v7100_v51 = vld [vmem:[%s9320_s5 + $0x68] ss:$16 sps:$4 sm:$0xff]  }
  0x5a   : > { %1345 = vmatpush1.bf16.msra.mxu1 %v7079_v23  ;;  %v7108_v52 = vld [vmem:[%s9320_s5 + $0x8c] ss:$16 sps:$4 sm:$0xff]   ;;  %v7121_v53 = vld [vmem:[%s9320_s5 + $0xe0] ss:$16 sps:$4 sm:$0xff]   ;;  %v7129_v54 = vld [vmem:[%s9320_s5 + $0x104] ss:$16 sps:$4 sm:$0xff]   ;;  %s9264_s26 = scalar_lea.hbm %s9378_s19, %s6811_s20 }
  0x5b   : > { %1346 = vmatprep.subr.bf16.mxu1 %v7087_v24  ;;  %v7106_v55 = vld [vmem:[%s9320_s5 + $0x88] ss:$16 sps:$4 sm:$0xff]   ;;  %v7127_v56 = vld [vmem:[%s9320_s5 + $0x100] ss:$16 sps:$4 sm:$0xff]   ;;  %v7114_v57 = vld [vmem:[%s9320_s5 + $0xac] ss:$16 sps:$4 sm:$0xff]  }
  0x5c   : > { %807 = vmatpush1.bf16.msra.mxu0 %v7066_v13  ;;  %v7135_v58 = vld [vmem:[%s9320_s5 + $0x124] ss:$16 sps:$4 sm:$0xff]   ;;  %v7112_v59 = vld [vmem:[%s9320_s5 + $0xa8] ss:$16 sps:$4 sm:$0xff]   ;;  %v7133_v60 = vld [vmem:[%s9320_s5 + $0x120] ss:$16 sps:$4 sm:$0xff]  }
  0x5d   : > { %808 = vmatprep.subr.bf16.mxu0 %v7067_v17  ;;  %v7120_v61 = vld [vmem:[%s9320_s5 + $0xcc] ss:$16 sps:$4 sm:$0xff]   ;;  %v7141_v62 = vld [vmem:[%s9320_s5 + $0x144] ss:$16 sps:$4 sm:$0xff]   ;;  %v7118_v63 = vld [vmem:[%s9320_s5 + $0xc8] ss:$16 sps:$4 sm:$0xff]  }
  0x5e   : > { %1347 = vmatpush1.bf16.msra.mxu1 %v7085_v27  ;;  %v7139_v0 = vld [vmem:[%s9320_s5 + $0x140] ss:$16 sps:$4 sm:$0xff]   ;;  %v7126_v1 = vld [vmem:[%s9320_s5 + $0xec] ss:$16 sps:$4 sm:$0xff]   ;;  %v7147_v2 = vld [vmem:[%s9320_s5 + $0x164] ss:$16 sps:$4 sm:$0xff]  }
  0x5f   : > { %1348 = vmatprep.subr.bf16.mxu1 %v7093_v28  ;;  %v7124_v3 = vld [vmem:[%s9320_s5 + $0xe8] ss:$16 sps:$4 sm:$0xff]   ;;  %v7145_v4 = vld [vmem:[%s9320_s5 + $0x160] ss:$16 sps:$4 sm:$0xff]   ;;  %v7132_v5 = vld [vmem:[%s9320_s5 + $0x10c] ss:$16 sps:$4 sm:$0xff]  }
  0x60   : > { %809 = vmatpush1.bf16.msra.mxu0 %v7069_v20  ;;  %v7130_v6 = vld [vmem:[%s9320_s5 + $0x108] ss:$16 sps:$4 sm:$0xff]   ;;  %v7138_v7 = vld [vmem:[%s9320_s5 + $0x12c] ss:$16 sps:$4 sm:$0xff]   ;;  %v7151_v13 = vld [vmem:[%s9320_s5 + $0x180] ss:$16 sps:$4 sm:$0xff]  }
  0x61   : > { %810 = vmatprep.subr.bf16.mxu0 %v7070_v21  ;;  %v7136_v8 = vld [vmem:[%s9320_s5 + $0x128] ss:$16 sps:$4 sm:$0xff]   ;;  %v7144_v9 = vld [vmem:[%s9320_s5 + $0x14c] ss:$16 sps:$4 sm:$0xff]   ;;  %v7153_v14 = vld [vmem:[%s9320_s5 + $0x184] ss:$16 sps:$4 sm:$0xff]  }
  0x62   : > { %1349 = vmatpush1.bf16.msra.mxu1 %v7091_v31  ;;  %v7142_v10 = vld [vmem:[%s9320_s5 + $0x148] ss:$16 sps:$4 sm:$0xff]   ;;  %v7150_v11 = vld [vmem:[%s9320_s5 + $0x16c] ss:$16 sps:$4 sm:$0xff]   ;;  %v7159_v17 = vld [vmem:[%s9320_s5 + $0x1a4] ss:$16 sps:$4 sm:$0xff]  }
  0x63   : > { %1350 = vmatprep.subr.bf16.mxu1 %v7099_v32  ;;  %v7148_v12 = vld [vmem:[%s9320_s5 + $0x168] ss:$16 sps:$4 sm:$0xff]   ;;  %v7156_v16 = vld [vmem:[%s9320_s5 + $0x18c] ss:$16 sps:$4 sm:$0xff]   ;;  %v7157_v19 = vld [vmem:[%s9320_s5 + $0x1a0] ss:$16 sps:$4 sm:$0xff]  }
  0x64   : > { %811 = vmatpush1.bf16.msra.mxu0 %v7072_v25  ;;  %v7154_v15 = vld [vmem:[%s9320_s5 + $0x188] ss:$16 sps:$4 sm:$0xff]   ;;  %v7162_v18 = vld [vmem:[%s9320_s5 + $0x1ac] ss:$16 sps:$4 sm:$0xff]   ;;  %v7165_v21 = vld [vmem:[%s9320_s5 + $0x1c4] ss:$16 sps:$4 sm:$0xff]  }
  0x65   : > { %812 = vmatprep.subr.bf16.mxu0 %v7073_v26  ;;  %v7160_v20 = vld [vmem:[%s9320_s5 + $0x1a8] ss:$16 sps:$4 sm:$0xff]   ;;  %v7168_v22 = vld [vmem:[%s9320_s5 + $0x1cc] ss:$16 sps:$4 sm:$0xff]   ;;  %v7163_v23 = vld [vmem:[%s9320_s5 + $0x1c0] ss:$16 sps:$4 sm:$0xff]  }
  0x66   : > { %1351 = vmatpush1.bf16.msra.mxu1 %v7097_v36  ;;  %v7166_v24 = vld [vmem:[%s9320_s5 + $0x1c8] ss:$16 sps:$4 sm:$0xff]   ;;  %v7171_v25 = vld [vmem:[%s9320_s5 + $0x1e4] ss:$16 sps:$4 sm:$0xff]   ;;  %v7174_v26 = vld [vmem:[%s9320_s5 + $0x1ec] ss:$16 sps:$4 sm:$0xff]  }
  0x67   : > { %1352 = vmatprep.subr.bf16.mxu1 %v7105_v37  ;;  %v7169_v27 = vld [vmem:[%s9320_s5 + $0x1e0] ss:$16 sps:$4 sm:$0xff]   ;;  %v7172_v28 = vld [vmem:[%s9320_s5 + $0x1e8] ss:$16 sps:$4 sm:$0xff]   ;;  %s9225_s3 = scalar_lea.vmem [#allocation6], %s670_s27  ;;  %s6031_s2 = scalar_lea.sflag [#allocation5], %s670_s27 }
  0x68   : > { %813 = vmatpush1.bf16.msra.mxu0 %v7075_v29  ;;  %v1442_v29 = vld [vmem:[%s9322_s7] sm:$0xff]  ;;  %v1443_v31 = vld [vmem:[%s9322_s7 + $0x8] sm:$0xff]  ;;  %s6046_s23 = sshll.u32 %s9225_s3, 4  ;;  %p9379_p10 = scmp.ne.s32.totalorder %s9363_s4, 0  ;;  %s6047_s23 = int_to_ptr.vmem [resolvable:$true] %s6046_s23 }
  0x69   : > { %814 = vmatprep.subr.bf16.mxu0 %v7076_v30  ;;  %v1446_v30 = vld [vmem:[%s9322_s7 + $0x20] sm:$0xff]  ;;  %v1447_v34 = vld [vmem:[%s9322_s7 + $0x28] sm:$0xff]  ;;  %s7635_s28 = scalar_lea.vmem %s6047_s23, 16  ;;  %s7727_s0 = smov [#allocation6]  }
  0x6a   : > { %1353 = vmatpush1.bf16.msra.mxu1 %v7103_v41  ;;  %v6249_v32 = vcombine.low %v1442_v29, %v1446_v30  ;;  %v6252_v36 = vcombine.high %v1443_v31, %v1447_v34  ;;  %v842_v41 = vlaneseq  ;;  %p7636_p8 = scmp.ne.s32.totalorder %s6047_s23, %s7635_s28  ;;  %s7639_s25 = sshll.u32 %s7727_s0, 4  ;;  %s7640_s25 = int_to_ptr.vmem [resolvable:$false] %s7639_s25 }
  0x6b   : > { %1354 = vmatprep.subr.bf16.mxu1 %v7111_v42  ;;  %s7641_s29 = scalar_lea.vmem %s7640_s25, 32  ;;  %p7642_p1 = scmp.lt.s32.totalorder %s6047_s23, %s7640_s25 }
  0x6c   : > { %815 = vmatpush1.bf16.msra.mxu0 %v7078_v33  ;;  %v6250_v33 = vcombine.high %v1442_v29, %v1446_v30  ;;  %v8193_v42 = vshrl.u32 %v842_v41, 7  ;;  %v1479_v29 = vld [vmem:[%s9322_s7 + $0x128] sm:$0xff]  ;;  %p7637_p11 = pnand %p7636_p8, %p9379_p10  ;;  %p7643_p3 = scmp.lt.s32.totalorder %s7641_s29, %s7635_s28 }
  0x6d   : > { %1387 = vmatprep.subr.bf16.mxu0 %v7084_v35  ;;  %v6251_v35 = vcombine.low %v1443_v31, %v1447_v34  ;;  %v1482_v34 = vld [vmem:[%s9322_s7 + $0x140] sm:$0xff] }
  0x6e   : > { %1355 = vmatpush1.bf16.msra.mxu1 %v7109_v45  ;;  %v8202_v45 = vsub.s32 1, %v8193_v42  ;;  %p7638_p13 = pneg %p7637_p11  ;;  %p7644_p5 = por %p7643_p3, %p7642_p1 }
  0x6f   : > { %833 = vmatmul.mubr.bf16.vlgmr.msra.gmra.mrb[0].mxu0 %v703_v38  ;;  %1356 = vmatprep.subr.bf16.mxu1 %v7117_v46 }
  0x70   : > { %1388 = vmatpush1.bf16.msra.mxu0 %v7082_v39  ;;  %p7645_p6 = pnand %p7644_p5, %p7638_p13 }
  0x71   : > { %1389 = vmatprep.subr.bf16.mxu0 %v7090_v40 }
  0x72   : > { %1357 = vmatpush1.bf16.msra.mxu1 %v7115_v49 }
  0x73   : > { %1358 = vmatprep.subr.bf16.mxu1 %v7123_v50 }
  0x74   : > { %1390 = vmatpush1.bf16.msra.mxu0 %v7088_v43  ;;  %v8196_v43 = vsub.s32 0, %v8193_v42 }
  0x75   : > { %1391 = vmatprep.subr.bf16.mxu0 %v7096_v44  ;;  %v916_v44 = vld [vmem:[%s9377_s9] sm:$0x3] }
  0x76   : > { %1359 = vmatpush1.bf16.msra.mxu1 %v7121_v53 }
  0x77   : > { %1360 = vmatprep.subr.bf16.mxu1 %v7129_v54 }
  0x78   : > { %1392 = vmatpush1.bf16.msra.mxu0 %v7094_v47 }
  0x79   : > { %1393 = vmatprep.subr.bf16.mxu0 %v7102_v48  ;;  %v921_v48 = vrot.slane %v916_v44, %v8196_v43 }
  0x7a   : > { %1361 = vmatpush1.bf16.msra.mxu1 %v7127_v56 }
  0x7b   : > { %1362 = vmatprep.subr.bf16.mxu1 %v7135_v58 }
  0x7c   : > { %1394 = vmatpush1.bf16.msra.mxu0 %v7100_v51  ;;  %v925_v51 = vrot.slane %v916_v44, %v8202_v45  ;;  %v1490_v44 = vld [vmem:[%s9322_s7 + $0x180] sm:$0xff] }
  0x7d   : > { %1395 = vmatprep.subr.bf16.mxu0 %v7108_v52 }
  0x7e   : > { %1363 = vmatpush1.bf16.msra.mxu1 %v7133_v60 }
  0x7f   : > { %1364 = vmatprep.subr.bf16.mxu1 %v7141_v62 }
  0x80   : > { %1396 = vmatpush1.bf16.msra.mxu0 %v7106_v55 }
  0x81   : > { %1397 = vmatprep.subr.bf16.mxu0 %v7114_v57 }
  0x82   : > { %1365 = vmatpush1.bf16.msra.mxu1 %v7139_v0  ;;  %v1450_v0 = vld [vmem:[%s9322_s7 + $0x40] sm:$0xff] }
  0x83   : > { %1366 = vmatprep.subr.bf16.mxu1 %v7147_v2 }
  0x84   : > { %1398 = vmatpush1.bf16.msra.mxu0 %v7112_v59 }
  0x85   : > { %1399 = vmatprep.subr.bf16.mxu0 %v7120_v61 }
  0x86   : > { %1367 = vmatpush1.bf16.msra.mxu1 %v7145_v4  ;;  %v1451_v4 = vld [vmem:[%s9322_s7 + $0x48] sm:$0xff] }
  0x87   : > { %1368 = vmatprep.subr.bf16.mxu1 %v7153_v14 }
  0x88   : > { %1400 = vmatpush1.bf16.msra.mxu0 %v7118_v63 }
  0x89   : > { %1401 = vmatprep.subr.bf16.mxu0 %v7126_v1 }
  0x8a   : > { %1369 = vmatpush1.bf16.msra.mxu1 %v7151_v13  ;;  %v1463_v13 = vld [vmem:[%s9322_s7 + $0xa8] sm:$0xff] }
  0x8b   : > { %1370 = vmatprep.subr.bf16.mxu1 %v7159_v17 }
  0x8c   : > { %1402 = vmatpush1.bf16.msra.mxu0 %v7124_v3  ;;  %v1454_v3 = vld [vmem:[%s9322_s7 + $0x60] sm:$0xff] }
  0x8d   : > { %1403 = vmatprep.subr.bf16.mxu0 %v7132_v5  ;;  %v1455_v5 = vld [vmem:[%s9322_s7 + $0x68] sm:$0xff]  ;;  %v6257_v14 = vcombine.low %v1450_v0, %v1454_v3 }
  0x8e   : > { %1371 = vmatpush1.bf16.msra.mxu1 %v7157_v19  ;;  %v1470_v19 = vld [vmem:[%s9322_s7 + $0xe0] sm:$0xff] }
  0x8f   : > { %1372 = vmatprep.subr.bf16.mxu1 %v7165_v21  ;;  %v1471_v21 = vld [vmem:[%s9322_s7 + $0xe8] sm:$0xff] }
  0x90   : > { %1404 = vmatpush1.bf16.msra.mxu0 %v7130_v6 }
  0x91   : > { %1405 = vmatprep.subr.bf16.mxu0 %v7138_v7 }
  0x92   : > { %1373 = vmatpush1.bf16.msra.mxu1 %v7163_v23 }
  0x93   : > { %1374 = vmatprep.subr.bf16.mxu1 %v7171_v25 }
  0x94   : > { %1406 = vmatpush1.bf16.msra.mxu0 %v7136_v8  ;;  %v6258_v8 = vcombine.high %v1450_v0, %v1454_v3  ;;  %v1511_v0 = vld [vmem:[%s9322_s7 + $0x228] sm:$0xff] }
  0x95   : > { %1407 = vmatprep.subr.bf16.mxu0 %v7144_v9  ;;  %v6260_v9 = vcombine.high %v1451_v4, %v1455_v5 }
  0x96   : > { %1375 = vmatpush1.bf16.msra.mxu1 %v7169_v27  ;;  %v1478_v27 = vld [vmem:[%s9322_s7 + $0x120] sm:$0xff] }
  0x97   : > { %3020 = vmatprep.subr.bf16.mxu1 %v6250_v33 }
  0x98   : > { %1408 = vmatpush1.bf16.msra.mxu0 %v7142_v10  ;;  %v1458_v10 = vld [vmem:[%s9322_s7 + $0x80] sm:$0xff] }
  0x99   : > { %1409 = vmatprep.subr.bf16.mxu0 %v7150_v11  ;;  %v1462_v11 = vld [vmem:[%s9322_s7 + $0xa0] sm:$0xff] }
  0x9c   : > { %1410 = vmatpush1.bf16.msra.mxu0 %v7148_v12  ;;  %v1459_v12 = vld [vmem:[%s9322_s7 + $0x88] sm:$0xff] }
  0x9d   : > { %1411 = vmatprep.subr.bf16.mxu0 %v7156_v16  ;;  %v6266_v16 = vcombine.high %v1458_v10, %v1462_v11  ;;  %v6268_v17 = vcombine.high %v1459_v12, %v1463_v13  ;;  %v6267_v23 = vcombine.low %v1459_v12, %v1463_v13  ;;  %v1522_v13 = vld [vmem:[%s9322_s7 + $0x280] sm:$0xff] }
  0xa0   : > { %1412 = vmatpush1.bf16.msra.mxu0 %v7154_v15  ;;  %v6259_v15 = vcombine.low %v1451_v4, %v1455_v5  ;;  %v1514_v5 = vld [vmem:[%s9322_s7 + $0x240] sm:$0xff] }
  0xa1   : > { %1413 = vmatprep.subr.bf16.mxu0 %v7162_v18  ;;  %v1466_v18 = vld [vmem:[%s9322_s7 + $0xc0] sm:$0xff] }
  0xa2   : > { %v6273_v30 = vcombine.low %v1466_v18, %v1470_v19 }
  0xa4   : > { %1414 = vmatpush1.bf16.msra.mxu0 %v7160_v20  ;;  %v1467_v20 = vld [vmem:[%s9322_s7 + $0xc8] sm:$0xff] }
  0xa5   : > { %1415 = vmatprep.subr.bf16.mxu0 %v7168_v22  ;;  %v6265_v22 = vcombine.low %v1458_v10, %v1462_v11  ;;  %v6276_v25 = vcombine.high %v1467_v20, %v1471_v21  ;;  %v6275_v31 = vcombine.low %v1467_v20, %v1471_v21  ;;  %v1530_v21 = vld [vmem:[%s9322_s7 + $0x2c0] sm:$0xff] }
  0xa8   : > { %1416 = vmatpush1.bf16.msra.mxu0 %v7166_v24  ;;  %v6274_v24 = vcombine.high %v1466_v18, %v1470_v19 }
  0xa9   : > { %1417 = vmatprep.subr.bf16.mxu0 %v7174_v26  ;;  %v1474_v26 = vld [vmem:[%s9322_s7 + $0x100] sm:$0xff] }
  0xac   : > { %1418 = vmatpush1.bf16.msra.mxu0 %v7172_v28  ;;  %v1475_v28 = vld [vmem:[%s9322_s7 + $0x108] sm:$0xff] }
  0xad   : > { %3106 = vmatprep.subr.bf16.mxu0 %v6252_v36  ;;  %v6284_v33 = vcombine.high %v1475_v28, %v1479_v29  ;;  %v1483_v36 = vld [vmem:[%s9322_s7 + $0x148] sm:$0xff] }
 0x12c   : > { %v907_v37 = vpop.f32.mrb[0].mxu1 }
 0x12d   : > { %v909_v38 = vpop.f32.mrb[1].mxu1 }
 0x12e   : > { %v911_v39 = vpop.f32.mrb[2].mxu1 }
 0x12f   : > { %v913_v40 = vpop.f32.mrb[3].mxu1 }
 0x142   : > { %v834_v46 = vpop.f32.mrb[0].mxu0 }
 0x143   : > { %v845_v47 = vrot.slane %v834_v46, %v8196_v43  ;;  %v836_v49 = vpop.f32.mrb[1].mxu0  ;;  %v1494_v46 = vld [vmem:[%s9322_s7 + $0x1a0] sm:$0xff] }
 0x144   : > { %v849_v50 = vrot.slane %v836_v49, %v8196_v43  ;;  %v838_v52 = vpop.f32.mrb[2].mxu0 }
 0x145   : > { %v908_v53 = vadd.f32 %v907_v37, %v845_v47  ;;  %v912_v54 = vadd.f32 %v911_v39, %v845_v47  ;;  %v839_v55 = vpop.f32.mrb[3].mxu0  ;;  %v1487_v37 = vld [vmem:[%s9322_s7 + $0x168] sm:$0xff]  ;;  %v6283_v39 = vcombine.low %v1475_v28, %v1479_v29  ;;  %v1538_v29 = vld [vmem:[%s9322_s7 + $0x300] sm:$0xff] }
 0x146   : > { %v910_v56 = vadd.f32 %v909_v38, %v849_v50  ;;  %v914_v57 = vadd.f32 %v913_v40, %v849_v50  ;;  %v6281_v38 = vcombine.low %v1474_v26, %v1478_v27  ;;  %v6292_v41 = vcombine.high %v1483_v36, %v1487_v37  ;;  %v1491_v47 = vld [vmem:[%s9322_s7 + $0x188] sm:$0xff] }
 0x147   : > { %v928_v58 = vadd.f32 %v921_v48, %v908_v53  ;;  %v930_v59 = vadd.f32 %v921_v48, %v912_v54  ;;  %v1495_v48 = vld [vmem:[%s9322_s7 + $0x1a8] sm:$0xff]  ;;  %v6291_v50 = vcombine.low %v1483_v36, %v1487_v37  ;;  %v1498_v53 = vld [vmem:[%s9322_s7 + $0x1c0] sm:$0xff] }
 0x148   : > { %v929_v60 = vadd.f32 %v925_v51, %v910_v56  ;;  %v931_v61 = vadd.f32 %v925_v51, %v914_v57  ;;  %v6298_v51 = vcombine.high %v1490_v44, %v1494_v46  ;;  %v6300_v52 = vcombine.high %v1491_v47, %v1495_v48  ;;  %v1502_v54 = vld [vmem:[%s9322_s7 + $0x1e0] sm:$0xff]  ;;  %v1499_v55 = vld [vmem:[%s9322_s7 + $0x1c8] sm:$0xff] }
 0x149   : > { %v932_v62 = vmax.f32 %v928_v58, 0.0  ;;  %v934_v63 = vmax.f32 %v930_v59, 0.0  ;;  %v1503_v56 = vld [vmem:[%s9322_s7 + $0x1e8] sm:$0xff]  ;;  %v6297_v57 = vcombine.low %v1490_v44, %v1494_v46  ;;  %v6299_v58 = vcombine.low %v1491_v47, %v1495_v48  ;;  %v1546_v37 = vld [vmem:[%s9322_s7 + $0x340] sm:$0xff] }
 0x14a   : > { %v933_v1 = vmax.f32 %v929_v60, 0.0  ;;  %v935_v2 = vmax.f32 %v931_v61, 0.0  ;;  %v6306_v59 = vcombine.high %v1498_v53, %v1502_v54  ;;  %v6308_v60 = vcombine.high %v1499_v55, %v1503_v56  ;;  %v1506_v61 = vld [vmem:[%s9322_s7 + $0x200] sm:$0xff] }
 0x14b   : > { %v936_v6 = vpack.c.bf16 %v934_v63, %v932_v62  ;;  %v1510_v62 = vld [vmem:[%s9322_s7 + $0x220] sm:$0xff]  ;;  %v1507_v63 = vld [vmem:[%s9322_s7 + $0x208] sm:$0xff] }
 0x14c   : > { %v937_v7 = vpack.c.bf16 %v935_v2, %v933_v1  ;;  %v6305_v1 = vcombine.low %v1498_v53, %v1502_v54  ;;  %v6307_v2 = vcombine.low %v1499_v55, %v1503_v56  ;;  %v6314_v3 = vcombine.high %v1506_v61, %v1510_v62  ;;  %v1559_v54 = vld [vmem:[%s9322_s7 + $0x3a8] sm:$0xff] }
 0x14d   : > { %v6316_v4 = vcombine.high %v1507_v63, %v1511_v0  ;;  %v6315_v10 = vcombine.low %v1507_v63, %v1511_v0 }
 0x14e   : > { %1376 = vmatprep.mubr.bf16.mxu1 %v937_v7  ;;  %1419 = vmatprep.mubr.bf16.mxu0 %v937_v7  ;;  %v1515_v7 = vld [vmem:[%s9322_s7 + $0x248] sm:$0xff] }
 0x14f   : > { %1377 = vmatmul.mubr.bf16.vlgmr.msra.gmra.mrb[4].mxu1 %v936_v6  ;;  %1420 = vmatmul.mubr.bf16.vlgmr.msra.gmra.mrb[4].mxu0 %v936_v6  ;;  %v1518_v6 = vld [vmem:[%s9322_s7 + $0x260] sm:$0xff] }
 0x150   : > { %3021 = vmatpush1.bf16.msra.mxu1 %v6249_v32  ;;  %3107 = vmatpush1.bf16.msra.mxu0 %v6251_v35  ;;  %v6282_v32 = vcombine.high %v1474_v26, %v1478_v27  ;;  %v1486_v35 = vld [vmem:[%s9322_s7 + $0x160] sm:$0xff]  ;;  %v6322_v11 = vcombine.high %v1514_v5, %v1518_v6 }
 0x151   : > { %3022 = vmatprep.subr.bf16.mxu1 %v6258_v8  ;;  %3108 = vmatprep.subr.bf16.mxu0 %v6260_v9  ;;  %v6290_v40 = vcombine.high %v1482_v34, %v1486_v35  ;;  %v6289_v49 = vcombine.low %v1482_v34, %v1486_v35  ;;  %v1519_v8 = vld [vmem:[%s9322_s7 + $0x268] sm:$0xff]  ;;  %v6313_v9 = vcombine.low %v1506_v61, %v1510_v62 }
 0x152   : > { %v6324_v12 = vcombine.high %v1515_v7, %v1519_v8  ;;  %v6323_v18 = vcombine.low %v1515_v7, %v1519_v8  ;;  %v1567_v62 = vld [vmem:[%s9322_s7 + $0x3e8] sm:$0xff] }
 0x154   : > { %3023 = vmatpush1.bf16.msra.mxu1 %v6257_v14  ;;  %3109 = vmatpush1.bf16.msra.mxu0 %v6259_v15  ;;  %v1526_v14 = vld [vmem:[%s9322_s7 + $0x2a0] sm:$0xff]  ;;  %v1523_v15 = vld [vmem:[%s9322_s7 + $0x288] sm:$0xff] }
 0x155   : > { %3024 = vmatprep.subr.bf16.mxu1 %v6266_v16  ;;  %3110 = vmatprep.subr.bf16.mxu0 %v6268_v17  ;;  %v1527_v16 = vld [vmem:[%s9322_s7 + $0x2a8] sm:$0xff]  ;;  %v6321_v17 = vcombine.low %v1514_v5, %v1518_v6  ;;  %v6330_v19 = vcombine.high %v1522_v13, %v1526_v14 }
 0x156   : > { %v6332_v20 = vcombine.high %v1523_v15, %v1527_v16  ;;  %v6331_v26 = vcombine.low %v1523_v15, %v1527_v16  ;;  %v1575_v6 = vld [vmem:[%s9322_s7 + $0x428] sm:$0xff] }
 0x158   : > { %3025 = vmatpush1.bf16.msra.mxu1 %v6265_v22  ;;  %3111 = vmatpush1.bf16.msra.mxu0 %v6267_v23  ;;  %v1534_v22 = vld [vmem:[%s9322_s7 + $0x2e0] sm:$0xff]  ;;  %v1531_v23 = vld [vmem:[%s9322_s7 + $0x2c8] sm:$0xff] }
 0x159   : > { %3026 = vmatprep.subr.bf16.mxu1 %v6274_v24  ;;  %3112 = vmatprep.subr.bf16.mxu0 %v6276_v25  ;;  %v1535_v24 = vld [vmem:[%s9322_s7 + $0x2e8] sm:$0xff]  ;;  %v6329_v25 = vcombine.low %v1522_v13, %v1526_v14  ;;  %v6338_v27 = vcombine.high %v1530_v21, %v1534_v22 }
 0x15a   : > { %v6340_v28 = vcombine.high %v1531_v23, %v1535_v24  ;;  %v6339_v34 = vcombine.low %v1531_v23, %v1535_v24 }
 0x15c   : > { %3027 = vmatpush1.bf16.msra.mxu1 %v6273_v30  ;;  %3113 = vmatpush1.bf16.msra.mxu0 %v6275_v31  ;;  %v1542_v30 = vld [vmem:[%s9322_s7 + $0x320] sm:$0xff]  ;;  %v1539_v31 = vld [vmem:[%s9322_s7 + $0x308] sm:$0xff] }
 0x15d   : > { %3028 = vmatprep.subr.bf16.mxu1 %v6282_v32  ;;  %3114 = vmatprep.subr.bf16.mxu0 %v6284_v33  ;;  %v1543_v32 = vld [vmem:[%s9322_s7 + $0x328] sm:$0xff]  ;;  %v6337_v33 = vcombine.low %v1530_v21, %v1534_v22  ;;  %v6346_v35 = vcombine.high %v1538_v29, %v1542_v30 }
 0x15e   : > { %v6348_v36 = vcombine.high %v1539_v31, %v1543_v32  ;;  %v6347_v44 = vcombine.low %v1539_v31, %v1543_v32 }
 0x160   : > { %3029 = vmatpush1.bf16.msra.mxu1 %v6281_v38  ;;  %3115 = vmatpush1.bf16.msra.mxu0 %v6283_v39  ;;  %v1550_v38 = vld [vmem:[%s9322_s7 + $0x360] sm:$0xff]  ;;  %v1547_v39 = vld [vmem:[%s9322_s7 + $0x348] sm:$0xff] }
 0x161   : > { %3030 = vmatprep.subr.bf16.mxu1 %v6290_v40  ;;  %3116 = vmatprep.subr.bf16.mxu0 %v6292_v41  ;;  %v1551_v40 = vld [vmem:[%s9322_s7 + $0x368] sm:$0xff]  ;;  %v6345_v41 = vcombine.low %v1538_v29, %v1542_v30  ;;  %v6354_v46 = vcombine.high %v1546_v37, %v1550_v38  ;;  %v6353_v48 = vcombine.low %v1546_v37, %v1550_v38 }
 0x162   : > { %v6356_v47 = vcombine.high %v1547_v39, %v1551_v40 }
 0x164   : > { %3031 = vmatpush1.bf16.msra.mxu1 %v6289_v49  ;;  %3117 = vmatpush1.bf16.msra.mxu0 %v6291_v50  ;;  %v6355_v49 = vcombine.low %v1547_v39, %v1551_v40  ;;  %v1554_v50 = vld [vmem:[%s9322_s7 + $0x380] sm:$0xff] }
 0x165   : > { %3032 = vmatprep.subr.bf16.mxu1 %v6298_v51  ;;  %3118 = vmatprep.subr.bf16.mxu0 %v6300_v52  ;;  %v1558_v51 = vld [vmem:[%s9322_s7 + $0x3a0] sm:$0xff]  ;;  %v1555_v52 = vld [vmem:[%s9322_s7 + $0x388] sm:$0xff] }
 0x166   : > { %v6362_v53 = vcombine.high %v1554_v50, %v1558_v51  ;;  %v6361_v55 = vcombine.low %v1554_v50, %v1558_v51  ;;  %v6363_v56 = vcombine.low %v1555_v52, %v1559_v54 }
 0x168   : > { %3033 = vmatpush1.bf16.msra.mxu1 %v6297_v57  ;;  %3119 = vmatpush1.bf16.msra.mxu0 %v6299_v58  ;;  %v6364_v57 = vcombine.high %v1555_v52, %v1559_v54  ;;  %v1562_v58 = vld [vmem:[%s9322_s7 + $0x3c0] sm:$0xff] }
 0x169   : > { %3034 = vmatprep.subr.bf16.mxu1 %v6306_v59  ;;  %3120 = vmatprep.subr.bf16.mxu0 %v6308_v60  ;;  %v1566_v59 = vld [vmem:[%s9322_s7 + $0x3e0] sm:$0xff]  ;;  %v1563_v60 = vld [vmem:[%s9322_s7 + $0x3c8] sm:$0xff] }
 0x16a   : > { %v6370_v61 = vcombine.high %v1562_v58, %v1566_v59  ;;  %v6369_v63 = vcombine.low %v1562_v58, %v1566_v59  ;;  %v6371_v0 = vcombine.low %v1563_v60, %v1567_v62  ;;  %v1586_v52 = vld [vmem:[%s9322_s7 + $0x480] sm:$0xff] }
 0x16c   : > { %3035 = vmatpush1.bf16.msra.mxu1 %v6305_v1  ;;  %3121 = vmatpush1.bf16.msra.mxu0 %v6307_v2  ;;  %v6372_v1 = vcombine.high %v1563_v60, %v1567_v62  ;;  %v1570_v2 = vld [vmem:[%s9322_s7 + $0x400] sm:$0xff] }
 0x16d   : > { %3036 = vmatprep.subr.bf16.mxu1 %v6314_v3  ;;  %3122 = vmatprep.subr.bf16.mxu0 %v6316_v4  ;;  %v1574_v3 = vld [vmem:[%s9322_s7 + $0x420] sm:$0xff]  ;;  %v1571_v4 = vld [vmem:[%s9322_s7 + $0x408] sm:$0xff] }
 0x16e   : > { %v6378_v5 = vcombine.high %v1570_v2, %v1574_v3  ;;  %v6377_v7 = vcombine.low %v1570_v2, %v1574_v3  ;;  %v6379_v8 = vcombine.low %v1571_v4, %v1575_v6  ;;  %v1594_v62 = vld [vmem:[%s9322_s7 + $0x4c0] sm:$0xff] }
 0x170   : > { %3037 = vmatpush1.bf16.msra.mxu1 %v6313_v9  ;;  %3123 = vmatpush1.bf16.msra.mxu0 %v6315_v10  ;;  %v6380_v9 = vcombine.high %v1571_v4, %v1575_v6  ;;  %v8401_v10 = vsub.s32 2, %v8193_v42  ;;  %v1602_v6 = vld [vmem:[%s9322_s7 + $0x500] sm:$0xff] }
 0x171   : > { %3038 = vmatprep.subr.bf16.mxu1 %v6322_v11  ;;  %3124 = vmatprep.subr.bf16.mxu0 %v6324_v12  ;;  %v1002_v11 = vld [vmem:[%s9321_s6] sm:$0xf]  ;;  %v8407_v12 = vsub.s32 3, %v8193_v42 }
 0x172   : > { %v1007_v13 = vrot.slane %v1002_v11, %v8196_v43  ;;  %v1015_v14 = vrot.slane %v1002_v11, %v8401_v10  ;;  %v1011_v15 = vrot.slane %v1002_v11, %v8202_v45 }
 0x173   : > { %v1019_v16 = vrot.slane %v1002_v11, %v8407_v12 }
 0x174   : > { %3039 = vmatpush1.bf16.msra.mxu1 %v6321_v17  ;;  %3125 = vmatpush1.bf16.msra.mxu0 %v6323_v18 }
 0x175   : > { %3040 = vmatprep.subr.bf16.mxu1 %v6330_v19  ;;  %3126 = vmatprep.subr.bf16.mxu0 %v6332_v20 }
 0x178   : > { %3041 = vmatpush1.bf16.msra.mxu1 %v6329_v25  ;;  %3127 = vmatpush1.bf16.msra.mxu0 %v6331_v26 }
 0x179   : > { %3042 = vmatprep.subr.bf16.mxu1 %v6338_v27  ;;  %3128 = vmatprep.subr.bf16.mxu0 %v6340_v28 }
 0x17c   : > { %3043 = vmatpush1.bf16.msra.mxu1 %v6337_v33  ;;  %3129 = vmatpush1.bf16.msra.mxu0 %v6339_v34 }
 0x17d   : > { %3044 = vmatprep.subr.bf16.mxu1 %v6346_v35  ;;  %3130 = vmatprep.subr.bf16.mxu0 %v6348_v36 }
 0x180   : > { %3045 = vmatpush1.bf16.msra.mxu1 %v6345_v41  ;;  %3131 = vmatpush1.bf16.msra.mxu0 %v6347_v44  ;;  %v1578_v41 = vld [vmem:[%s9322_s7 + $0x440] sm:$0xff] }
 0x181   : > { %3046 = vmatprep.subr.bf16.mxu1 %v6354_v46  ;;  %3132 = vmatprep.subr.bf16.mxu0 %v6356_v47  ;;  %v1582_v47 = vld [vmem:[%s9322_s7 + $0x460] sm:$0xff] }
 0x182   : > { %v6385_v58 = vcombine.low %v1578_v41, %v1582_v47 }
 0x184   : > { %3047 = vmatpush1.bf16.msra.mxu1 %v6353_v48  ;;  %3133 = vmatpush1.bf16.msra.mxu0 %v6355_v49  ;;  %v1579_v48 = vld [vmem:[%s9322_s7 + $0x448] sm:$0xff] }
 0x185   : > { %3048 = vmatprep.subr.bf16.mxu1 %v6362_v53  ;;  %3134 = vmatprep.subr.bf16.mxu0 %v6364_v57  ;;  %v1583_v49 = vld [vmem:[%s9322_s7 + $0x468] sm:$0xff]  ;;  %v6386_v53 = vcombine.high %v1578_v41, %v1582_v47  ;;  %v1638_v41 = vld [vmem:[%s9322_s7 + $0x620] sm:$0xff] }
 0x186   : > { %v6388_v54 = vcombine.high %v1579_v48, %v1583_v49  ;;  %v1591_v57 = vld [vmem:[%s9322_s7 + $0x4a8] sm:$0xff]  ;;  %v6387_v59 = vcombine.low %v1579_v48, %v1583_v49 }
 0x187   : > { %v1635_v47 = vld [vmem:[%s9322_s7 + $0x608] sm:$0xff] }
 0x188   : > { %3049 = vmatpush1.bf16.msra.mxu1 %v6361_v55  ;;  %3135 = vmatpush1.bf16.msra.mxu0 %v6363_v56  ;;  %v1590_v55 = vld [vmem:[%s9322_s7 + $0x4a0] sm:$0xff]  ;;  %v1587_v56 = vld [vmem:[%s9322_s7 + $0x488] sm:$0xff] }
 0x189   : > { %3050 = vmatprep.subr.bf16.mxu1 %v6370_v61  ;;  %3136 = vmatprep.subr.bf16.mxu0 %v6372_v1  ;;  %v6394_v60 = vcombine.high %v1586_v52, %v1590_v55  ;;  %v6396_v61 = vcombine.high %v1587_v56, %v1591_v57  ;;  %v1599_v1 = vld [vmem:[%s9322_s7 + $0x4e8] sm:$0xff]  ;;  %v6393_v2 = vcombine.low %v1586_v52, %v1590_v55  ;;  %v1642_v55 = vld [vmem:[%s9322_s7 + $0x640] sm:$0xff] }
 0x18a   : > { %v6395_v3 = vcombine.low %v1587_v56, %v1591_v57  ;;  %v1639_v48 = vld [vmem:[%s9322_s7 + $0x628] sm:$0xff]  ;;  %v1646_v56 = vld [vmem:[%s9322_s7 + $0x660] sm:$0xff] }
 0x18b   : > { %v1643_v57 = vld [vmem:[%s9322_s7 + $0x648] sm:$0xff] }
 0x18c   : > { %3051 = vmatpush1.bf16.msra.mxu1 %v6369_v63  ;;  %3137 = vmatpush1.bf16.msra.mxu0 %v6371_v0  ;;  %v1598_v63 = vld [vmem:[%s9322_s7 + $0x4e0] sm:$0xff]  ;;  %v1595_v0 = vld [vmem:[%s9322_s7 + $0x4c8] sm:$0xff] }
 0x18d   : > { %3063 = vmatprep.subr.bf16.mxu1 %v6378_v5  ;;  %3149 = vmatprep.subr.bf16.mxu0 %v6380_v9  ;;  %v6402_v4 = vcombine.high %v1594_v62, %v1598_v63  ;;  %v6404_v5 = vcombine.high %v1595_v0, %v1599_v1  ;;  %v1607_v9 = vld [vmem:[%s9322_s7 + $0x528] sm:$0xff]  ;;  %v6401_v11 = vcombine.low %v1594_v62, %v1598_v63  ;;  %v1650_v63 = vld [vmem:[%s9322_s7 + $0x680] sm:$0xff] }
 0x222   : > { %v1378_v17 = vpop.f32.mrb[4].mxu1  ;;  %v1421_v18 = vpop.f32.mrb[4].mxu0 }
 0x223   : > { %v1379_v19 = vadd.f32 %v1378_v17, %v1007_v13  ;;  %v1422_v20 = vadd.f32 %v1421_v18, %v1015_v14  ;;  %v1380_v21 = vpop.f32.mrb[5].mxu1  ;;  %v1423_v22 = vpop.f32.mrb[5].mxu0  ;;  %v1614_v17 = vld [vmem:[%s9322_s7 + $0x560] sm:$0xff]  ;;  %v1611_v18 = vld [vmem:[%s9322_s7 + $0x548] sm:$0xff] }
 0x224   : > { %v1381_v23 = vadd.f32 %v1380_v21, %v1011_v15  ;;  %v1424_v24 = vadd.f32 %v1423_v22, %v1019_v16  ;;  %v1382_v25 = vpop.f32.mrb[6].mxu1  ;;  %v1425_v26 = vpop.f32.mrb[6].mxu0 }
 0x225   : > { %v1383_v27 = vadd.f32 %v1382_v25, %v1007_v13  ;;  %v1426_v28 = vadd.f32 %v1425_v26, %v1015_v14  ;;  %v1384_v29 = vpop.f32.mrb[7].mxu1  ;;  %v1427_v30 = vpop.f32.mrb[7].mxu0  ;;  %v1430_v33 = vmax.f32 %v1379_v19, 0.0  ;;  %v1432_v34 = vmax.f32 %v1422_v20, 0.0  ;;  %v1615_v19 = vld [vmem:[%s9322_s7 + $0x568] sm:$0xff]  ;;  %v1622_v25 = vld [vmem:[%s9322_s7 + $0x5a0] sm:$0xff] }
 0x226   : > { %v1385_v31 = vadd.f32 %v1384_v29, %v1011_v15  ;;  %v1428_v32 = vadd.f32 %v1427_v30, %v1019_v16  ;;  %v1431_v37 = vmax.f32 %v1381_v23, 0.0  ;;  %v1433_v38 = vmax.f32 %v1424_v24, 0.0  ;;  %v1610_v16 = vld [vmem:[%s9322_s7 + $0x540] sm:$0xff]  ;;  %v1619_v26 = vld [vmem:[%s9322_s7 + $0x588] sm:$0xff] }
 0x227   : > { %v1434_v35 = vmax.f32 %v1383_v27, 0.0  ;;  %v1436_v36 = vmax.f32 %v1426_v28, 0.0  ;;  %v6403_v13 = vcombine.low %v1595_v0, %v1599_v1  ;;  %v6418_v22 = vcombine.high %v1610_v16, %v1614_v17  ;;  %v1618_v24 = vld [vmem:[%s9322_s7 + $0x580] sm:$0xff]  ;;  %v1623_v27 = vld [vmem:[%s9322_s7 + $0x5a8] sm:$0xff] }
 0x228   : > { %v1435_v39 = vmax.f32 %v1385_v31, 0.0  ;;  %v1437_v40 = vmax.f32 %v1428_v32, 0.0  ;;  %v6420_v23 = vcombine.high %v1611_v18, %v1615_v19  ;;  %v6417_v28 = vcombine.low %v1610_v16, %v1614_v17  ;;  %v1626_v32 = vld [vmem:[%s9322_s7 + $0x5c0] sm:$0xff]  ;;  %v1651_v1 = vld [vmem:[%s9322_s7 + $0x688] sm:$0xff] }
 0x229   : > { %v8416_v44 = vpack.c.bf16 %v1434_v35, %v1430_v33  ;;  %v8418_v46 = vpack.c.bf16 %v1436_v36, %v1432_v34  ;;  %v6419_v29 = vcombine.low %v1611_v18, %v1615_v19  ;;  %v6426_v30 = vcombine.high %v1618_v24, %v1622_v25  ;;  %v1630_v33 = vld [vmem:[%s9322_s7 + $0x5e0] sm:$0xff]  ;;  %v1627_v34 = vld [vmem:[%s9322_s7 + $0x5c8] sm:$0xff] }
 0x22a   : > { %v8429_v50 = vpack.c.bf16 %v1435_v39, %v1431_v37  ;;  %v8431_v51 = vpack.c.bf16 %v1437_v40, %v1433_v38  ;;  %v6428_v31 = vcombine.high %v1619_v26, %v1623_v27  ;;  %v1631_v35 = vld [vmem:[%s9322_s7 + $0x5e8] sm:$0xff]  ;;  %v6425_v36 = vcombine.low %v1618_v24, %v1622_v25  ;;  %v1634_v40 = vld [vmem:[%s9322_s7 + $0x600] sm:$0xff] }
 0x22b   : > { %v6427_v37 = vcombine.low %v1619_v26, %v1623_v27  ;;  %v6434_v38 = vcombine.high %v1626_v32, %v1630_v33  ;;  %v6436_v39 = vcombine.high %v1627_v34, %v1631_v35  ;;  %v6433_v49 = vcombine.low %v1626_v32, %v1630_v33  ;;  %v1654_v0 = vld [vmem:[%s9322_s7 + $0x6a0] sm:$0xff]  ;;  %v1667_v19 = vld [vmem:[%s9322_s7 + $0x708] sm:$0xff] }
 0x22c   : > { %3052 = vmatprep.mubr.bf16.mxu1 %v8429_v50  ;;  %3138 = vmatprep.mubr.bf16.mxu0 %v8429_v50  ;;  %v6435_v52 = vcombine.low %v1627_v34, %v1631_v35  ;;  %v1666_v17 = vld [vmem:[%s9322_s7 + $0x700] sm:$0xff]  ;;  %v1675_v27 = vld [vmem:[%s9322_s7 + $0x748] sm:$0xff] }
 0x22d   : > { %3053 = vmatmul.mubr.bf16.vlgmr.msra.gmra.mrb[8].mxu1 %v8416_v44  ;;  %3139 = vmatmul.mubr.bf16.vlgmr.msra.gmra.mrb[8].mxu0 %v8416_v44  ;;  %v1670_v18 = vld [vmem:[%s9322_s7 + $0x720] sm:$0xff]  ;;  %v1683_v35 = vld [vmem:[%s9322_s7 + $0x788] sm:$0xff] }
 0x22e   : > { %3064 = vmatpush1.bf16.msra.mxu1 %v6377_v7  ;;  %3150 = vmatpush1.bf16.msra.mxu0 %v6379_v8  ;;  %v1606_v7 = vld [vmem:[%s9322_s7 + $0x520] sm:$0xff]  ;;  %v1603_v8 = vld [vmem:[%s9322_s7 + $0x508] sm:$0xff] }
 0x22f   : > { %3095 = vmatprep.mubr.bf16.mxu1 %v8431_v51  ;;  %3181 = vmatprep.mubr.bf16.mxu0 %v8431_v51  ;;  %v6410_v14 = vcombine.high %v1602_v6, %v1606_v7  ;;  %v6412_v15 = vcombine.high %v1603_v8, %v1607_v9  ;;  %v6409_v20 = vcombine.low %v1602_v6, %v1606_v7  ;;  %v1658_v7 = vld [vmem:[%s9322_s7 + $0x6c0] sm:$0xff] }
 0x230   : > { %3065 = vmatprep.subr.bf16.mxu1 %v6386_v53  ;;  %3151 = vmatprep.subr.bf16.mxu0 %v6388_v54  ;;  %v6411_v21 = vcombine.low %v1603_v8, %v1607_v9  ;;  %v6442_v53 = vcombine.high %v1634_v40, %v1638_v41  ;;  %v6444_v54 = vcombine.high %v1635_v47, %v1639_v48  ;;  %v1662_v8 = vld [vmem:[%s9322_s7 + $0x6e0] sm:$0xff]  ;;  %v1659_v9 = vld [vmem:[%s9322_s7 + $0x6c8] sm:$0xff] }
 0x231   : > { %v1674_v25 = vld [vmem:[%s9322_s7 + $0x740] sm:$0xff] }
 0x232   : > { %3066 = vmatpush1.bf16.msra.mxu1 %v6385_v58  ;;  %3152 = vmatpush1.bf16.msra.mxu0 %v6387_v59  ;;  %v1647_v58 = vld [vmem:[%s9322_s7 + $0x668] sm:$0xff]  ;;  %v6441_v59 = vcombine.low %v1634_v40, %v1638_v41  ;;  %v1678_v26 = vld [vmem:[%s9322_s7 + $0x760] sm:$0xff] }
 0x233   : > { %3067 = vmatprep.subr.bf16.mxu1 %v6394_v60  ;;  %3153 = vmatprep.subr.bf16.mxu0 %v6396_v61  ;;  %v6443_v60 = vcombine.low %v1635_v47, %v1639_v48  ;;  %v6450_v61 = vcombine.high %v1642_v55, %v1646_v56  ;;  %v6452_v62 = vcombine.high %v1643_v57, %v1647_v58  ;;  %v1682_v33 = vld [vmem:[%s9322_s7 + $0x780] sm:$0xff]  ;;  %v1691_v48 = vld [vmem:[%s9322_s7 + $0x7c8] sm:$0xff] }
 0x234   : > { %v1686_v34 = vld [vmem:[%s9322_s7 + $0x7a0] sm:$0xff] }
 0x235   : > { %v1690_v41 = vld [vmem:[%s9322_s7 + $0x7c0] sm:$0xff] }
 0x236   : > { %3068 = vmatpush1.bf16.msra.mxu1 %v6393_v2  ;;  %3154 = vmatpush1.bf16.msra.mxu0 %v6395_v3  ;;  %v1655_v2 = vld [vmem:[%s9322_s7 + $0x6a8] sm:$0xff]  ;;  %v6449_v3 = vcombine.low %v1642_v55, %v1646_v56  ;;  %v1694_v47 = vld [vmem:[%s9322_s7 + $0x7e0] sm:$0xff]  ;;  %v1444_v56 = vld [vmem:[%s9322_s7 + $0x10] sm:$0xff] }
 0x237   : > { %3069 = vmatprep.subr.bf16.mxu1 %v6402_v4  ;;  %3155 = vmatprep.subr.bf16.mxu0 %v6404_v5  ;;  %v6451_v4 = vcombine.low %v1643_v57, %v1647_v58  ;;  %v6458_v5 = vcombine.high %v1650_v63, %v1654_v0  ;;  %v6460_v6 = vcombine.high %v1651_v1, %v1655_v2  ;;  %v1448_v57 = vld [vmem:[%s9322_s7 + $0x30] sm:$0xff]  ;;  %v1445_v58 = vld [vmem:[%s9322_s7 + $0x18] sm:$0xff] }
 0x23a   : > { %3070 = vmatpush1.bf16.msra.mxu1 %v6401_v11  ;;  %3156 = vmatpush1.bf16.msra.mxu0 %v6403_v13  ;;  %v1663_v11 = vld [vmem:[%s9322_s7 + $0x6e8] sm:$0xff]  ;;  %v6457_v13 = vcombine.low %v1650_v63, %v1654_v0  ;;  %v1452_v0 = vld [vmem:[%s9322_s7 + $0x50] sm:$0xff] }
 0x23b   : > { %3071 = vmatprep.subr.bf16.mxu1 %v6410_v14  ;;  %3157 = vmatprep.subr.bf16.mxu0 %v6412_v15  ;;  %v6459_v14 = vcombine.low %v1651_v1, %v1655_v2  ;;  %v6466_v15 = vcombine.high %v1658_v7, %v1662_v8  ;;  %v6468_v16 = vcombine.high %v1659_v9, %v1663_v11  ;;  %v1456_v1 = vld [vmem:[%s9322_s7 + $0x70] sm:$0xff]  ;;  %v1453_v2 = vld [vmem:[%s9322_s7 + $0x58] sm:$0xff] }
 0x23e   : > { %3072 = vmatpush1.bf16.msra.mxu1 %v6409_v20  ;;  %3158 = vmatpush1.bf16.msra.mxu0 %v6411_v21  ;;  %v1671_v20 = vld [vmem:[%s9322_s7 + $0x728] sm:$0xff]  ;;  %v6465_v21 = vcombine.low %v1658_v7, %v1662_v8  ;;  %v1460_v8 = vld [vmem:[%s9322_s7 + $0x90] sm:$0xff] }
 0x23f   : > { %3073 = vmatprep.subr.bf16.mxu1 %v6418_v22  ;;  %3159 = vmatprep.subr.bf16.mxu0 %v6420_v23  ;;  %v6467_v22 = vcombine.low %v1659_v9, %v1663_v11  ;;  %v6474_v23 = vcombine.high %v1666_v17, %v1670_v18  ;;  %v6476_v24 = vcombine.high %v1667_v19, %v1671_v20  ;;  %v1464_v9 = vld [vmem:[%s9322_s7 + $0xb0] sm:$0xff]  ;;  %v1461_v11 = vld [vmem:[%s9322_s7 + $0x98] sm:$0xff] }
 0x242   : > { %3074 = vmatpush1.bf16.msra.mxu1 %v6417_v28  ;;  %3160 = vmatpush1.bf16.msra.mxu0 %v6419_v29  ;;  %v1679_v28 = vld [vmem:[%s9322_s7 + $0x768] sm:$0xff]  ;;  %v6473_v29 = vcombine.low %v1666_v17, %v1670_v18  ;;  %v1468_v18 = vld [vmem:[%s9322_s7 + $0xd0] sm:$0xff] }
 0x243   : > { %3075 = vmatprep.subr.bf16.mxu1 %v6426_v30  ;;  %3161 = vmatprep.subr.bf16.mxu0 %v6428_v31  ;;  %v6475_v30 = vcombine.low %v1667_v19, %v1671_v20  ;;  %v6482_v31 = vcombine.high %v1674_v25, %v1678_v26  ;;  %v6484_v32 = vcombine.high %v1675_v27, %v1679_v28  ;;  %v1472_v19 = vld [vmem:[%s9322_s7 + $0xf0] sm:$0xff]  ;;  %v1469_v20 = vld [vmem:[%s9322_s7 + $0xd8] sm:$0xff] }
 0x246   : > { %3076 = vmatpush1.bf16.msra.mxu1 %v6425_v36  ;;  %3162 = vmatpush1.bf16.msra.mxu0 %v6427_v37  ;;  %v1687_v36 = vld [vmem:[%s9322_s7 + $0x7a8] sm:$0xff]  ;;  %v6481_v37 = vcombine.low %v1674_v25, %v1678_v26  ;;  %v1476_v25 = vld [vmem:[%s9322_s7 + $0x110] sm:$0xff] }
 0x247   : > { %3077 = vmatprep.subr.bf16.mxu1 %v6434_v38  ;;  %3163 = vmatprep.subr.bf16.mxu0 %v6436_v39  ;;  %v6483_v38 = vcombine.low %v1675_v27, %v1679_v28  ;;  %v6490_v39 = vcombine.high %v1682_v33, %v1686_v34  ;;  %v6492_v40 = vcombine.high %v1683_v35, %v1687_v36  ;;  %v1480_v26 = vld [vmem:[%s9322_s7 + $0x130] sm:$0xff]  ;;  %v1477_v27 = vld [vmem:[%s9322_s7 + $0x118] sm:$0xff] }
 0x248   : > { %v1481_v28 = vld [vmem:[%s9322_s7 + $0x138] sm:$0xff] }
 0x24a   : > { %3078 = vmatpush1.bf16.msra.mxu1 %v6433_v49  ;;  %3164 = vmatpush1.bf16.msra.mxu0 %v6435_v52  ;;  %v1695_v49 = vld [vmem:[%s9322_s7 + $0x7e8] sm:$0xff]  ;;  %v6489_v52 = vcombine.low %v1682_v33, %v1686_v34  ;;  %v1484_v33 = vld [vmem:[%s9322_s7 + $0x150] sm:$0xff] }
 0x24b   : > { %3079 = vmatprep.subr.bf16.mxu1 %v6442_v53  ;;  %3165 = vmatprep.subr.bf16.mxu0 %v6444_v54  ;;  %v6491_v53 = vcombine.low %v1683_v35, %v1687_v36  ;;  %v6498_v54 = vcombine.high %v1690_v41, %v1694_v47  ;;  %v6500_v55 = vcombine.high %v1691_v48, %v1695_v49  ;;  %v1488_v34 = vld [vmem:[%s9322_s7 + $0x170] sm:$0xff]  ;;  %v1485_v35 = vld [vmem:[%s9322_s7 + $0x158] sm:$0xff] }
 0x24c   : > { %v1489_v36 = vld [vmem:[%s9322_s7 + $0x178] sm:$0xff] }
 0x24e   : > { %3080 = vmatpush1.bf16.msra.mxu1 %v6441_v59  ;;  %3166 = vmatpush1.bf16.msra.mxu0 %v6443_v60  ;;  %v1449_v59 = vld [vmem:[%s9322_s7 + $0x38] sm:$0xff]  ;;  %v6497_v60 = vcombine.low %v1690_v41, %v1694_v47  ;;  %v1492_v41 = vld [vmem:[%s9322_s7 + $0x190] sm:$0xff] }
 0x24f   : > { %3081 = vmatprep.subr.bf16.mxu1 %v6450_v61  ;;  %3167 = vmatprep.subr.bf16.mxu0 %v6452_v62  ;;  %v6499_v61 = vcombine.low %v1691_v48, %v1695_v49  ;;  %v6254_v62 = vcombine.high %v1444_v56, %v1448_v57  ;;  %v6256_v63 = vcombine.high %v1445_v58, %v1449_v59  ;;  %v1496_v47 = vld [vmem:[%s9322_s7 + $0x1b0] sm:$0xff]  ;;  %v1493_v48 = vld [vmem:[%s9322_s7 + $0x198] sm:$0xff] }
 0x250   : > { %v1497_v49 = vld [vmem:[%s9322_s7 + $0x1b8] sm:$0xff] }
 0x252   : > { %3082 = vmatpush1.bf16.msra.mxu1 %v6449_v3  ;;  %3168 = vmatpush1.bf16.msra.mxu0 %v6451_v4  ;;  %v1457_v3 = vld [vmem:[%s9322_s7 + $0x78] sm:$0xff]  ;;  %v6253_v4 = vcombine.low %v1444_v56, %v1448_v57  ;;  %v1500_v56 = vld [vmem:[%s9322_s7 + $0x1d0] sm:$0xff] }
 0x253   : > { %3083 = vmatprep.subr.bf16.mxu1 %v6458_v5  ;;  %3169 = vmatprep.subr.bf16.mxu0 %v6460_v6  ;;  %v6255_v5 = vcombine.low %v1445_v58, %v1449_v59  ;;  %v6262_v6 = vcombine.high %v1452_v0, %v1456_v1  ;;  %v6264_v7 = vcombine.high %v1453_v2, %v1457_v3  ;;  %v1504_v57 = vld [vmem:[%s9322_s7 + $0x1f0] sm:$0xff]  ;;  %v1501_v58 = vld [vmem:[%s9322_s7 + $0x1d8] sm:$0xff] }
 0x254   : > { %v1505_v59 = vld [vmem:[%s9322_s7 + $0x1f8] sm:$0xff] }
 0x256   : > { %3084 = vmatpush1.bf16.msra.mxu1 %v6457_v13  ;;  %3170 = vmatpush1.bf16.msra.mxu0 %v6459_v14  ;;  %v1465_v13 = vld [vmem:[%s9322_s7 + $0xb8] sm:$0xff]  ;;  %v6261_v14 = vcombine.low %v1452_v0, %v1456_v1  ;;  %v1508_v0 = vld [vmem:[%s9322_s7 + $0x210] sm:$0xff] }
 0x257   : > { %3085 = vmatprep.subr.bf16.mxu1 %v6466_v15  ;;  %3171 = vmatprep.subr.bf16.mxu0 %v6468_v16  ;;  %v6263_v15 = vcombine.low %v1453_v2, %v1457_v3  ;;  %v6270_v16 = vcombine.high %v1460_v8, %v1464_v9  ;;  %v6272_v17 = vcombine.high %v1461_v11, %v1465_v13  ;;  %v1512_v1 = vld [vmem:[%s9322_s7 + $0x230] sm:$0xff]  ;;  %v1509_v2 = vld [vmem:[%s9322_s7 + $0x218] sm:$0xff] }
 0x258   : > { %v1513_v3 = vld [vmem:[%s9322_s7 + $0x238] sm:$0xff] }
 0x25a   : > { %3086 = vmatpush1.bf16.msra.mxu1 %v6465_v21  ;;  %3172 = vmatpush1.bf16.msra.mxu0 %v6467_v22  ;;  %v6269_v21 = vcombine.low %v1460_v8, %v1464_v9  ;;  %v6271_v22 = vcombine.low %v1461_v11, %v1465_v13  ;;  %v1516_v8 = vld [vmem:[%s9322_s7 + $0x250] sm:$0xff]  ;;  %v1517_v11 = vld [vmem:[%s9322_s7 + $0x258] sm:$0xff] }
 0x25b   : > { %3087 = vmatprep.subr.bf16.mxu1 %v6474_v23  ;;  %3173 = vmatprep.subr.bf16.mxu0 %v6476_v24  ;;  %v6278_v23 = vcombine.high %v1468_v18, %v1472_v19  ;;  %v1520_v9 = vld [vmem:[%s9322_s7 + $0x270] sm:$0xff]  ;;  %v1521_v13 = vld [vmem:[%s9322_s7 + $0x278] sm:$0xff] }
 0x25e   : > { %3088 = vmatpush1.bf16.msra.mxu1 %v6473_v29  ;;  %3174 = vmatpush1.bf16.msra.mxu0 %v6475_v30  ;;  %v6277_v29 = vcombine.low %v1468_v18, %v1472_v19  ;;  %v1524_v18 = vld [vmem:[%s9322_s7 + $0x290] sm:$0xff] }
 0x25f   : > { %3089 = vmatprep.subr.bf16.mxu1 %v6482_v31  ;;  %3175 = vmatprep.subr.bf16.mxu0 %v6484_v32  ;;  %v6286_v31 = vcombine.high %v1476_v25, %v1480_v26  ;;  %v6288_v32 = vcombine.high %v1477_v27, %v1481_v28  ;;  %v1528_v19 = vld [vmem:[%s9322_s7 + $0x2b0] sm:$0xff] }
 0x262   : > { %3090 = vmatpush1.bf16.msra.mxu1 %v6481_v37  ;;  %3176 = vmatpush1.bf16.msra.mxu0 %v6483_v38  ;;  %v6285_v37 = vcombine.low %v1476_v25, %v1480_v26  ;;  %v6287_v38 = vcombine.low %v1477_v27, %v1481_v28  ;;  %v1532_v25 = vld [vmem:[%s9322_s7 + $0x2d0] sm:$0xff]  ;;  %v1533_v27 = vld [vmem:[%s9322_s7 + $0x2d8] sm:$0xff] }
 0x263   : > { %3091 = vmatprep.subr.bf16.mxu1 %v6490_v39  ;;  %3177 = vmatprep.subr.bf16.mxu0 %v6492_v40  ;;  %v6294_v39 = vcombine.high %v1484_v33, %v1488_v34  ;;  %v6296_v40 = vcombine.high %v1485_v35, %v1489_v36  ;;  %v1536_v26 = vld [vmem:[%s9322_s7 + $0x2f0] sm:$0xff]  ;;  %v1537_v28 = vld [vmem:[%s9322_s7 + $0x2f8] sm:$0xff] }
 0x266   : > { %3092 = vmatpush1.bf16.msra.mxu1 %v6489_v52  ;;  %3178 = vmatpush1.bf16.msra.mxu0 %v6491_v53  ;;  %v6293_v52 = vcombine.low %v1484_v33, %v1488_v34  ;;  %v6295_v53 = vcombine.low %v1485_v35, %v1489_v36  ;;  %v1540_v33 = vld [vmem:[%s9322_s7 + $0x310] sm:$0xff]  ;;  %v1541_v35 = vld [vmem:[%s9322_s7 + $0x318] sm:$0xff] }
 0x267   : > { %3093 = vmatprep.subr.bf16.mxu1 %v6498_v54  ;;  %3179 = vmatprep.subr.bf16.mxu0 %v6500_v55  ;;  %v6302_v54 = vcombine.high %v1492_v41, %v1496_v47  ;;  %v6304_v55 = vcombine.high %v1493_v48, %v1497_v49  ;;  %v1544_v34 = vld [vmem:[%s9322_s7 + $0x330] sm:$0xff]  ;;  %v1545_v36 = vld [vmem:[%s9322_s7 + $0x338] sm:$0xff] }
 0x26a   : > { %3094 = vmatpush1.bf16.msra.mxu1 %v6497_v60  ;;  %3180 = vmatpush1.bf16.msra.mxu0 %v6499_v61  ;;  %v6301_v60 = vcombine.low %v1492_v41, %v1496_v47  ;;  %v6303_v61 = vcombine.low %v1493_v48, %v1497_v49  ;;  %v1548_v41 = vld [vmem:[%s9322_s7 + $0x350] sm:$0xff]  ;;  %v1549_v48 = vld [vmem:[%s9322_s7 + $0x358] sm:$0xff] }
 0x26b   : > { %3192 = vmatprep.subr.bf16.mxu1 %v6254_v62  ;;  %3278 = vmatprep.subr.bf16.mxu0 %v6256_v63  ;;  %v6310_v62 = vcombine.high %v1500_v56, %v1504_v57  ;;  %v6312_v63 = vcombine.high %v1501_v58, %v1505_v59  ;;  %v1552_v47 = vld [vmem:[%s9322_s7 + $0x370] sm:$0xff]  ;;  %v1553_v49 = vld [vmem:[%s9322_s7 + $0x378] sm:$0xff] }
 0x26d   : > { %3096 = vmatmul.mubr.bf16.vlgmr.msra.gmra.mrb[8].mxu1 %v8418_v46  ;;  %3182 = vmatmul.mubr.bf16.vlgmr.msra.gmra.mrb[8].mxu0 %v8418_v46 }
 0x26e   : > { %3193 = vmatpush1.bf16.msra.mxu1 %v6253_v4  ;;  %3224 = vmatprep.mubr.bf16.mxu1 %v8429_v50  ;;  %v6309_v4 = vcombine.low %v1500_v56, %v1504_v57  ;;  %v1556_v56 = vld [vmem:[%s9322_s7 + $0x390] sm:$0xff] }
 0x26f   : > { %3279 = vmatpush1.bf16.msra.mxu0 %v6255_v5  ;;  %3310 = vmatprep.mubr.bf16.mxu0 %v8429_v50  ;;  %v1473_v50 = vld [vmem:[%s9322_s7 + $0xf8] sm:$0xff]  ;;  %v6311_v5 = vcombine.low %v1501_v58, %v1505_v59  ;;  %v1560_v57 = vld [vmem:[%s9322_s7 + $0x3b0] sm:$0xff] }
 0x270   : > { %3194 = vmatprep.subr.bf16.mxu1 %v6262_v6  ;;  %3280 = vmatprep.subr.bf16.mxu0 %v6264_v7  ;;  %v6280_v24 = vcombine.high %v1469_v20, %v1473_v50  ;;  %v6279_v30 = vcombine.low %v1469_v20, %v1473_v50  ;;  %v6318_v6 = vcombine.high %v1508_v0, %v1512_v1  ;;  %v1525_v20 = vld [vmem:[%s9322_s7 + $0x298] sm:$0xff] }
 0x271   : > { %v6320_v7 = vcombine.high %v1509_v2, %v1513_v3  ;;  %v1529_v50 = vld [vmem:[%s9322_s7 + $0x2b8] sm:$0xff] }
 0x272   : > { %3195 = vmatpush1.bf16.msra.mxu1 %v6261_v14  ;;  %v6317_v14 = vcombine.low %v1508_v0, %v1512_v1  ;;  %v1557_v58 = vld [vmem:[%s9322_s7 + $0x398] sm:$0xff]  ;;  %v1564_v0 = vld [vmem:[%s9322_s7 + $0x3d0] sm:$0xff] }
 0x273   : > { %3281 = vmatpush1.bf16.msra.mxu0 %v6263_v15  ;;  %3196 = vmatprep.subr.bf16.mxu1 %v6270_v16  ;;  %v6319_v15 = vcombine.low %v1509_v2, %v1513_v3  ;;  %v6326_v16 = vcombine.high %v1516_v8, %v1520_v9  ;;  %v1561_v59 = vld [vmem:[%s9322_s7 + $0x3b8] sm:$0xff]  ;;  %v1568_v1 = vld [vmem:[%s9322_s7 + $0x3f0] sm:$0xff] }
 0x274   : > { %3282 = vmatprep.subr.bf16.mxu0 %v6272_v17  ;;  %v6328_v17 = vcombine.high %v1517_v11, %v1521_v13  ;;  %v1565_v2 = vld [vmem:[%s9322_s7 + $0x3d8] sm:$0xff] }
 0x275   : > { %v1569_v3 = vld [vmem:[%s9322_s7 + $0x3f8] sm:$0xff] }
 0x276   : > { %3197 = vmatpush1.bf16.msra.mxu1 %v6269_v21  ;;  %v6325_v21 = vcombine.low %v1516_v8, %v1520_v9  ;;  %v1572_v8 = vld [vmem:[%s9322_s7 + $0x410] sm:$0xff] }
 0x277   : > { %3283 = vmatpush1.bf16.msra.mxu0 %v6271_v22  ;;  %3198 = vmatprep.subr.bf16.mxu1 %v6278_v23  ;;  %v6327_v22 = vcombine.low %v1517_v11, %v1521_v13  ;;  %v6334_v23 = vcombine.high %v1524_v18, %v1528_v19  ;;  %v1576_v9 = vld [vmem:[%s9322_s7 + $0x430] sm:$0xff]  ;;  %v1573_v11 = vld [vmem:[%s9322_s7 + $0x418] sm:$0xff] }
 0x278   : > { %3284 = vmatprep.subr.bf16.mxu0 %v6280_v24  ;;  %v6336_v24 = vcombine.high %v1525_v20, %v1529_v50  ;;  %v1577_v13 = vld [vmem:[%s9322_s7 + $0x438] sm:$0xff] }
 0x27a   : > { %3199 = vmatpush1.bf16.msra.mxu1 %v6277_v29  ;;  %v6333_v29 = vcombine.low %v1524_v18, %v1528_v19  ;;  %v1580_v18 = vld [vmem:[%s9322_s7 + $0x450] sm:$0xff] }
 0x27b   : > { %3285 = vmatpush1.bf16.msra.mxu0 %v6279_v30  ;;  %3200 = vmatprep.subr.bf16.mxu1 %v6286_v31  ;;  %v6335_v30 = vcombine.low %v1525_v20, %v1529_v50  ;;  %v6342_v31 = vcombine.high %v1532_v25, %v1536_v26  ;;  %v1584_v19 = vld [vmem:[%s9322_s7 + $0x470] sm:$0xff]  ;;  %v6381_v20 = vcombine.low %v1572_v8, %v1576_v9  ;;  %v1581_v50 = vld [vmem:[%s9322_s7 + $0x458] sm:$0xff] }
 0x27c   : > { %3286 = vmatprep.subr.bf16.mxu0 %v6288_v32  ;;  %v6344_v32 = vcombine.high %v1533_v27, %v1537_v28 }
 0x27e   : > { %3201 = vmatpush1.bf16.msra.mxu1 %v6285_v37  ;;  %v6341_v37 = vcombine.low %v1532_v25, %v1536_v26  ;;  %v1592_v25 = vld [vmem:[%s9322_s7 + $0x4b0] sm:$0xff] }
 0x27f   : > { %3287 = vmatpush1.bf16.msra.mxu0 %v6287_v38  ;;  %3202 = vmatprep.subr.bf16.mxu1 %v6294_v39  ;;  %v6343_v38 = vcombine.low %v1533_v27, %v1537_v28  ;;  %v6350_v39 = vcombine.high %v1540_v33, %v1544_v34  ;;  %v1589_v27 = vld [vmem:[%s9322_s7 + $0x498] sm:$0xff] }
 0x280   : > { %3288 = vmatprep.subr.bf16.mxu0 %v6296_v40  ;;  %v6352_v40 = vcombine.high %v1541_v35, %v1545_v36  ;;  %v1593_v28 = vld [vmem:[%s9322_s7 + $0x4b8] sm:$0xff] }
 0x282   : > { %3203 = vmatpush1.bf16.msra.mxu1 %v6293_v52  ;;  %v6349_v52 = vcombine.low %v1540_v33, %v1544_v34  ;;  %v1596_v33 = vld [vmem:[%s9322_s7 + $0x4d0] sm:$0xff] }
 0x283   : > { %3289 = vmatpush1.bf16.msra.mxu0 %v6295_v53  ;;  %3204 = vmatprep.subr.bf16.mxu1 %v6302_v54  ;;  %v6351_v53 = vcombine.low %v1541_v35, %v1545_v36  ;;  %v6358_v54 = vcombine.high %v1548_v41, %v1552_v47  ;;  %v1600_v34 = vld [vmem:[%s9322_s7 + $0x4f0] sm:$0xff]  ;;  %v1601_v35 = vld [vmem:[%s9322_s7 + $0x4f8] sm:$0xff]  ;;  %v6399_v36 = vcombine.low %v1589_v27, %v1593_v28 }
 0x284   : > { %3290 = vmatprep.subr.bf16.mxu0 %v6304_v55  ;;  %v6360_v55 = vcombine.high %v1549_v48, %v1553_v49 }
 0x286   : > { %3205 = vmatpush1.bf16.msra.mxu1 %v6301_v60  ;;  %v6357_v60 = vcombine.low %v1548_v41, %v1552_v47  ;;  %v1605_v41 = vld [vmem:[%s9322_s7 + $0x518] sm:$0xff] }
 0x287   : > { %3291 = vmatpush1.bf16.msra.mxu0 %v6303_v61  ;;  %3206 = vmatprep.subr.bf16.mxu1 %v6310_v62  ;;  %v6359_v61 = vcombine.low %v1549_v48, %v1553_v49  ;;  %v6366_v62 = vcombine.high %v1556_v56, %v1560_v57  ;;  %v1609_v47 = vld [vmem:[%s9322_s7 + $0x538] sm:$0xff]  ;;  %v6405_v48 = vcombine.low %v1596_v33, %v1600_v34 }
 0x288   : > { %3292 = vmatprep.subr.bf16.mxu0 %v6312_v63  ;;  %v6368_v63 = vcombine.high %v1557_v58, %v1561_v59 }
 0x28a   : > { %3207 = vmatpush1.bf16.msra.mxu1 %v6309_v4  ;;  %v6365_v4 = vcombine.low %v1556_v56, %v1560_v57  ;;  %v1613_v56 = vld [vmem:[%s9322_s7 + $0x558] sm:$0xff] }
 0x28b   : > { %3293 = vmatpush1.bf16.msra.mxu0 %v6311_v5  ;;  %3208 = vmatprep.subr.bf16.mxu1 %v6318_v6  ;;  %v6367_v5 = vcombine.low %v1557_v58, %v1561_v59  ;;  %v6374_v6 = vcombine.high %v1564_v0, %v1568_v1  ;;  %v1617_v57 = vld [vmem:[%s9322_s7 + $0x578] sm:$0xff]  ;;  %v6415_v59 = vcombine.low %v1605_v41, %v1609_v47 }
 0x28c   : > { %3294 = vmatprep.subr.bf16.mxu0 %v6320_v7  ;;  %v6376_v7 = vcombine.high %v1565_v2, %v1569_v3 }
 0x28e   : > { %3209 = vmatpush1.bf16.msra.mxu1 %v6317_v14  ;;  %v6373_v14 = vcombine.low %v1564_v0, %v1568_v1  ;;  %v1621_v0 = vld [vmem:[%s9322_s7 + $0x598] sm:$0xff] }
 0x28f   : > { %3295 = vmatpush1.bf16.msra.mxu0 %v6319_v15  ;;  %3210 = vmatprep.subr.bf16.mxu1 %v6326_v16  ;;  %v6375_v15 = vcombine.low %v1565_v2, %v1569_v3  ;;  %v6382_v16 = vcombine.high %v1572_v8, %v1576_v9  ;;  %v1625_v1 = vld [vmem:[%s9322_s7 + $0x5b8] sm:$0xff]  ;;  %v6423_v3 = vcombine.low %v1613_v56, %v1617_v57 }
 0x290   : > { %3296 = vmatprep.subr.bf16.mxu0 %v6328_v17  ;;  %v6384_v17 = vcombine.high %v1573_v11, %v1577_v13  ;;  %v1629_v8 = vld [vmem:[%s9322_s7 + $0x5d8] sm:$0xff] }
 0x291   : > { %v1633_v9 = vld [vmem:[%s9322_s7 + $0x5f8] sm:$0xff] }
 0x292   : > { %3211 = vmatpush1.bf16.msra.mxu1 %v6325_v21  ;;  %v1585_v21 = vld [vmem:[%s9322_s7 + $0x478] sm:$0xff] }
 0x293   : > { %3297 = vmatpush1.bf16.msra.mxu0 %v6327_v22  ;;  %3212 = vmatprep.subr.bf16.mxu1 %v6334_v23  ;;  %v6383_v22 = vcombine.low %v1573_v11, %v1577_v13  ;;  %v6390_v23 = vcombine.high %v1580_v18, %v1584_v19  ;;  %v6392_v26 = vcombine.high %v1581_v50, %v1585_v21 }
 0x294   : > { %3298 = vmatprep.subr.bf16.mxu0 %v6336_v24  ;;  %v1588_v24 = vld [vmem:[%s9322_s7 + $0x490] sm:$0xff]  ;;  %v6431_v13 = vcombine.low %v1621_v0, %v1625_v1 }
 0x296   : > { %3213 = vmatpush1.bf16.msra.mxu1 %v6333_v29  ;;  %v6389_v29 = vcombine.low %v1580_v18, %v1584_v19  ;;  %v1637_v18 = vld [vmem:[%s9322_s7 + $0x618] sm:$0xff] }
 0x297   : > { %3299 = vmatpush1.bf16.msra.mxu0 %v6335_v30  ;;  %3214 = vmatprep.subr.bf16.mxu1 %v6342_v31  ;;  %v6391_v30 = vcombine.low %v1581_v50, %v1585_v21  ;;  %v6398_v31 = vcombine.high %v1588_v24, %v1592_v25  ;;  %v1641_v19 = vld [vmem:[%s9322_s7 + $0x638] sm:$0xff]  ;;  %v6439_v50 = vcombine.low %v1629_v8, %v1633_v9 }
 0x298   : > { %3300 = vmatprep.subr.bf16.mxu0 %v6344_v32  ;;  %v6400_v32 = vcombine.high %v1589_v27, %v1593_v28  ;;  %v6447_v28 = vcombine.low %v1637_v18, %v1641_v19 }
 0x29a   : > { %3215 = vmatpush1.bf16.msra.mxu1 %v6341_v37  ;;  %v6406_v37 = vcombine.high %v1596_v33, %v1600_v34  ;;  %v1653_v33 = vld [vmem:[%s9322_s7 + $0x698] sm:$0xff] }
 0x29b   : > { %3301 = vmatpush1.bf16.msra.mxu0 %v6343_v38  ;;  %3216 = vmatprep.subr.bf16.mxu1 %v6350_v39  ;;  %v1604_v39 = vld [vmem:[%s9322_s7 + $0x510] sm:$0xff]  ;;  %v1657_v34 = vld [vmem:[%s9322_s7 + $0x6b8] sm:$0xff] }
 0x29c   : > { %3302 = vmatprep.subr.bf16.mxu0 %v6352_v40  ;;  %v1608_v40 = vld [vmem:[%s9322_s7 + $0x530] sm:$0xff] }
 0x29d   : > { %v6413_v58 = vcombine.low %v1604_v39, %v1608_v40 }
 0x29e   : > { %3217 = vmatpush1.bf16.msra.mxu1 %v6349_v52  ;;  %v6414_v52 = vcombine.high %v1604_v39, %v1608_v40  ;;  %v1661_v39 = vld [vmem:[%s9322_s7 + $0x6d8] sm:$0xff] }
 0x29f   : > { %3303 = vmatpush1.bf16.msra.mxu0 %v6351_v53  ;;  %3218 = vmatprep.subr.bf16.mxu1 %v6358_v54  ;;  %v6416_v53 = vcombine.high %v1605_v41, %v1609_v47  ;;  %v1612_v54 = vld [vmem:[%s9322_s7 + $0x550] sm:$0xff]  ;;  %v1665_v40 = vld [vmem:[%s9322_s7 + $0x6f8] sm:$0xff]  ;;  %v6463_v47 = vcombine.low %v1653_v33, %v1657_v34 }
 0x2a0   : > { %3304 = vmatprep.subr.bf16.mxu0 %v6360_v55  ;;  %v1616_v55 = vld [vmem:[%s9322_s7 + $0x570] sm:$0xff] }
 0x2a1   : > { %v6421_v2 = vcombine.low %v1612_v54, %v1616_v55 }
 0x2a2   : > { %3219 = vmatpush1.bf16.msra.mxu1 %v6357_v60  ;;  %v6422_v60 = vcombine.high %v1612_v54, %v1616_v55  ;;  %v1669_v54 = vld [vmem:[%s9322_s7 + $0x718] sm:$0xff] }
 0x2a3   : > { %3305 = vmatpush1.bf16.msra.mxu0 %v6359_v61  ;;  %3220 = vmatprep.subr.bf16.mxu1 %v6366_v62  ;;  %v6424_v61 = vcombine.high %v1613_v56, %v1617_v57  ;;  %v1620_v62 = vld [vmem:[%s9322_s7 + $0x590] sm:$0xff]  ;;  %v1673_v55 = vld [vmem:[%s9322_s7 + $0x738] sm:$0xff]  ;;  %v6471_v57 = vcombine.low %v1661_v39, %v1665_v40 }
 0x2a4   : > { %3306 = vmatprep.subr.bf16.mxu0 %v6368_v63  ;;  %v1624_v63 = vld [vmem:[%s9322_s7 + $0x5b0] sm:$0xff] }
 0x2a5   : > { %v6429_v11 = vcombine.low %v1620_v62, %v1624_v63 }
 0x2a6   : > { %3221 = vmatpush1.bf16.msra.mxu1 %v6365_v4  ;;  %v6430_v4 = vcombine.high %v1620_v62, %v1624_v63  ;;  %v1677_v62 = vld [vmem:[%s9322_s7 + $0x758] sm:$0xff] }
 0x2a7   : > { %3307 = vmatpush1.bf16.msra.mxu0 %v6367_v5  ;;  %3222 = vmatprep.subr.bf16.mxu1 %v6374_v6  ;;  %v6432_v5 = vcombine.high %v1621_v0, %v1625_v1  ;;  %v1628_v6 = vld [vmem:[%s9322_s7 + $0x5d0] sm:$0xff]  ;;  %v1681_v63 = vld [vmem:[%s9322_s7 + $0x778] sm:$0xff]  ;;  %v6479_v1 = vcombine.low %v1669_v54, %v1673_v55 }
 0x2a8   : > { %3308 = vmatprep.subr.bf16.mxu0 %v6376_v7  ;;  %v1632_v7 = vld [vmem:[%s9322_s7 + $0x5f0] sm:$0xff] }
 0x2aa   : > { %3223 = vmatpush1.bf16.msra.mxu1 %v6373_v14  ;;  %v6438_v14 = vcombine.high %v1628_v6, %v1632_v7 }
 0x2ab   : > { %3309 = vmatpush1.bf16.msra.mxu0 %v6375_v15  ;;  %3235 = vmatprep.subr.bf16.mxu1 %v6382_v16  ;;  %v6440_v15 = vcombine.high %v1629_v8, %v1633_v9  ;;  %v1636_v16 = vld [vmem:[%s9322_s7 + $0x610] sm:$0xff]  ;;  %v6487_v9 = vcombine.low %v1677_v62, %v1681_v63 }
 0x2ac   : > { %3321 = vmatprep.subr.bf16.mxu0 %v6384_v17  ;;  %v1640_v17 = vld [vmem:[%s9322_s7 + $0x630] sm:$0xff] }
 0x2ad   : > { %3225 = vmatmul.mubr.bf16.vlgmr.msra.gmra.mrb[12].mxu1 %v8416_v44  ;;  %v6446_v21 = vcombine.high %v1636_v16, %v1640_v17  ;;  %v6445_v27 = vcombine.low %v1636_v16, %v1640_v17  ;;  %v1693_v16 = vld [vmem:[%s9322_s7 + $0x7d8] sm:$0xff] }
 0x2ae   : > { %3311 = vmatmul.mubr.bf16.vlgmr.msra.gmra.mrb[12].mxu0 %v8416_v44  ;;  %3236 = vmatpush1.bf16.msra.mxu1 %v6381_v20  ;;  %v1597_v44 = vld [vmem:[%s9322_s7 + $0x4d8] sm:$0xff]  ;;  %v6437_v20 = vcombine.low %v1628_v6, %v1632_v7 }
 0x2af   : > { %3267 = vmatprep.mubr.bf16.mxu1 %v8431_v51  ;;  %3322 = vmatpush1.bf16.msra.mxu0 %v6383_v22  ;;  %v6408_v38 = vcombine.high %v1597_v44, %v1601_v35  ;;  %v6407_v49 = vcombine.low %v1597_v44, %v1601_v35  ;;  %v6448_v22 = vcombine.high %v1637_v18, %v1641_v19  ;;  %v1685_v6 = vld [vmem:[%s9322_s7 + $0x798] sm:$0xff] }
 0x2b0   : > { %3353 = vmatprep.mubr.bf16.mxu0 %v8431_v51  ;;  %3237 = vmatprep.subr.bf16.mxu1 %v6390_v23  ;;  %v6397_v51 = vcombine.low %v1588_v24, %v1592_v25  ;;  %v1644_v23 = vld [vmem:[%s9322_s7 + $0x650] sm:$0xff]  ;;  %v1645_v25 = vld [vmem:[%s9322_s7 + $0x658] sm:$0xff] }
 0x2b1   : > { %3323 = vmatprep.subr.bf16.mxu0 %v6392_v26  ;;  %v1648_v24 = vld [vmem:[%s9322_s7 + $0x670] sm:$0xff]  ;;  %v1649_v26 = vld [vmem:[%s9322_s7 + $0x678] sm:$0xff] }
 0x2b2   : > { %3238 = vmatpush1.bf16.msra.mxu1 %v6389_v29  ;;  %v6454_v29 = vcombine.high %v1644_v23, %v1648_v24  ;;  %v6453_v44 = vcombine.low %v1644_v23, %v1648_v24  ;;  %v6455_v35 = vcombine.low %v1645_v25, %v1649_v26  ;;  %v1689_v7 = vld [vmem:[%s9322_s7 + $0x7b8] sm:$0xff]  ;;  %v7177_v23 = vld [vmem:[#allocation3 + $0x4] ss:$16 sps:$4 sm:$0xff]  }
 0x2b3   : > { %3324 = vmatpush1.bf16.msra.mxu0 %v6391_v30  ;;  %3239 = vmatprep.subr.bf16.mxu1 %v6398_v31  ;;  %v6456_v30 = vcombine.high %v1645_v25, %v1649_v26  ;;  %v1652_v31 = vld [vmem:[%s9322_s7 + $0x690] sm:$0xff]  ;;  %v1697_v17 = vld [vmem:[%s9322_s7 + $0x7f8] sm:$0xff]  ;;  %v6495_v19 = vcombine.low %v1685_v6, %v1689_v7 }
 0x2b4   : > { %3325 = vmatprep.subr.bf16.mxu0 %v6400_v32  ;;  %v1656_v32 = vld [vmem:[%s9322_s7 + $0x6b0] sm:$0xff]  ;;  %v7180_v24 = vld [vmem:[#allocation3 + $0xc] ss:$16 sps:$4 sm:$0xff]   ;;  %v7178_v26 = vld [vmem:[#allocation3 + $0x8] ss:$16 sps:$4 sm:$0xff]  }
 0x2b5   : > { %v6461_v41 = vcombine.low %v1652_v31, %v1656_v32  ;;  %v7175_v25 = vld [vmem:[#allocation3] ss:$16 sps:$4 sm:$0xff]  }
 0x2b6   : > { %3240 = vmatpush1.bf16.msra.mxu1 %v6397_v51  ;;  %v6462_v51 = vcombine.high %v1652_v31, %v1656_v32  ;;  %v7189_v31 = vld [vmem:[#allocation3 + $0x44] ss:$16 sps:$4 sm:$0xff]   ;;  %v7192_v32 = vld [vmem:[#allocation3 + $0x4c] ss:$16 sps:$4 sm:$0xff]  }
 0x2b7   : > { %3326 = vmatpush1.bf16.msra.mxu0 %v6399_v36  ;;  %3241 = vmatprep.subr.bf16.mxu1 %v6406_v37  ;;  %v6464_v36 = vcombine.high %v1653_v33, %v1657_v34  ;;  %v1660_v37 = vld [vmem:[%s9322_s7 + $0x6d0] sm:$0xff]  ;;  %v7190_v34 = vld [vmem:[#allocation3 + $0x48] ss:$16 sps:$4 sm:$0xff]  }
 0x2b8   : > { %3327 = vmatprep.subr.bf16.mxu0 %v6408_v38  ;;  %v1664_v38 = vld [vmem:[%s9322_s7 + $0x6f0] sm:$0xff] }
 0x2b9   : > { %v6469_v56 = vcombine.low %v1660_v37, %v1664_v38  ;;  %v7187_v33 = vld [vmem:[#allocation3 + $0x40] ss:$16 sps:$4 sm:$0xff]  }
 0x2ba   : > { %3242 = vmatpush1.bf16.msra.mxu1 %v6405_v48  ;;  %v6470_v48 = vcombine.high %v1660_v37, %v1664_v38  ;;  %v7204_v37 = vld [vmem:[#allocation3 + $0x8c] ss:$16 sps:$4 sm:$0xff]   ;;  %v7199_v38 = vld [vmem:[#allocation3 + $0x80] ss:$16 sps:$4 sm:$0xff]  }
 0x2bb   : > { %3328 = vmatpush1.bf16.msra.mxu0 %v6407_v49  ;;  %3243 = vmatprep.subr.bf16.mxu1 %v6414_v52  ;;  %v6472_v49 = vcombine.high %v1661_v39, %v1665_v40  ;;  %v1668_v52 = vld [vmem:[%s9322_s7 + $0x710] sm:$0xff]  ;;  %v7202_v39 = vld [vmem:[#allocation3 + $0x88] ss:$16 sps:$4 sm:$0xff]  }
 0x2bc   : > { %3329 = vmatprep.subr.bf16.mxu0 %v6416_v53  ;;  %v1672_v53 = vld [vmem:[%s9322_s7 + $0x730] sm:$0xff] }
 0x2bd   : > { %v6477_v0 = vcombine.low %v1668_v52, %v1672_v53  ;;  %v7207_v40 = vld [vmem:[#allocation3 + $0xa4] ss:$16 sps:$4 sm:$0xff]  }
 0x2be   : > { %3244 = vmatpush1.bf16.msra.mxu1 %v6413_v58  ;;  %v6478_v58 = vcombine.high %v1668_v52, %v1672_v53  ;;  %v7216_v52 = vld [vmem:[#allocation3 + $0xcc] ss:$16 sps:$4 sm:$0xff]   ;;  %v7211_v53 = vld [vmem:[#allocation3 + $0xc0] ss:$16 sps:$4 sm:$0xff]  }
 0x2bf   : > { %3330 = vmatpush1.bf16.msra.mxu0 %v6415_v59  ;;  %3245 = vmatprep.subr.bf16.mxu1 %v6422_v60  ;;  %v6480_v59 = vcombine.high %v1669_v54, %v1673_v55  ;;  %v1676_v60 = vld [vmem:[%s9322_s7 + $0x750] sm:$0xff]  ;;  %v7214_v54 = vld [vmem:[#allocation3 + $0xc8] ss:$16 sps:$4 sm:$0xff]  }
 0x2c0   : > { %3331 = vmatprep.subr.bf16.mxu0 %v6424_v61  ;;  %v1680_v61 = vld [vmem:[%s9322_s7 + $0x770] sm:$0xff] }
 0x2c1   : > { %v6485_v8 = vcombine.low %v1676_v60, %v1680_v61  ;;  %v7219_v55 = vld [vmem:[#allocation3 + $0xe4] ss:$16 sps:$4 sm:$0xff]  }
 0x2c2   : > { %3246 = vmatpush1.bf16.msra.mxu1 %v6421_v2  ;;  %v6486_v2 = vcombine.high %v1676_v60, %v1680_v61 }
 0x2c3   : > { %3332 = vmatpush1.bf16.msra.mxu0 %v6423_v3  ;;  %3247 = vmatprep.subr.bf16.mxu1 %v6430_v4  ;;  %v6488_v3 = vcombine.high %v1677_v62, %v1681_v63  ;;  %v1684_v4 = vld [vmem:[%s9322_s7 + $0x790] sm:$0xff] }
 0x2c4   : > { %3333 = vmatprep.subr.bf16.mxu0 %v6432_v5  ;;  %v1688_v5 = vld [vmem:[%s9322_s7 + $0x7b0] sm:$0xff] }
 0x2c5   : > { %v6493_v18 = vcombine.low %v1684_v4, %v1688_v5 }
 0x2c6   : > { %3248 = vmatpush1.bf16.msra.mxu1 %v6429_v11  ;;  %v6494_v11 = vcombine.high %v1684_v4, %v1688_v5 }
 0x2c7   : > { %3334 = vmatpush1.bf16.msra.mxu0 %v6431_v13  ;;  %3249 = vmatprep.subr.bf16.mxu1 %v6438_v14  ;;  %v6496_v13 = vcombine.high %v1685_v6, %v1689_v7  ;;  %v1692_v14 = vld [vmem:[%s9322_s7 + $0x7d0] sm:$0xff] }
 0x2c8   : > { %3335 = vmatprep.subr.bf16.mxu0 %v6440_v15  ;;  %v1696_v15 = vld [vmem:[%s9322_s7 + $0x7f0] sm:$0xff] }
 0x2c9   : > { %v7225_v7 = vld [vmem:[#allocation3 + $0x104] ss:$16 sps:$4 sm:$0xff]  }
 0x2ca   : > { %3250 = vmatpush1.bf16.msra.mxu1 %v6437_v20  ;;  %v6502_v20 = vcombine.high %v1692_v14, %v1696_v15 }
 0x2cb   : > { %3336 = vmatpush1.bf16.msra.mxu0 %v6439_v50  ;;  %3251 = vmatprep.subr.bf16.mxu1 %v6446_v21  ;;  %v6504_v50 = vcombine.high %v1693_v16, %v1697_v17  ;;  %v6501_v21 = vcombine.low %v1692_v14, %v1696_v15 }
 0x2cc   : > { %3337 = vmatprep.subr.bf16.mxu0 %v6448_v22  ;;  %v6503_v22 = vcombine.low %v1693_v16, %v1697_v17  ;;  %v7223_v17 = vld [vmem:[#allocation3 + $0x100] ss:$16 sps:$4 sm:$0xff]  }
 0x2ce   : > { %3252 = vmatpush1.bf16.msra.mxu1 %v6445_v27  ;;  %v7183_v27 = vld [vmem:[#allocation3 + $0x24] ss:$16 sps:$4 sm:$0xff]  }
 0x2cf   : > { %3338 = vmatpush1.bf16.msra.mxu0 %v6447_v28  ;;  %3253 = vmatprep.subr.bf16.mxu1 %v6454_v29  ;;  %v7186_v28 = vld [vmem:[#allocation3 + $0x2c] ss:$16 sps:$4 sm:$0xff]   ;;  %v7181_v29 = vld [vmem:[#allocation3 + $0x20] ss:$16 sps:$4 sm:$0xff]  }
 0x2d0   : > { %3339 = vmatprep.subr.bf16.mxu0 %v6456_v30  ;;  %v7184_v30 = vld [vmem:[#allocation3 + $0x28] ss:$16 sps:$4 sm:$0xff]  }
 0x2d2   : > { %3254 = vmatpush1.bf16.msra.mxu1 %v6453_v44  ;;  %v7195_v44 = vld [vmem:[#allocation3 + $0x64] ss:$16 sps:$4 sm:$0xff]  }
 0x2d3   : > { %3340 = vmatpush1.bf16.msra.mxu0 %v6455_v35  ;;  %3255 = vmatprep.subr.bf16.mxu1 %v6462_v51  ;;  %v7198_v35 = vld [vmem:[#allocation3 + $0x6c] ss:$16 sps:$4 sm:$0xff]   ;;  %v7193_v51 = vld [vmem:[#allocation3 + $0x60] ss:$16 sps:$4 sm:$0xff]  }
 0x2d4   : > { %3341 = vmatprep.subr.bf16.mxu0 %v6464_v36  ;;  %v7201_v36 = vld [vmem:[#allocation3 + $0x84] ss:$16 sps:$4 sm:$0xff]  }
 0x2d6   : > { %3256 = vmatpush1.bf16.msra.mxu1 %v6461_v41  ;;  %v7210_v41 = vld [vmem:[#allocation3 + $0xac] ss:$16 sps:$4 sm:$0xff]  }
 0x2d7   : > { %3342 = vmatpush1.bf16.msra.mxu0 %v6463_v47  ;;  %3257 = vmatprep.subr.bf16.mxu1 %v6470_v48  ;;  %v7205_v47 = vld [vmem:[#allocation3 + $0xa0] ss:$16 sps:$4 sm:$0xff]   ;;  %v7208_v48 = vld [vmem:[#allocation3 + $0xa8] ss:$16 sps:$4 sm:$0xff]  }
 0x2d8   : > { %3343 = vmatprep.subr.bf16.mxu0 %v6472_v49  ;;  %v7213_v49 = vld [vmem:[#allocation3 + $0xc4] ss:$16 sps:$4 sm:$0xff]  }
 0x2da   : > { %3258 = vmatpush1.bf16.msra.mxu1 %v6469_v56  ;;  %v7222_v56 = vld [vmem:[#allocation3 + $0xec] ss:$16 sps:$4 sm:$0xff]  }
 0x2db   : > { %3344 = vmatpush1.bf16.msra.mxu0 %v6471_v57  ;;  %3259 = vmatprep.subr.bf16.mxu1 %v6478_v58  ;;  %v7217_v57 = vld [vmem:[#allocation3 + $0xe0] ss:$16 sps:$4 sm:$0xff]   ;;  %v7220_v58 = vld [vmem:[#allocation3 + $0xe8] ss:$16 sps:$4 sm:$0xff]  }
 0x2dc   : > { %3345 = vmatprep.subr.bf16.mxu0 %v6480_v59  ;;  %v9004_v59 = vld [vmem:[%s9323_s8] sm:$0xff] }
 0x2dd   : > { %v1703_v60 = vrot.slane %v9004_v59, %v8196_v43  ;;  %v1711_v61 = vrot.slane %v9004_v59, %v8401_v10  ;;  %v1707_v62 = vrot.slane %v9004_v59, %v8202_v45 }
 0x2de   : > { %3260 = vmatpush1.bf16.msra.mxu1 %v6477_v0 }
 0x2df   : > { %3346 = vmatpush1.bf16.msra.mxu0 %v6479_v1  ;;  %3261 = vmatprep.subr.bf16.mxu1 %v6486_v2  ;;  %v1715_v1 = vrot.slane %v9004_v59, %v8407_v12 }
 0x2e0   : > { %3347 = vmatprep.subr.bf16.mxu0 %v6488_v3 }
 0x2e2   : > { %3262 = vmatpush1.bf16.msra.mxu1 %v6485_v8  ;;  %v7228_v8 = vld [vmem:[#allocation3 + $0x10c] ss:$16 sps:$4 sm:$0xff]  }
 0x2e3   : > { %3348 = vmatpush1.bf16.msra.mxu0 %v6487_v9  ;;  %3263 = vmatprep.subr.bf16.mxu1 %v6494_v11 }
 0x2e4   : > { %3349 = vmatprep.subr.bf16.mxu0 %v6496_v13 }
 0x2e6   : > { %3264 = vmatpush1.bf16.msra.mxu1 %v6493_v18  ;;  %v7226_v18 = vld [vmem:[#allocation3 + $0x108] ss:$16 sps:$4 sm:$0xff]  }
 0x2e7   : > { %3350 = vmatpush1.bf16.msra.mxu0 %v6495_v19  ;;  %3265 = vmatprep.subr.bf16.mxu1 %v6502_v20 }
 0x2e8   : > { %3351 = vmatprep.subr.bf16.mxu0 %v6504_v50 }
 0x2ea   : > { %3266 = vmatpush1.bf16.msra.mxu1 %v6501_v21 }
 0x2eb   : > { %3352 = vmatpush1.bf16.msra.mxu0 %v6503_v22  ;;  %5092 = vmatprep.subr.bf16.mxu1 %v7177_v23 }
 0x2ec   : > { %5256 = vmatprep.subr.bf16.mxu0 %v7180_v24 }
 0x2ed   : > { %3268 = vmatmul.mubr.bf16.vlgmr.msra.gmra.mrb[12].mxu1 %v8418_v46 }
 0x2ee   : > { %3354 = vmatmul.mubr.bf16.vlgmr.msra.gmra.mrb[12].mxu0 %v8418_v46  ;;  %5093 = vmatpush1.bf16.msra.mxu1 %v7175_v25  ;;  %v7196_v46 = vld [vmem:[#allocation3 + $0x68] ss:$16 sps:$4 sm:$0xff]   ;;  %v7231_v25 = vld [vmem:[#allocation3 + $0x124] ss:$16 sps:$4 sm:$0xff]  }
 0x2ef   : > { %5257 = vmatpush1.bf16.msra.mxu0 %v7178_v26  ;;  %5094 = vmatprep.subr.bf16.mxu1 %v7183_v27  ;;  %v7234_v26 = vld [vmem:[#allocation3 + $0x12c] ss:$16 sps:$4 sm:$0xff]  }
 0x2f0   : > { %5258 = vmatprep.subr.bf16.mxu0 %v7186_v28 }
 0x2f2   : > { %5095 = vmatpush1.bf16.msra.mxu1 %v7181_v29  ;;  %v7229_v29 = vld [vmem:[#allocation3 + $0x120] ss:$16 sps:$4 sm:$0xff]  }
 0x2f3   : > { %5259 = vmatpush1.bf16.msra.mxu0 %v7184_v30  ;;  %5096 = vmatprep.subr.bf16.mxu1 %v7189_v31  ;;  %v7232_v30 = vld [vmem:[#allocation3 + $0x128] ss:$16 sps:$4 sm:$0xff]  }
 0x2f4   : > { %5260 = vmatprep.subr.bf16.mxu0 %v7192_v32 }
 0x2f6   : > { %5097 = vmatpush1.bf16.msra.mxu1 %v7187_v33 }
 0x2f7   : > { %5261 = vmatpush1.bf16.msra.mxu0 %v7190_v34  ;;  %5098 = vmatprep.subr.bf16.mxu1 %v7195_v44 }
 0x2f8   : > { %5262 = vmatprep.subr.bf16.mxu0 %v7198_v35  ;;  %v7724_v35 = vmov 1966171168  }
 0x2fa   : > { %5099 = vmatpush1.bf16.msra.mxu1 %v7193_v51  ;;  %v3434_v51 = vunpack.c.l.s4 %v7724_v35 }
 0x2fb   : > { %5263 = vmatpush1.bf16.msra.mxu0 %v7196_v46  ;;  %5100 = vmatprep.subr.bf16.mxu1 %v7201_v36  ;;  %v7237_v36 = vld [vmem:[#allocation3 + $0x144] ss:$16 sps:$4 sm:$0xff]  }
 0x2fc   : > { %5264 = vmatprep.subr.bf16.mxu0 %v7204_v37  ;;  %v7240_v37 = vld [vmem:[#allocation3 + $0x14c] ss:$16 sps:$4 sm:$0xff]  }
 0x2fe   : > { %5101 = vmatpush1.bf16.msra.mxu1 %v7199_v38 }
 0x2ff   : > { %5265 = vmatpush1.bf16.msra.mxu0 %v7202_v39  ;;  %5102 = vmatprep.subr.bf16.mxu1 %v7207_v40  ;;  %v7235_v40 = vld [vmem:[#allocation3 + $0x140] ss:$16 sps:$4 sm:$0xff]  }
 0x300   : > { %5266 = vmatprep.subr.bf16.mxu0 %v7210_v41  ;;  %v7238_v41 = vld [vmem:[#allocation3 + $0x148] ss:$16 sps:$4 sm:$0xff]  }
 0x302   : > { %5103 = vmatpush1.bf16.msra.mxu1 %v7205_v47 }
 0x303   : > { %5267 = vmatpush1.bf16.msra.mxu0 %v7208_v48  ;;  %5104 = vmatprep.subr.bf16.mxu1 %v7213_v49 }
 0x304   : > { %5268 = vmatprep.subr.bf16.mxu0 %v7216_v52 }
 0x306   : > { %5105 = vmatpush1.bf16.msra.mxu1 %v7211_v53 }
 0x307   : > { %5269 = vmatpush1.bf16.msra.mxu0 %v7214_v54  ;;  %5106 = vmatprep.subr.bf16.mxu1 %v7219_v55  ;;  %v3435_v54 = vunpack.c.0.s8 %v3434_v51 }
 0x308   : > { %5270 = vmatprep.subr.bf16.mxu0 %v7222_v56  ;;  %v7243_v56 = vld [vmem:[#allocation3 + $0x164] ss:$16 sps:$4 sm:$0xff]  }
 0x30a   : > { %5107 = vmatpush1.bf16.msra.mxu1 %v7217_v57  ;;  %v7246_v57 = vld [vmem:[#allocation3 + $0x16c] ss:$16 sps:$4 sm:$0xff]  }
 0x30b   : > { %5271 = vmatpush1.bf16.msra.mxu0 %v7220_v58  ;;  %5108 = vmatprep.subr.bf16.mxu1 %v7225_v7  ;;  %v7252_v7 = vld [vmem:[#allocation3 + $0x18c] ss:$16 sps:$4 sm:$0xff]  }
 0x30c   : > { %5272 = vmatprep.subr.bf16.mxu0 %v7228_v8  ;;  %v7247_v8 = vld [vmem:[#allocation3 + $0x180] ss:$16 sps:$4 sm:$0xff]  }
 0x30e   : > { %5109 = vmatpush1.bf16.msra.mxu1 %v7223_v17  ;;  %v7258_v17 = vld [vmem:[#allocation3 + $0x1ac] ss:$16 sps:$4 sm:$0xff]  }
 0x30f   : > { %5273 = vmatpush1.bf16.msra.mxu0 %v7226_v18  ;;  %5110 = vmatprep.subr.bf16.mxu1 %v7231_v25  ;;  %v7253_v18 = vld [vmem:[#allocation3 + $0x1a0] ss:$16 sps:$4 sm:$0xff]   ;;  %v7267_v25 = vld [vmem:[#allocation3 + $0x1e4] ss:$16 sps:$4 sm:$0xff]  }
 0x310   : > { %5274 = vmatprep.subr.bf16.mxu0 %v7234_v26  ;;  %v7268_v26 = vld [vmem:[#allocation3 + $0x1e8] ss:$16 sps:$4 sm:$0xff]  }
 0x312   : > { %5111 = vmatpush1.bf16.msra.mxu1 %v7229_v29  ;;  %v7276_v29 = vld [vmem:[#allocation3 + $0x20c] ss:$16 sps:$4 sm:$0xff]  }
 0x313   : > { %5275 = vmatpush1.bf16.msra.mxu0 %v7232_v30  ;;  %5112 = vmatprep.subr.bf16.mxu1 %v7237_v36  ;;  %v1718_v30 = vsub.s32 4, %v8193_v42 }
 0x314   : > { %5276 = vmatprep.subr.bf16.mxu0 %v7240_v37 }
 0x316   : > { %5113 = vmatpush1.bf16.msra.mxu1 %v7235_v40 }
 0x317   : > { %5277 = vmatpush1.bf16.msra.mxu0 %v7238_v41  ;;  %5114 = vmatprep.subr.bf16.mxu1 %v7243_v56 }
 0x318   : > { %5278 = vmatprep.subr.bf16.mxu0 %v7246_v57 }
 0x340   : > { %v3097_v63 = vpop.f32.mrb[8].mxu1  ;;  %v3183_v0 = vpop.f32.mrb[8].mxu0 }
 0x341   : > { %v3099_v2 = vpop.f32.mrb[9].mxu1  ;;  %v3185_v3 = vpop.f32.mrb[9].mxu0  ;;  %v6922_v4 = vadd.f32 %v3097_v63, %v1703_v60  ;;  %v6926_v9 = vadd.f32 %v3183_v0, %v1711_v61 }
 0x342   : > { %v3101_v5 = vpop.f32.mrb[10].mxu1  ;;  %v3187_v6 = vpop.f32.mrb[10].mxu0  ;;  %v6923_v11 = vadd.f32 %v3099_v2, %v1707_v62  ;;  %v6927_v19 = vadd.f32 %v3185_v3, %v1715_v1 }
 0x343   : > { %v6924_v13 = vadd.f32 %v3101_v5, %v1703_v60  ;;  %v6928_v14 = vadd.f32 %v3187_v6, %v1711_v61  ;;  %v3103_v15 = vpop.f32.mrb[11].mxu1  ;;  %v3189_v16 = vpop.f32.mrb[11].mxu0  ;;  %v7241_v61 = vld [vmem:[#allocation3 + $0x160] ss:$16 sps:$4 sm:$0xff]   ;;  %v7249_v6 = vld [vmem:[#allocation3 + $0x184] ss:$16 sps:$4 sm:$0xff]  }
 0x344   : > { %v6925_v20 = vadd.f32 %v3103_v15, %v1707_v62  ;;  %v6929_v50 = vadd.f32 %v3189_v16, %v1715_v1  ;;  %v7244_v62 = vld [vmem:[#allocation3 + $0x168] ss:$16 sps:$4 sm:$0xff]   ;;  %5115 = vmatpush1.bf16.msra.mxu1 %v7241_v61  ;;  %v7255_v16 = vld [vmem:[#allocation3 + $0x1a4] ss:$16 sps:$4 sm:$0xff]  }
 0x345   : > { %v3365_v21 = vmax.f32 %v6922_v4, %v6924_v13  ;;  %v3379_v22 = vmax.f32 %v6926_v9, %v6928_v14  ;;  %5279 = vmatpush1.bf16.msra.mxu0 %v7244_v62  ;;  %v9015_v4 = vsub.s32 %v3435_v54, %v8193_v42  ;;  %v7250_v9 = vld [vmem:[#allocation3 + $0x188] ss:$16 sps:$4 sm:$0xff]   ;;  %5116 = vmatprep.subr.bf16.mxu1 %v7249_v6 }
 0x346   : > { %v3372_v23 = vmax.f32 %v6923_v11, %v6925_v20  ;;  %v3386_v24 = vmax.f32 %v6927_v19, %v6929_v50  ;;  %5280 = vmatprep.subr.bf16.mxu0 %v7252_v7  ;;  %v7256_v19 = vld [vmem:[#allocation3 + $0x1a8] ss:$16 sps:$4 sm:$0xff]   ;;  %v7261_v50 = vld [vmem:[#allocation3 + $0x1c4] ss:$16 sps:$4 sm:$0xff]  }
 0x347   : > { %v3366_v27 = vrot.slane %v3365_v21, 4  ;;  %v3380_v28 = vrot.slane %v3379_v22, 4 }
 0x348   : > { %v3373_v31 = vrot.slane %v3372_v23, 4  ;;  %v3387_v32 = vrot.slane %v3386_v24, 4  ;;  %5117 = vmatpush1.bf16.msra.mxu1 %v7247_v8 }
 0x349   : > { %v3367_v33 = vmax.f32 %v3365_v21, %v3366_v27  ;;  %v3381_v34 = vmax.f32 %v3379_v22, %v3380_v28  ;;  %5281 = vmatpush1.bf16.msra.mxu0 %v7250_v9  ;;  %5118 = vmatprep.subr.bf16.mxu1 %v7255_v16  ;;  %v7264_v21 = vld [vmem:[#allocation3 + $0x1cc] ss:$16 sps:$4 sm:$0xff]   ;;  %v7259_v22 = vld [vmem:[#allocation3 + $0x1c0] ss:$16 sps:$4 sm:$0xff]   ;;  %v7273_v28 = vld [vmem:[#allocation3 + $0x204] ss:$16 sps:$4 sm:$0xff]  }
 0x34a   : > { %v3374_v44 = vmax.f32 %v3372_v23, %v3373_v31  ;;  %v3388_v46 = vmax.f32 %v3386_v24, %v3387_v32  ;;  %5282 = vmatprep.subr.bf16.mxu0 %v7258_v17  ;;  %v7262_v23 = vld [vmem:[#allocation3 + $0x1c8] ss:$16 sps:$4 sm:$0xff]   ;;  %v7265_v24 = vld [vmem:[#allocation3 + $0x1e0] ss:$16 sps:$4 sm:$0xff]   ;;  %v7270_v27 = vld [vmem:[#allocation3 + $0x1ec] ss:$16 sps:$4 sm:$0xff]  }
 0x34b   : > { %v3368_v38 = vrot.slane %v3367_v33, 2  ;;  %v3382_v39 = vrot.slane %v3381_v34, 2  ;;  %v1726_v31 = vsub.s32 6, %v8193_v42  ;;  %v1722_v32 = vsub.s32 5, %v8193_v42 }
 0x34c   : > { %v3375_v47 = vrot.slane %v3374_v44, 2  ;;  %v3389_v48 = vrot.slane %v3388_v46, 2  ;;  %5119 = vmatpush1.bf16.msra.mxu1 %v7253_v18 }
 0x34d   : > { %v3369_v49 = vmax.f32 %v3367_v33, %v3368_v38  ;;  %v3383_v52 = vmax.f32 %v3381_v34, %v3382_v39  ;;  %5283 = vmatpush1.bf16.msra.mxu0 %v7256_v19  ;;  %5120 = vmatprep.subr.bf16.mxu1 %v7261_v50  ;;  %v1730_v33 = vsub.s32 7, %v8193_v42  ;;  %v1719_v34 = vrot.slane %v9004_v59, %v1718_v30  ;;  %v7562_v42 = vld [vmem:[%s9326_s11 + $0x80] sm:$0xff]  }
 0x34e   : > { %v3376_v53 = vmax.f32 %v3374_v44, %v3375_v47  ;;  %v3390_v55 = vmax.f32 %v3388_v46, %v3389_v48  ;;  %5284 = vmatprep.subr.bf16.mxu0 %v7264_v21  ;;  %v1727_v35 = vrot.slane %v9004_v59, %v1726_v31  ;;  %v1723_v51 = vrot.slane %v9004_v59, %v1722_v32 }
 0x34f   : > { %v3370_v58 = vrot.slane %v3369_v49, 1  ;;  %v3384_v60 = vrot.slane %v3383_v52, 1  ;;  %v1731_v37 = vrot.slane %v9004_v59, %v1730_v33 }
 0x350   : > { %v3377_v63 = vrot.slane %v3376_v53, 1  ;;  %v3391_v0 = vrot.slane %v3390_v55, 1  ;;  %5121 = vmatpush1.bf16.msra.mxu1 %v7259_v22 }
 0x351   : > { %v3371_v1 = vmax.f32 %v3369_v49, %v3370_v58  ;;  %v3385_v2 = vmax.f32 %v3383_v52, %v3384_v60  ;;  %5285 = vmatpush1.bf16.msra.mxu0 %v7262_v23  ;;  %5122 = vmatprep.subr.bf16.mxu1 %v7267_v25 }
 0x352   : > { %v3378_v3 = vmax.f32 %v3376_v53, %v3377_v63  ;;  %v3392_v5 = vmax.f32 %v3390_v55, %v3391_v0  ;;  %5286 = vmatprep.subr.bf16.mxu0 %v7270_v27 }
 0x354   : > { %v3429_v11 = vcombine.low %v3371_v1, %v3378_v3  ;;  %v3430_v13 = vcombine.low %v3385_v2, %v3392_v5  ;;  %5123 = vmatpush1.bf16.msra.mxu1 %v7265_v24 }
 0x355   : > { %5287 = vmatpush1.bf16.msra.mxu0 %v7268_v26  ;;  %5133 = vmatprep.subr.bf16.mxu1 %v7273_v28 }
 0x356   : > { %v9018_v14 = vrot.slane %v3429_v11, %v9015_v4  ;;  %v9021_v15 = vrot.slane %v3430_v13, %v9015_v4  ;;  %5297 = vmatprep.subr.bf16.mxu0 %v7276_v29 }
 0x358   : > { %v3461_v20 = vcombine.low %v9018_v14, %v9021_v15  ;;  %v7279_v14 = vld [vmem:[#allocation3 + $0x224] ss:$16 sps:$4 sm:$0xff]   ;;  %v7282_v15 = vld [vmem:[#allocation3 + $0x22c] ss:$16 sps:$4 sm:$0xff]  }
 0x3c0   : > { %v3269_v44 = vpop.f32.mrb[12].mxu1 }
 0x3c1   : > { %v3355_v46 = vpop.f32.mrb[12].mxu0  ;;  %v3271_v36 = vpop.f32.mrb[13].mxu1  ;;  %v6930_v40 = vadd.f32 %v3269_v44, %v1719_v34 }
 0x3c2   : > { %v3357_v38 = vpop.f32.mrb[13].mxu0  ;;  %v3273_v39 = vpop.f32.mrb[14].mxu1  ;;  %v6934_v49 = vadd.f32 %v3355_v46, %v1727_v35  ;;  %v6931_v52 = vadd.f32 %v3271_v36, %v1723_v51 }
 0x3c3   : > { %v6932_v41 = vadd.f32 %v3273_v39, %v1719_v34  ;;  %v3359_v47 = vpop.f32.mrb[14].mxu0  ;;  %v3275_v48 = vpop.f32.mrb[15].mxu1  ;;  %v6935_v56 = vadd.f32 %v3357_v38, %v1731_v37 }
 0x3c4   : > { %v6936_v53 = vadd.f32 %v3359_v47, %v1727_v35  ;;  %v6933_v54 = vadd.f32 %v3275_v48, %v1723_v51  ;;  %v3361_v55 = vpop.f32.mrb[15].mxu0  ;;  %v3469_v35 = vrot.slane %v3461_v20, %v9015_v4  ;;  %v7277_v20 = vld [vmem:[#allocation3 + $0x220] ss:$16 sps:$4 sm:$0xff]   ;;  %v7280_v48 = vld [vmem:[#allocation3 + $0x228] ss:$16 sps:$4 sm:$0xff]  }
 0x3c5   : > { %v3393_v57 = vmax.f32 %v6930_v40, %v6932_v41  ;;  %v6937_v58 = vadd.f32 %v3361_v55, %v1731_v37  ;;  %v7271_v40 = vld [vmem:[#allocation3 + $0x200] ss:$16 sps:$4 sm:$0xff]   ;;  %v7274_v41 = vld [vmem:[#allocation3 + $0x208] ss:$16 sps:$4 sm:$0xff]   ;;  %v7291_v55 = vld [vmem:[#allocation3 + $0x264] ss:$16 sps:$4 sm:$0xff]  }
 0x3c6   : > { %v3407_v60 = vmax.f32 %v6934_v49, %v6936_v53  ;;  %v3400_v61 = vmax.f32 %v6931_v52, %v6933_v54  ;;  %v7285_v49 = vld [vmem:[#allocation3 + $0x244] ss:$16 sps:$4 sm:$0xff]   ;;  %v7288_v52 = vld [vmem:[#allocation3 + $0x24c] ss:$16 sps:$4 sm:$0xff]   ;;  %v7283_v53 = vld [vmem:[#allocation3 + $0x240] ss:$16 sps:$4 sm:$0xff]  }
 0x3c7   : > { %v3394_v62 = vrot.slane %v3393_v57, 4  ;;  %v3414_v63 = vmax.f32 %v6935_v56, %v6937_v58  ;;  %v7286_v54 = vld [vmem:[#allocation3 + $0x248] ss:$16 sps:$4 sm:$0xff]   ;;  %v7294_v56 = vld [vmem:[#allocation3 + $0x26c] ss:$16 sps:$4 sm:$0xff]  }
 0x3c8   : > { %v3408_v0 = vrot.slane %v3407_v60, 4  ;;  %v3401_v59 = vrot.slane %v3400_v61, 4  ;;  %v7292_v58 = vld [vmem:[#allocation3 + $0x268] ss:$16 sps:$4 sm:$0xff]  }
 0x3c9   : > { %v3395_v1 = vmax.f32 %v3393_v57, %v3394_v62  ;;  %v3415_v2 = vrot.slane %v3414_v63, 4  ;;  %v7289_v57 = vld [vmem:[#allocation3 + $0x260] ss:$16 sps:$4 sm:$0xff]  }
 0x3ca   : > { %v3409_v3 = vmax.f32 %v3407_v60, %v3408_v0  ;;  %v3402_v5 = vmax.f32 %v3400_v61, %v3401_v59  ;;  %v7297_v60 = vld [vmem:[#allocation3 + $0x284] ss:$16 sps:$4 sm:$0xff]   ;;  %v7300_v61 = vld [vmem:[#allocation3 + $0x28c] ss:$16 sps:$4 sm:$0xff]   ;;  %v7295_v62 = vld [vmem:[#allocation3 + $0x280] ss:$16 sps:$4 sm:$0xff]  }
 0x3cb   : > { %v3396_v6 = vrot.slane %v3395_v1, 2  ;;  %v3416_v7 = vmax.f32 %v3414_v63, %v3415_v2  ;;  %v7298_v63 = vld [vmem:[#allocation3 + $0x288] ss:$16 sps:$4 sm:$0xff]   ;;  %v7303_v0 = vld [vmem:[#allocation3 + $0x2a4] ss:$16 sps:$4 sm:$0xff]  }
 0x3cc   : > { %v3410_v8 = vrot.slane %v3409_v3, 2  ;;  %v3403_v9 = vrot.slane %v3402_v5, 2  ;;  %v7306_v59 = vld [vmem:[#allocation3 + $0x2ac] ss:$16 sps:$4 sm:$0xff]   ;;  %v7304_v2 = vld [vmem:[#allocation3 + $0x2a8] ss:$16 sps:$4 sm:$0xff]  }
 0x3cd   : > { %v3397_v11 = vmax.f32 %v3395_v1, %v3396_v6  ;;  %v3417_v13 = vrot.slane %v3416_v7, 2  ;;  %v7301_v1 = vld [vmem:[#allocation3 + $0x2a0] ss:$16 sps:$4 sm:$0xff]  }
 0x3ce   : > { %v3411_v16 = vmax.f32 %v3409_v3, %v3410_v8  ;;  %v3404_v17 = vmax.f32 %v3402_v5, %v3403_v9  ;;  %v7309_v3 = vld [vmem:[#allocation3 + $0x2c4] ss:$16 sps:$4 sm:$0xff]   ;;  %v7312_v5 = vld [vmem:[#allocation3 + $0x2cc] ss:$16 sps:$4 sm:$0xff]   ;;  %v7307_v6 = vld [vmem:[#allocation3 + $0x2c0] ss:$16 sps:$4 sm:$0xff]  }
 0x3cf   : > { %v3398_v18 = vrot.slane %v3397_v11, 1  ;;  %v3418_v19 = vmax.f32 %v3416_v7, %v3417_v13  ;;  %v7310_v7 = vld [vmem:[#allocation3 + $0x2c8] ss:$16 sps:$4 sm:$0xff]   ;;  %v7315_v8 = vld [vmem:[#allocation3 + $0x2e4] ss:$16 sps:$4 sm:$0xff]  }
 0x3d0   : > { %v3412_v50 = vrot.slane %v3411_v16, 1  ;;  %v3405_v21 = vrot.slane %v3404_v17, 1  ;;  %v7318_v9 = vld [vmem:[#allocation3 + $0x2ec] ss:$16 sps:$4 sm:$0xff]   ;;  %v7316_v13 = vld [vmem:[#allocation3 + $0x2e8] ss:$16 sps:$4 sm:$0xff]  }
 0x3d1   : > { %v3399_v22 = vmax.f32 %v3397_v11, %v3398_v18  ;;  %v3419_v23 = vrot.slane %v3418_v19, 1  ;;  %v7313_v11 = vld [vmem:[#allocation3 + $0x2e0] ss:$16 sps:$4 sm:$0xff]  }
 0x3d2   : > { %v3413_v24 = vmax.f32 %v3411_v16, %v3412_v50  ;;  %v3406_v25 = vmax.f32 %v3404_v17, %v3405_v21  ;;  %v7321_v16 = vld [vmem:[#allocation3 + $0x304] ss:$16 sps:$4 sm:$0xff]   ;;  %v7324_v17 = vld [vmem:[#allocation3 + $0x30c] ss:$16 sps:$4 sm:$0xff]   ;;  %v7319_v18 = vld [vmem:[#allocation3 + $0x300] ss:$16 sps:$4 sm:$0xff]  }
 0x3d3   : > { %v3420_v26 = vmax.f32 %v3418_v19, %v3419_v23  ;;  %v7322_v19 = vld [vmem:[#allocation3 + $0x308] ss:$16 sps:$4 sm:$0xff]   ;;  %v7327_v50 = vld [vmem:[#allocation3 + $0x324] ss:$16 sps:$4 sm:$0xff]   ;;  %v7330_v21 = vld [vmem:[#allocation3 + $0x32c] ss:$16 sps:$4 sm:$0xff]  }
 0x3d4   : > { %v3431_v27 = vcombine.low %v3399_v22, %v3406_v25  ;;  %v7325_v22 = vld [vmem:[#allocation3 + $0x320] ss:$16 sps:$4 sm:$0xff]   ;;  %v7328_v23 = vld [vmem:[#allocation3 + $0x328] ss:$16 sps:$4 sm:$0xff]   ;;  %v7336_v25 = vld [vmem:[#allocation3 + $0x34c] ss:$16 sps:$4 sm:$0xff]  }
 0x3d5   : > { %v3432_v28 = vcombine.low %v3413_v24, %v3420_v26  ;;  %v7333_v24 = vld [vmem:[#allocation3 + $0x344] ss:$16 sps:$4 sm:$0xff]   ;;  %v7331_v26 = vld [vmem:[#allocation3 + $0x340] ss:$16 sps:$4 sm:$0xff]  }
 0x3d6   : > { %v3453_v29 = vrot.slane %v3431_v27, %v9015_v4  ;;  %v7334_v27 = vld [vmem:[#allocation3 + $0x348] ss:$16 sps:$4 sm:$0xff]  }
 0x3d7   : > { %v3460_v34 = vrot.slane %v3432_v28, %v9015_v4  ;;  %v7339_v28 = vld [vmem:[#allocation3 + $0x364] ss:$16 sps:$4 sm:$0xff]  }
 0x3d9   : > { %v3462_v44 = vcombine.low %v3453_v29, %v3460_v34  ;;  %v7342_v29 = vld [vmem:[#allocation3 + $0x36c] ss:$16 sps:$4 sm:$0xff]   ;;  %v7337_v34 = vld [vmem:[#allocation3 + $0x360] ss:$16 sps:$4 sm:$0xff]  }
 0x3db   : > { %v3476_v51 = vrot.slane %v3462_v44, %v9015_v4  ;;  %v7340_v44 = vld [vmem:[#allocation3 + $0x368] ss:$16 sps:$4 sm:$0xff]  }
 0x3dd   : > { %v9048_v46 = vcombine.low %v3469_v35, %v3476_v51  ;;  %v7345_v35 = vld [vmem:[#allocation3 + $0x384] ss:$16 sps:$4 sm:$0xff]   ;;  %v7348_v51 = vld [vmem:[#allocation3 + $0x38c] ss:$16 sps:$4 sm:$0xff]  }
 0x3df   : > { %v3493_v36 = vrot.slane %v9048_v46, %v8202_v45  ;;  %v3489_v37 = vrot.slane %v9048_v46, %v8196_v43  ;;  %v3501_v38 = vrot.slane %v9048_v46, %v8407_v12 }
 0x3e1   : > { %v3527_v39 = vpack.c.bf16 %v3493_v36, %v3493_v36  ;;  %v3526_v47 = vpack.c.bf16 %v3489_v37, %v3489_v37  ;;  %v3529_v4 = vpack.c.bf16 %v3501_v38, %v3501_v38  ;;  %v7343_v36 = vld [vmem:[#allocation3 + $0x380] ss:$16 sps:$4 sm:$0xff]   ;;  %v7346_v37 = vld [vmem:[#allocation3 + $0x388] ss:$16 sps:$4 sm:$0xff]   ;;  %v7351_v38 = vld [vmem:[#allocation3 + $0x3a4] ss:$16 sps:$4 sm:$0xff]  }
 0x3e3   : > { %5124 = vmatprep.mubr.bf16.mxu1 %v3527_v39  ;;  %5288 = vmatprep.mubr.bf16.mxu0 %v3527_v39  ;;  %v7354_v39 = vld [vmem:[#allocation3 + $0x3ac] ss:$16 sps:$4 sm:$0xff]  }
 0x3e4   : > { %5125 = vmatmul.mubr.bf16.vlgmr.msra.gmra.mrb[16].mxu1 %v3526_v47  ;;  %5289 = vmatmul.mubr.bf16.vlgmr.msra.gmra.mrb[16].mxu0 %v3526_v47  ;;  %v7357_v47 = vld [vmem:[#allocation3 + $0x3c4] ss:$16 sps:$4 sm:$0xff]  }
 0x3e5   : > { %5134 = vmatpush1.bf16.msra.mxu1 %v7271_v40  ;;  %5298 = vmatpush1.bf16.msra.mxu0 %v7274_v41  ;;  %v7349_v40 = vld [vmem:[#allocation3 + $0x3a0] ss:$16 sps:$4 sm:$0xff]   ;;  %v7352_v41 = vld [vmem:[#allocation3 + $0x3a8] ss:$16 sps:$4 sm:$0xff]  }
 0x3e6   : > { %5165 = vmatprep.mubr.bf16.mxu1 %v3529_v4  ;;  %5329 = vmatprep.mubr.bf16.mxu0 %v3529_v4  ;;  %v7358_v4 = vld [vmem:[#allocation3 + $0x3c8] ss:$16 sps:$4 sm:$0xff]  }
 0x3e7   : > { %5135 = vmatprep.subr.bf16.mxu1 %v7279_v14  ;;  %5299 = vmatprep.subr.bf16.mxu0 %v7282_v15  ;;  %v7360_v14 = vld [vmem:[#allocation3 + $0x3cc] ss:$16 sps:$4 sm:$0xff]   ;;  %v7355_v15 = vld [vmem:[#allocation3 + $0x3c0] ss:$16 sps:$4 sm:$0xff]  }
 0x3e9   : > { %5136 = vmatpush1.bf16.msra.mxu1 %v7277_v20  ;;  %5300 = vmatpush1.bf16.msra.mxu0 %v7280_v48  ;;  %v7363_v20 = vld [vmem:[#allocation3 + $0x3e4] ss:$16 sps:$4 sm:$0xff]   ;;  %v7366_v48 = vld [vmem:[#allocation3 + $0x3ec] ss:$16 sps:$4 sm:$0xff]  }
 0x3ea   : > { %5137 = vmatprep.subr.bf16.mxu1 %v7285_v49  ;;  %5301 = vmatprep.subr.bf16.mxu0 %v7288_v52  ;;  %v7361_v49 = vld [vmem:[#allocation3 + $0x3e0] ss:$16 sps:$4 sm:$0xff]   ;;  %v7364_v52 = vld [vmem:[#allocation3 + $0x3e8] ss:$16 sps:$4 sm:$0xff]  }
 0x3ed   : > { %5138 = vmatpush1.bf16.msra.mxu1 %v7283_v53  ;;  %5302 = vmatpush1.bf16.msra.mxu0 %v7286_v54  ;;  %v3497_v53 = vrot.slane %v9048_v46, %v8401_v10  ;;  %v7369_v54 = vld [vmem:[#allocation3 + $0x404] ss:$16 sps:$4 sm:$0xff]  }
 0x3ee   : > { %5139 = vmatprep.subr.bf16.mxu1 %v7291_v55  ;;  %5303 = vmatprep.subr.bf16.mxu0 %v7294_v56  ;;  %v7372_v55 = vld [vmem:[#allocation3 + $0x40c] ss:$16 sps:$4 sm:$0xff]   ;;  %v3509_v56 = vrot.slane %v9048_v46, %v1722_v32 }
 0x3ef   : > { %v7384_v32 = vld [vmem:[#allocation3 + $0x44c] ss:$16 sps:$4 sm:$0xff]  }
 0x3f1   : > { %5140 = vmatpush1.bf16.msra.mxu1 %v7289_v57  ;;  %5304 = vmatpush1.bf16.msra.mxu0 %v7292_v58  ;;  %v7367_v57 = vld [vmem:[#allocation3 + $0x400] ss:$16 sps:$4 sm:$0xff]   ;;  %v3528_v58 = vpack.c.bf16 %v3497_v53, %v3497_v53  ;;  %v7442_v53 = vld [vmem:[#allocation3 + $0x588] ss:$16 sps:$4 sm:$0xff]  }
 0x3f2   : > { %5141 = vmatprep.subr.bf16.mxu1 %v7297_v60  ;;  %5305 = vmatprep.subr.bf16.mxu0 %v7300_v61  ;;  %v7370_v60 = vld [vmem:[#allocation3 + $0x408] ss:$16 sps:$4 sm:$0xff]   ;;  %v3531_v61 = vpack.c.bf16 %v3509_v56, %v3509_v56  ;;  %v7445_v56 = vld [vmem:[#allocation3 + $0x5a0] ss:$16 sps:$4 sm:$0xff]  }
 0x3f5   : > { %5142 = vmatpush1.bf16.msra.mxu1 %v7295_v62  ;;  %5306 = vmatpush1.bf16.msra.mxu0 %v7298_v63  ;;  %v7375_v62 = vld [vmem:[#allocation3 + $0x424] ss:$16 sps:$4 sm:$0xff]   ;;  %v7378_v63 = vld [vmem:[#allocation3 + $0x42c] ss:$16 sps:$4 sm:$0xff]  }
 0x3f6   : > { %5143 = vmatprep.subr.bf16.mxu1 %v7303_v0  ;;  %5307 = vmatprep.subr.bf16.mxu0 %v7306_v59  ;;  %v7373_v0 = vld [vmem:[#allocation3 + $0x420] ss:$16 sps:$4 sm:$0xff]   ;;  %v7376_v59 = vld [vmem:[#allocation3 + $0x428] ss:$16 sps:$4 sm:$0xff]  }
 0x3f9   : > { %5144 = vmatpush1.bf16.msra.mxu1 %v7301_v1  ;;  %5308 = vmatpush1.bf16.msra.mxu0 %v7304_v2  ;;  %v7381_v1 = vld [vmem:[#allocation3 + $0x444] ss:$16 sps:$4 sm:$0xff]   ;;  %v7379_v2 = vld [vmem:[#allocation3 + $0x440] ss:$16 sps:$4 sm:$0xff]  }
 0x3fa   : > { %5145 = vmatprep.subr.bf16.mxu1 %v7309_v3  ;;  %5309 = vmatprep.subr.bf16.mxu0 %v7312_v5  ;;  %v7382_v3 = vld [vmem:[#allocation3 + $0x448] ss:$16 sps:$4 sm:$0xff]   ;;  %v7387_v5 = vld [vmem:[#allocation3 + $0x464] ss:$16 sps:$4 sm:$0xff]  }
 0x3fd   : > { %5146 = vmatpush1.bf16.msra.mxu1 %v7307_v6  ;;  %5310 = vmatpush1.bf16.msra.mxu0 %v7310_v7  ;;  %v7390_v6 = vld [vmem:[#allocation3 + $0x46c] ss:$16 sps:$4 sm:$0xff]   ;;  %v7385_v7 = vld [vmem:[#allocation3 + $0x460] ss:$16 sps:$4 sm:$0xff]  }
 0x3fe   : > { %5147 = vmatprep.subr.bf16.mxu1 %v7315_v8  ;;  %5311 = vmatprep.subr.bf16.mxu0 %v7318_v9  ;;  %v7388_v8 = vld [vmem:[#allocation3 + $0x468] ss:$16 sps:$4 sm:$0xff]   ;;  %v7393_v9 = vld [vmem:[#allocation3 + $0x484] ss:$16 sps:$4 sm:$0xff]  }
 0x401   : > { %5148 = vmatpush1.bf16.msra.mxu1 %v7313_v11  ;;  %5312 = vmatpush1.bf16.msra.mxu0 %v7316_v13  ;;  %v7396_v11 = vld [vmem:[#allocation3 + $0x48c] ss:$16 sps:$4 sm:$0xff]   ;;  %v7391_v13 = vld [vmem:[#allocation3 + $0x480] ss:$16 sps:$4 sm:$0xff]  }
 0x402   : > { %5149 = vmatprep.subr.bf16.mxu1 %v7321_v16  ;;  %5313 = vmatprep.subr.bf16.mxu0 %v7324_v17  ;;  %v7394_v16 = vld [vmem:[#allocation3 + $0x488] ss:$16 sps:$4 sm:$0xff]   ;;  %v7399_v17 = vld [vmem:[#allocation3 + $0x4a4] ss:$16 sps:$4 sm:$0xff]  }
 0x405   : > { %5150 = vmatpush1.bf16.msra.mxu1 %v7319_v18  ;;  %5314 = vmatpush1.bf16.msra.mxu0 %v7322_v19  ;;  %v7402_v18 = vld [vmem:[#allocation3 + $0x4ac] ss:$16 sps:$4 sm:$0xff]   ;;  %v7397_v19 = vld [vmem:[#allocation3 + $0x4a0] ss:$16 sps:$4 sm:$0xff]  }
 0x406   : > { %5151 = vmatprep.subr.bf16.mxu1 %v7327_v50  ;;  %5315 = vmatprep.subr.bf16.mxu0 %v7330_v21  ;;  %v7400_v50 = vld [vmem:[#allocation3 + $0x4a8] ss:$16 sps:$4 sm:$0xff]   ;;  %v7405_v21 = vld [vmem:[#allocation3 + $0x4c4] ss:$16 sps:$4 sm:$0xff]  }
 0x409   : > { %5152 = vmatpush1.bf16.msra.mxu1 %v7325_v22  ;;  %5316 = vmatpush1.bf16.msra.mxu0 %v7328_v23  ;;  %v7408_v22 = vld [vmem:[#allocation3 + $0x4cc] ss:$16 sps:$4 sm:$0xff]   ;;  %v7403_v23 = vld [vmem:[#allocation3 + $0x4c0] ss:$16 sps:$4 sm:$0xff]  }
 0x40a   : > { %5153 = vmatprep.subr.bf16.mxu1 %v7333_v24  ;;  %5317 = vmatprep.subr.bf16.mxu0 %v7336_v25  ;;  %v7406_v24 = vld [vmem:[#allocation3 + $0x4c8] ss:$16 sps:$4 sm:$0xff]   ;;  %v7411_v25 = vld [vmem:[#allocation3 + $0x4e4] ss:$16 sps:$4 sm:$0xff]  }
 0x40d   : > { %5154 = vmatpush1.bf16.msra.mxu1 %v7331_v26  ;;  %5318 = vmatpush1.bf16.msra.mxu0 %v7334_v27  ;;  %v7414_v26 = vld [vmem:[#allocation3 + $0x4ec] ss:$16 sps:$4 sm:$0xff]   ;;  %v7409_v27 = vld [vmem:[#allocation3 + $0x4e0] ss:$16 sps:$4 sm:$0xff]  }
 0x40e   : > { %5155 = vmatprep.subr.bf16.mxu1 %v7339_v28  ;;  %5319 = vmatprep.subr.bf16.mxu0 %v7342_v29  ;;  %v7412_v28 = vld [vmem:[#allocation3 + $0x4e8] ss:$16 sps:$4 sm:$0xff]   ;;  %v7417_v29 = vld [vmem:[#allocation3 + $0x504] ss:$16 sps:$4 sm:$0xff]  }
 0x411   : > { %5156 = vmatpush1.bf16.msra.mxu1 %v7337_v34  ;;  %5320 = vmatpush1.bf16.msra.mxu0 %v7340_v44  ;;  %v7420_v34 = vld [vmem:[#allocation3 + $0x50c] ss:$16 sps:$4 sm:$0xff]   ;;  %v7415_v44 = vld [vmem:[#allocation3 + $0x500] ss:$16 sps:$4 sm:$0xff]  }
 0x412   : > { %5157 = vmatprep.subr.bf16.mxu1 %v7345_v35  ;;  %5321 = vmatprep.subr.bf16.mxu0 %v7348_v51  ;;  %v7418_v35 = vld [vmem:[#allocation3 + $0x508] ss:$16 sps:$4 sm:$0xff]   ;;  %v7423_v51 = vld [vmem:[#allocation3 + $0x524] ss:$16 sps:$4 sm:$0xff]  }
 0x415   : > { %5158 = vmatpush1.bf16.msra.mxu1 %v7343_v36  ;;  %5322 = vmatpush1.bf16.msra.mxu0 %v7346_v37  ;;  %v7426_v36 = vld [vmem:[#allocation3 + $0x52c] ss:$16 sps:$4 sm:$0xff]   ;;  %v7421_v37 = vld [vmem:[#allocation3 + $0x520] ss:$16 sps:$4 sm:$0xff]  }
 0x416   : > { %5159 = vmatprep.subr.bf16.mxu1 %v7351_v38  ;;  %5323 = vmatprep.subr.bf16.mxu0 %v7354_v39  ;;  %v7424_v38 = vld [vmem:[#allocation3 + $0x528] ss:$16 sps:$4 sm:$0xff]   ;;  %v7429_v39 = vld [vmem:[#allocation3 + $0x544] ss:$16 sps:$4 sm:$0xff]  }
 0x419   : > { %5160 = vmatpush1.bf16.msra.mxu1 %v7349_v40  ;;  %5324 = vmatpush1.bf16.msra.mxu0 %v7352_v41  ;;  %v7432_v40 = vld [vmem:[#allocation3 + $0x54c] ss:$16 sps:$4 sm:$0xff]   ;;  %v7427_v41 = vld [vmem:[#allocation3 + $0x540] ss:$16 sps:$4 sm:$0xff]  }
 0x41a   : > { %5161 = vmatprep.subr.bf16.mxu1 %v7357_v47  ;;  %5325 = vmatprep.subr.bf16.mxu0 %v7360_v14  ;;  %v7430_v47 = vld [vmem:[#allocation3 + $0x548] ss:$16 sps:$4 sm:$0xff]   ;;  %v7435_v14 = vld [vmem:[#allocation3 + $0x564] ss:$16 sps:$4 sm:$0xff]  }
 0x41d   : > { %5162 = vmatpush1.bf16.msra.mxu1 %v7355_v15  ;;  %5326 = vmatpush1.bf16.msra.mxu0 %v7358_v4  ;;  %v7438_v15 = vld [vmem:[#allocation3 + $0x56c] ss:$16 sps:$4 sm:$0xff]   ;;  %v7433_v4 = vld [vmem:[#allocation3 + $0x560] ss:$16 sps:$4 sm:$0xff]  }
 0x41e   : > { %5163 = vmatprep.subr.bf16.mxu1 %v7363_v20  ;;  %5327 = vmatprep.subr.bf16.mxu0 %v7366_v48  ;;  %v7436_v20 = vld [vmem:[#allocation3 + $0x568] ss:$16 sps:$4 sm:$0xff]   ;;  %v7441_v48 = vld [vmem:[#allocation3 + $0x584] ss:$16 sps:$4 sm:$0xff]  }
 0x421   : > { %5164 = vmatpush1.bf16.msra.mxu1 %v7361_v49  ;;  %5328 = vmatpush1.bf16.msra.mxu0 %v7364_v52  ;;  %v7444_v49 = vld [vmem:[#allocation3 + $0x58c] ss:$16 sps:$4 sm:$0xff]   ;;  %v7439_v52 = vld [vmem:[#allocation3 + $0x580] ss:$16 sps:$4 sm:$0xff]  }
 0x422   : > { %5174 = vmatprep.subr.bf16.mxu1 %v7369_v54  ;;  %5338 = vmatprep.subr.bf16.mxu0 %v7372_v55  ;;  %v7447_v54 = vld [vmem:[#allocation3 + $0x5a4] ss:$16 sps:$4 sm:$0xff]   ;;  %v7450_v55 = vld [vmem:[#allocation3 + $0x5ac] ss:$16 sps:$4 sm:$0xff]  }
 0x424   : > { %5166 = vmatmul.mubr.bf16.vlgmr.msra.gmra.mrb[16].mxu1 %v3528_v58  ;;  %5330 = vmatmul.mubr.bf16.vlgmr.msra.gmra.mrb[16].mxu0 %v3528_v58  ;;  %v7453_v58 = vld [vmem:[#allocation3 + $0x5c4] ss:$16 sps:$4 sm:$0xff]  }
 0x425   : > { %5175 = vmatpush1.bf16.msra.mxu1 %v7367_v57  ;;  %5206 = vmatprep.mubr.bf16.mxu1 %v3531_v61  ;;  %v7448_v57 = vld [vmem:[#allocation3 + $0x5a8] ss:$16 sps:$4 sm:$0xff]  }
 0x426   : > { %5339 = vmatpush1.bf16.msra.mxu0 %v7370_v60  ;;  %5370 = vmatprep.mubr.bf16.mxu0 %v3531_v61  ;;  %v7456_v60 = vld [vmem:[#allocation3 + $0x5cc] ss:$16 sps:$4 sm:$0xff]   ;;  %v7451_v61 = vld [vmem:[#allocation3 + $0x5c0] ss:$16 sps:$4 sm:$0xff]  }
 0x427   : > { %5176 = vmatprep.subr.bf16.mxu1 %v7375_v62  ;;  %5340 = vmatprep.subr.bf16.mxu0 %v7378_v63  ;;  %v7454_v62 = vld [vmem:[#allocation3 + $0x5c8] ss:$16 sps:$4 sm:$0xff]   ;;  %v7459_v63 = vld [vmem:[#allocation3 + $0x5e4] ss:$16 sps:$4 sm:$0xff]  }
 0x429   : > { %5177 = vmatpush1.bf16.msra.mxu1 %v7373_v0  ;;  %v7462_v0 = vld [vmem:[#allocation3 + $0x5ec] ss:$16 sps:$4 sm:$0xff]  }
 0x42a   : > { %5341 = vmatpush1.bf16.msra.mxu0 %v7376_v59  ;;  %5178 = vmatprep.subr.bf16.mxu1 %v7381_v1  ;;  %v7457_v59 = vld [vmem:[#allocation3 + $0x5e0] ss:$16 sps:$4 sm:$0xff]   ;;  %v7460_v1 = vld [vmem:[#allocation3 + $0x5e8] ss:$16 sps:$4 sm:$0xff]  }
 0x42b   : > { %5342 = vmatprep.subr.bf16.mxu0 %v7384_v32  ;;  %v3505_v32 = vrot.slane %v9048_v46, %v1718_v30  ;;  %v7469_v30 = vld [vmem:[#allocation3 + $0x620] ss:$16 sps:$4 sm:$0xff]  }
 0x42d   : > { %5179 = vmatpush1.bf16.msra.mxu1 %v7379_v2  ;;  %v7465_v2 = vld [vmem:[#allocation3 + $0x604] ss:$16 sps:$4 sm:$0xff]  }
 0x42e   : > { %5343 = vmatpush1.bf16.msra.mxu0 %v7382_v3  ;;  %5180 = vmatprep.subr.bf16.mxu1 %v7387_v5  ;;  %v7468_v3 = vld [vmem:[#allocation3 + $0x60c] ss:$16 sps:$4 sm:$0xff]   ;;  %v3517_v5 = vrot.slane %v9048_v46, %v1730_v33 }
 0x42f   : > { %5344 = vmatprep.subr.bf16.mxu0 %v7390_v6  ;;  %v7463_v6 = vld [vmem:[#allocation3 + $0x600] ss:$16 sps:$4 sm:$0xff]   ;;  %v7480_v33 = vld [vmem:[#allocation3 + $0x64c] ss:$16 sps:$4 sm:$0xff]  }
 0x431   : > { %5181 = vmatpush1.bf16.msra.mxu1 %v7385_v7  ;;  %v3530_v7 = vpack.c.bf16 %v3505_v32, %v3505_v32  ;;  %v7546_v32 = vld [vmem:[#allocation3 + $0x7ac] ss:$16 sps:$4 sm:$0xff]  }
 0x432   : > { %5345 = vmatpush1.bf16.msra.mxu0 %v7388_v8  ;;  %5182 = vmatprep.subr.bf16.mxu1 %v7393_v9  ;;  %v7466_v8 = vld [vmem:[#allocation3 + $0x608] ss:$16 sps:$4 sm:$0xff]   ;;  %v7471_v9 = vld [vmem:[#allocation3 + $0x624] ss:$16 sps:$4 sm:$0xff]  }
 0x433   : > { %5346 = vmatprep.subr.bf16.mxu0 %v7396_v11  ;;  %v3533_v11 = vpack.c.bf16 %v3517_v5, %v3517_v5  ;;  %v7549_v5 = vld [vmem:[#allocation3 + $0x7c4] ss:$16 sps:$4 sm:$0xff]  }
 0x435   : > { %5183 = vmatpush1.bf16.msra.mxu1 %v7391_v13  ;;  %v7474_v13 = vld [vmem:[#allocation3 + $0x62c] ss:$16 sps:$4 sm:$0xff]  }
 0x436   : > { %5347 = vmatpush1.bf16.msra.mxu0 %v7394_v16  ;;  %5184 = vmatprep.subr.bf16.mxu1 %v7399_v17  ;;  %v7472_v16 = vld [vmem:[#allocation3 + $0x628] ss:$16 sps:$4 sm:$0xff]   ;;  %v7477_v17 = vld [vmem:[#allocation3 + $0x644] ss:$16 sps:$4 sm:$0xff]  }
 0x437   : > { %5348 = vmatprep.subr.bf16.mxu0 %v7402_v18  ;;  %v7475_v18 = vld [vmem:[#allocation3 + $0x640] ss:$16 sps:$4 sm:$0xff]  }
 0x439   : > { %5185 = vmatpush1.bf16.msra.mxu1 %v7397_v19  ;;  %v7478_v19 = vld [vmem:[#allocation3 + $0x648] ss:$16 sps:$4 sm:$0xff]  }
 0x43a   : > { %5349 = vmatpush1.bf16.msra.mxu0 %v7400_v50  ;;  %5186 = vmatprep.subr.bf16.mxu1 %v7405_v21  ;;  %v7483_v50 = vld [vmem:[#allocation3 + $0x664] ss:$16 sps:$4 sm:$0xff]   ;;  %v7486_v21 = vld [vmem:[#allocation3 + $0x66c] ss:$16 sps:$4 sm:$0xff]  }
 0x43b   : > { %5350 = vmatprep.subr.bf16.mxu0 %v7408_v22  ;;  %v7481_v22 = vld [vmem:[#allocation3 + $0x660] ss:$16 sps:$4 sm:$0xff]  }
 0x43d   : > { %5187 = vmatpush1.bf16.msra.mxu1 %v7403_v23  ;;  %v7484_v23 = vld [vmem:[#allocation3 + $0x668] ss:$16 sps:$4 sm:$0xff]  }
 0x43e   : > { %5351 = vmatpush1.bf16.msra.mxu0 %v7406_v24  ;;  %5188 = vmatprep.subr.bf16.mxu1 %v7411_v25  ;;  %v7489_v24 = vld [vmem:[#allocation3 + $0x684] ss:$16 sps:$4 sm:$0xff]   ;;  %v7492_v25 = vld [vmem:[#allocation3 + $0x68c] ss:$16 sps:$4 sm:$0xff]  }
 0x43f   : > { %5352 = vmatprep.subr.bf16.mxu0 %v7414_v26  ;;  %v7487_v26 = vld [vmem:[#allocation3 + $0x680] ss:$16 sps:$4 sm:$0xff]  }
 0x441   : > { %5189 = vmatpush1.bf16.msra.mxu1 %v7409_v27  ;;  %v7490_v27 = vld [vmem:[#allocation3 + $0x688] ss:$16 sps:$4 sm:$0xff]  }
 0x442   : > { %5353 = vmatpush1.bf16.msra.mxu0 %v7412_v28  ;;  %5190 = vmatprep.subr.bf16.mxu1 %v7417_v29  ;;  %v7495_v28 = vld [vmem:[#allocation3 + $0x6a4] ss:$16 sps:$4 sm:$0xff]   ;;  %v7498_v29 = vld [vmem:[#allocation3 + $0x6ac] ss:$16 sps:$4 sm:$0xff]  }
 0x443   : > { %5354 = vmatprep.subr.bf16.mxu0 %v7420_v34  ;;  %v7493_v34 = vld [vmem:[#allocation3 + $0x6a0] ss:$16 sps:$4 sm:$0xff]  }
 0x445   : > { %5191 = vmatpush1.bf16.msra.mxu1 %v7415_v44  ;;  %v7496_v44 = vld [vmem:[#allocation3 + $0x6a8] ss:$16 sps:$4 sm:$0xff]  }
 0x446   : > { %5355 = vmatpush1.bf16.msra.mxu0 %v7418_v35  ;;  %5192 = vmatprep.subr.bf16.mxu1 %v7423_v51  ;;  %v7501_v35 = vld [vmem:[#allocation3 + $0x6c4] ss:$16 sps:$4 sm:$0xff]   ;;  %v7504_v51 = vld [vmem:[#allocation3 + $0x6cc] ss:$16 sps:$4 sm:$0xff]  }
 0x447   : > { %5356 = vmatprep.subr.bf16.mxu0 %v7426_v36  ;;  %v7499_v36 = vld [vmem:[#allocation3 + $0x6c0] ss:$16 sps:$4 sm:$0xff]  }
 0x449   : > { %5193 = vmatpush1.bf16.msra.mxu1 %v7421_v37  ;;  %v7502_v37 = vld [vmem:[#allocation3 + $0x6c8] ss:$16 sps:$4 sm:$0xff]  }
 0x44a   : > { %5357 = vmatpush1.bf16.msra.mxu0 %v7424_v38  ;;  %5194 = vmatprep.subr.bf16.mxu1 %v7429_v39  ;;  %v7507_v38 = vld [vmem:[#allocation3 + $0x6e4] ss:$16 sps:$4 sm:$0xff]   ;;  %v7510_v39 = vld [vmem:[#allocation3 + $0x6ec] ss:$16 sps:$4 sm:$0xff]  }
 0x44b   : > { %5358 = vmatprep.subr.bf16.mxu0 %v7432_v40  ;;  %v7505_v40 = vld [vmem:[#allocation3 + $0x6e0] ss:$16 sps:$4 sm:$0xff]  }
 0x44d   : > { %5195 = vmatpush1.bf16.msra.mxu1 %v7427_v41  ;;  %v7508_v41 = vld [vmem:[#allocation3 + $0x6e8] ss:$16 sps:$4 sm:$0xff]  }
 0x44e   : > { %5359 = vmatpush1.bf16.msra.mxu0 %v7430_v47  ;;  %5196 = vmatprep.subr.bf16.mxu1 %v7435_v14  ;;  %v7513_v47 = vld [vmem:[#allocation3 + $0x704] ss:$16 sps:$4 sm:$0xff]   ;;  %v7516_v14 = vld [vmem:[#allocation3 + $0x70c] ss:$16 sps:$4 sm:$0xff]  }
 0x44f   : > { %5360 = vmatprep.subr.bf16.mxu0 %v7438_v15  ;;  %v7511_v15 = vld [vmem:[#allocation3 + $0x700] ss:$16 sps:$4 sm:$0xff]  }
 0x451   : > { %5197 = vmatpush1.bf16.msra.mxu1 %v7433_v4  ;;  %v7514_v4 = vld [vmem:[#allocation3 + $0x708] ss:$16 sps:$4 sm:$0xff]  }
 0x452   : > { %5361 = vmatpush1.bf16.msra.mxu0 %v7436_v20  ;;  %5198 = vmatprep.subr.bf16.mxu1 %v7441_v48  ;;  %v7519_v20 = vld [vmem:[#allocation3 + $0x724] ss:$16 sps:$4 sm:$0xff]   ;;  %v7522_v48 = vld [vmem:[#allocation3 + $0x72c] ss:$16 sps:$4 sm:$0xff]  }
 0x453   : > { %5362 = vmatprep.subr.bf16.mxu0 %v7444_v49  ;;  %v7517_v49 = vld [vmem:[#allocation3 + $0x720] ss:$16 sps:$4 sm:$0xff]  }
 0x455   : > { %5199 = vmatpush1.bf16.msra.mxu1 %v7439_v52  ;;  %v7520_v52 = vld [vmem:[#allocation3 + $0x728] ss:$16 sps:$4 sm:$0xff]  }
 0x456   : > { %5363 = vmatpush1.bf16.msra.mxu0 %v7442_v53  ;;  %5200 = vmatprep.subr.bf16.mxu1 %v7447_v54  ;;  %v7525_v53 = vld [vmem:[#allocation3 + $0x744] ss:$16 sps:$4 sm:$0xff]   ;;  %v7528_v54 = vld [vmem:[#allocation3 + $0x74c] ss:$16 sps:$4 sm:$0xff]  }
 0x457   : > { %5364 = vmatprep.subr.bf16.mxu0 %v7450_v55  ;;  %v7523_v55 = vld [vmem:[#allocation3 + $0x740] ss:$16 sps:$4 sm:$0xff]  }
 0x459   : > { %5201 = vmatpush1.bf16.msra.mxu1 %v7445_v56  ;;  %v7526_v56 = vld [vmem:[#allocation3 + $0x748] ss:$16 sps:$4 sm:$0xff]  }
 0x45a   : > { %5365 = vmatpush1.bf16.msra.mxu0 %v7448_v57  ;;  %5202 = vmatprep.subr.bf16.mxu1 %v7453_v58  ;;  %v7531_v57 = vld [vmem:[#allocation3 + $0x764] ss:$16 sps:$4 sm:$0xff]   ;;  %v7534_v58 = vld [vmem:[#allocation3 + $0x76c] ss:$16 sps:$4 sm:$0xff]  }
 0x45b   : > { %5366 = vmatprep.subr.bf16.mxu0 %v7456_v60  ;;  %v7529_v60 = vld [vmem:[#allocation3 + $0x760] ss:$16 sps:$4 sm:$0xff]  }
 0x45d   : > { %5203 = vmatpush1.bf16.msra.mxu1 %v7451_v61  ;;  %v7532_v61 = vld [vmem:[#allocation3 + $0x768] ss:$16 sps:$4 sm:$0xff]  }
 0x45e   : > { %5367 = vmatpush1.bf16.msra.mxu0 %v7454_v62  ;;  %5204 = vmatprep.subr.bf16.mxu1 %v7459_v63  ;;  %v7537_v62 = vld [vmem:[#allocation3 + $0x784] ss:$16 sps:$4 sm:$0xff]   ;;  %v7540_v63 = vld [vmem:[#allocation3 + $0x78c] ss:$16 sps:$4 sm:$0xff]  }
 0x45f   : > { %5368 = vmatprep.subr.bf16.mxu0 %v7462_v0  ;;  %v7535_v0 = vld [vmem:[#allocation3 + $0x780] ss:$16 sps:$4 sm:$0xff]  }
 0x461   : > { %5205 = vmatpush1.bf16.msra.mxu1 %v7457_v59  ;;  %v7538_v59 = vld [vmem:[#allocation3 + $0x788] ss:$16 sps:$4 sm:$0xff]  }
 0x462   : > { %5369 = vmatpush1.bf16.msra.mxu0 %v7460_v1  ;;  %5215 = vmatprep.subr.bf16.mxu1 %v7465_v2  ;;  %v7543_v1 = vld [vmem:[#allocation3 + $0x7a4] ss:$16 sps:$4 sm:$0xff]   ;;  %v7541_v2 = vld [vmem:[#allocation3 + $0x7a0] ss:$16 sps:$4 sm:$0xff]  }
 0x463   : > { %5379 = vmatprep.subr.bf16.mxu0 %v7468_v3  ;;  %v7544_v3 = vld [vmem:[#allocation3 + $0x7a8] ss:$16 sps:$4 sm:$0xff]  }
 0x464   : > { %5207 = vmatmul.mubr.bf16.vlgmr.msra.gmra.mrb[16].mxu1 %v3530_v7 }
 0x465   : > { %5371 = vmatmul.mubr.bf16.vlgmr.msra.gmra.mrb[16].mxu0 %v3530_v7  ;;  %5216 = vmatpush1.bf16.msra.mxu1 %v7463_v6  ;;  %v7552_v6 = vld [vmem:[#allocation3 + $0x7cc] ss:$16 sps:$4 sm:$0xff]   ;;  %v7547_v7 = vld [vmem:[#allocation3 + $0x7c0] ss:$16 sps:$4 sm:$0xff]  }
 0x466   : > { %5247 = vmatprep.mubr.bf16.mxu1 %v3533_v11  ;;  %5380 = vmatpush1.bf16.msra.mxu0 %v7466_v8  ;;  %v7550_v8 = vld [vmem:[#allocation3 + $0x7c8] ss:$16 sps:$4 sm:$0xff]  }
 0x467   : > { %5411 = vmatprep.mubr.bf16.mxu0 %v3533_v11  ;;  %5217 = vmatprep.subr.bf16.mxu1 %v7471_v9  ;;  %v7555_v9 = vld [vmem:[#allocation3 + $0x7e4] ss:$16 sps:$4 sm:$0xff]   ;;  %v7558_v11 = vld [vmem:[#allocation3 + $0x7ec] ss:$16 sps:$4 sm:$0xff]  }
 0x468   : > { %5381 = vmatprep.subr.bf16.mxu0 %v7474_v13  ;;  %v7553_v13 = vld [vmem:[#allocation3 + $0x7e0] ss:$16 sps:$4 sm:$0xff]  }
 0x469   : > { %5218 = vmatpush1.bf16.msra.mxu1 %v7469_v30  ;;  %v7556_v30 = vld [vmem:[#allocation3 + $0x7e8] ss:$16 sps:$4 sm:$0xff]  }
 0x46a   : > { %5382 = vmatpush1.bf16.msra.mxu0 %v7472_v16  ;;  %5219 = vmatprep.subr.bf16.mxu1 %v7477_v17  ;;  %v3513_v16 = vrot.slane %v9048_v46, %v1726_v31  ;;  %v7559_v17 = vld [vmem:[%s9326_s11 + $0x40] sm:$0xff]   ;;  %v7563_v31 = vld [vmem:[%s9326_s11 + $0x48] sm:$0xff]  }
 0x46b   : > { %5383 = vmatprep.subr.bf16.mxu0 %v7480_v33  ;;  %v7560_v33 = vld [vmem:[%s9326_s11 + $0xc0] sm:$0xff]   ;;  %v7564_v46 = vld [vmem:[%s9326_s11 + $0xc8] sm:$0xff]  }
 0x46d   : > { %5220 = vmatpush1.bf16.msra.mxu1 %v7475_v18  ;;  %v7561_v18 = vld [vmem:[%s9326_s11] sm:$0xff]  }
 0x46e   : > { %5384 = vmatpush1.bf16.msra.mxu0 %v7478_v19  ;;  %5221 = vmatprep.subr.bf16.mxu1 %v7483_v50  ;;  %v3532_v19 = vpack.c.bf16 %v3513_v16, %v3513_v16  ;;  %v7565_v50 = vld [vmem:[%s9326_s11 + $0x8] sm:$0xff]   ;;  %v7595_v16 = vld [vmem:[%s9328_s13 + $0x20] sm:$0xff]  }
 0x46f   : > { %5385 = vmatprep.subr.bf16.mxu0 %v7486_v21  ;;  %v7566_v21 = vld [vmem:[%s9326_s11 + $0x88] sm:$0xff]  }
 0x471   : > { %5222 = vmatpush1.bf16.msra.mxu1 %v7481_v22  ;;  %v7567_v22 = vld [vmem:[%s9326_s11 + $0x50] sm:$0xff]  }
 0x472   : > { %5386 = vmatpush1.bf16.msra.mxu0 %v7484_v23  ;;  %5223 = vmatprep.subr.bf16.mxu1 %v7489_v24  ;;  %v7568_v23 = vld [vmem:[%s9326_s11 + $0xd0] sm:$0xff]  }
 0x473   : > { %5387 = vmatprep.subr.bf16.mxu0 %v7492_v25  ;;  %v7569_v24 = vld [vmem:[%s9326_s11 + $0x10] sm:$0xff]  }
 0x474   : > { %v7570_v25 = vld [vmem:[%s9326_s11 + $0x90] sm:$0xff]  }
 0x475   : > { %5224 = vmatpush1.bf16.msra.mxu1 %v7487_v26  ;;  %v7571_v26 = vld [vmem:[%s9326_s11 + $0x58] sm:$0xff]  }
 0x476   : > { %5388 = vmatpush1.bf16.msra.mxu0 %v7490_v27  ;;  %5225 = vmatprep.subr.bf16.mxu1 %v7495_v28  ;;  %v7572_v27 = vld [vmem:[%s9326_s11 + $0xd8] sm:$0xff]  }
 0x477   : > { %5389 = vmatprep.subr.bf16.mxu0 %v7498_v29  ;;  %v7573_v28 = vld [vmem:[%s9326_s11 + $0x18] sm:$0xff]  }
 0x478   : > { %v7574_v29 = vld [vmem:[%s9326_s11 + $0x98] sm:$0xff]  }
 0x479   : > { %5226 = vmatpush1.bf16.msra.mxu1 %v7493_v34  ;;  %v7575_v34 = vld [vmem:[%s9326_s11 + $0x60] sm:$0xff]  }
 0x47a   : > { %5390 = vmatpush1.bf16.msra.mxu0 %v7496_v44  ;;  %5227 = vmatprep.subr.bf16.mxu1 %v7501_v35  ;;  %v7576_v44 = vld [vmem:[%s9326_s11 + $0xe0] sm:$0xff]  }
 0x47b   : > { %5391 = vmatprep.subr.bf16.mxu0 %v7504_v51  ;;  %v7577_v35 = vld [vmem:[%s9326_s11 + $0x20] sm:$0xff]  }
 0x47c   : > { %v7578_v51 = vld [vmem:[%s9326_s11 + $0xa0] sm:$0xff]  }
 0x47d   : > { %5228 = vmatpush1.bf16.msra.mxu1 %v7499_v36  ;;  %v7579_v36 = vld [vmem:[%s9326_s11 + $0x68] sm:$0xff]  }
 0x47e   : > { %5392 = vmatpush1.bf16.msra.mxu0 %v7502_v37  ;;  %5229 = vmatprep.subr.bf16.mxu1 %v7507_v38  ;;  %v7580_v37 = vld [vmem:[%s9326_s11 + $0xe8] sm:$0xff]  }
 0x47f   : > { %5393 = vmatprep.subr.bf16.mxu0 %v7510_v39  ;;  %v7581_v38 = vld [vmem:[%s9326_s11 + $0x28] sm:$0xff]  }
 0x480   : > { %v7582_v39 = vld [vmem:[%s9326_s11 + $0xa8] sm:$0xff]  }
 0x481   : > { %5230 = vmatpush1.bf16.msra.mxu1 %v7505_v40  ;;  %v7583_v40 = vld [vmem:[%s9326_s11 + $0x70] sm:$0xff]  }
 0x482   : > { %5394 = vmatpush1.bf16.msra.mxu0 %v7508_v41  ;;  %5231 = vmatprep.subr.bf16.mxu1 %v7513_v47  ;;  %v7584_v41 = vld [vmem:[%s9326_s11 + $0xf0] sm:$0xff]  }
 0x483   : > { %5395 = vmatprep.subr.bf16.mxu0 %v7516_v14  ;;  %v7585_v47 = vld [vmem:[%s9326_s11 + $0x30] sm:$0xff]  }
 0x484   : > { %v7586_v14 = vld [vmem:[%s9326_s11 + $0xb0] sm:$0xff]  }
 0x485   : > { %5232 = vmatpush1.bf16.msra.mxu1 %v7511_v15  ;;  %v7587_v15 = vld [vmem:[%s9326_s11 + $0x78] sm:$0xff]  }
 0x486   : > { %5396 = vmatpush1.bf16.msra.mxu0 %v7514_v4  ;;  %5233 = vmatprep.subr.bf16.mxu1 %v7519_v20  ;;  %v7588_v4 = vld [vmem:[%s9326_s11 + $0xf8] sm:$0xff]  }
 0x487   : > { %5397 = vmatprep.subr.bf16.mxu0 %v7522_v48  ;;  %v7589_v20 = vld [vmem:[%s9326_s11 + $0x38] sm:$0xff]  }
 0x488   : > { %v7590_v48 = vld [vmem:[%s9326_s11 + $0xb8] sm:$0xff]  }
 0x489   : > { %5234 = vmatpush1.bf16.msra.mxu1 %v7517_v49  ;;  %v7725_v49 = vmov 0.0  }
 0x48a   : > { %5398 = vmatpush1.bf16.msra.mxu0 %v7520_v52  ;;  %5235 = vmatprep.subr.bf16.mxu1 %v7525_v53  ;;  %v3790_v52 = vld [vmem:[%s9325_s10] sm:$0xf] }
 0x48b   : > { %5399 = vmatprep.subr.bf16.mxu0 %v7528_v54  ;;  %v5075_v53 = vrot.slane %v3790_v52, %v8196_v43  ;;  %v5083_v54 = vrot.slane %v3790_v52, %v8401_v10 }
 0x48d   : > { %5236 = vmatpush1.bf16.msra.mxu1 %v7523_v55  ;;  %v5079_v55 = vrot.slane %v3790_v52, %v8202_v45  ;;  %v7591_v45 = vld [vmem:[%s9328_s13] sm:$0xff]  }
 0x48e   : > { %5400 = vmatpush1.bf16.msra.mxu0 %v7526_v56  ;;  %5237 = vmatprep.subr.bf16.mxu1 %v7531_v57  ;;  %v5087_v56 = vrot.slane %v3790_v52, %v8407_v12  ;;  %v5882_v52 = vld [vmem:[%s9331_s16] sm:$0x1] }
 0x48f   : > { %5401 = vmatprep.subr.bf16.mxu0 %v7534_v58 }
 0x491   : > { %5238 = vmatpush1.bf16.msra.mxu1 %v7529_v60 }
 0x492   : > { %5402 = vmatpush1.bf16.msra.mxu0 %v7532_v61  ;;  %5239 = vmatprep.subr.bf16.mxu1 %v7537_v62 }
 0x493   : > { %5403 = vmatprep.subr.bf16.mxu0 %v7540_v63 }
 0x495   : > { %5240 = vmatpush1.bf16.msra.mxu1 %v7535_v0 }
 0x496   : > { %5404 = vmatpush1.bf16.msra.mxu0 %v7538_v59  ;;  %5241 = vmatprep.subr.bf16.mxu1 %v7543_v1 }
 0x497   : > { %5405 = vmatprep.subr.bf16.mxu0 %v7546_v32 }
 0x499   : > { %5242 = vmatpush1.bf16.msra.mxu1 %v7541_v2 }
 0x49a   : > { %5406 = vmatpush1.bf16.msra.mxu0 %v7544_v3  ;;  %5243 = vmatprep.subr.bf16.mxu1 %v7549_v5 }
 0x49b   : > { %5407 = vmatprep.subr.bf16.mxu0 %v7552_v6 }
 0x49d   : > { %5244 = vmatpush1.bf16.msra.mxu1 %v7547_v7 }
 0x49e   : > { %5408 = vmatpush1.bf16.msra.mxu0 %v7550_v8  ;;  %5245 = vmatprep.subr.bf16.mxu1 %v7555_v9 }
 0x49f   : > { %5409 = vmatprep.subr.bf16.mxu0 %v7558_v11  ;;  %v7592_v11 = vld [vmem:[%s9328_s13 + $0x8] sm:$0xff]  }
 0x4a1   : > { %5246 = vmatpush1.bf16.msra.mxu1 %v7553_v13  ;;  %v7593_v13 = vld [vmem:[%s9328_s13 + $0x10] sm:$0xff]  }
 0x4a2   : > { %5410 = vmatpush1.bf16.msra.mxu0 %v7556_v30  ;;  %6815 = vmatprep.subr.bf16.mxu1 %v7559_v17  ;;  %v7594_v30 = vld [vmem:[%s9328_s13 + $0x18] sm:$0xff]   ;;  %v7596_v17 = vld [vmem:[%s9328_s13 + $0x28] sm:$0xff]  }
 0x4a3   : > { %6837 = vmatprep.subr.bf16.mxu0 %v7560_v33  ;;  %v7597_v33 = vld [vmem:[%s9328_s13 + $0x30] sm:$0xff]  }
 0x4a4   : > { %5248 = vmatmul.mubr.bf16.vlgmr.msra.gmra.mrb[16].mxu1 %v3532_v19 }
 0x4a5   : > { %5412 = vmatmul.mubr.bf16.vlgmr.msra.gmra.mrb[16].mxu0 %v3532_v19  ;;  %6816 = vmatpush3.bf16.msra.mxu1 %v7561_v18  ;;  %v7598_v18 = vld [vmem:[%s9328_s13 + $0x38] sm:$0xff]   ;;  %v7599_v19 = vld [vmem:[%s9330_s15] sm:$0xff]  }
 0x4a6   : > { %6838 = vmatpush3.bf16.msra.mxu0 %v7562_v42  ;;  %6817 = vmatprep.subr.bf16.mxu1 %v7563_v31  ;;  %v7600_v42 = vld [vmem:[%s9330_s15 + $0x8] sm:$0xff]  }
 0x4a7   : > { %6839 = vmatprep.subr.bf16.mxu0 %v7564_v46 }
 0x4a9   : > { %6818 = vmatpush3.bf16.msra.mxu1 %v7565_v50  ;;  %v5492_v50 = vld [vmem:[%s9327_s12] sm:$0x1] }
 0x4aa   : > { %6840 = vmatpush3.bf16.msra.mxu0 %v7566_v21  ;;  %6819 = vmatprep.subr.bf16.mxu1 %v7567_v22 }
 0x4ab   : > { %6841 = vmatprep.subr.bf16.mxu0 %v7568_v23 }
 0x4ad   : > { %6820 = vmatpush3.bf16.msra.mxu1 %v7569_v24 }
 0x4ae   : > { %6842 = vmatpush3.bf16.msra.mxu0 %v7570_v25  ;;  %6821 = vmatprep.subr.bf16.mxu1 %v7571_v26 }
 0x4af   : > { %6843 = vmatprep.subr.bf16.mxu0 %v7572_v27 }
 0x4b1   : > { %6822 = vmatpush3.bf16.msra.mxu1 %v7573_v28 }
 0x4b2   : > { %6844 = vmatpush3.bf16.msra.mxu0 %v7574_v29  ;;  %6823 = vmatprep.subr.bf16.mxu1 %v7575_v34 }
 0x4b3   : > { %6845 = vmatprep.subr.bf16.mxu0 %v7576_v44 }
 0x4b5   : > { %6824 = vmatpush3.bf16.msra.mxu1 %v7577_v35  ;;  %v7601_v35 = vld [vmem:[%s9330_s15 + $0x10] sm:$0xff]  }
 0x4b6   : > { %6846 = vmatpush3.bf16.msra.mxu0 %v7578_v51  ;;  %6825 = vmatprep.subr.bf16.mxu1 %v7579_v36  ;;  %v7602_v51 = vld [vmem:[%s9330_s15 + $0x18] sm:$0xff]   ;;  %v7603_v36 = vld [vmem:[%s9332_s17] sm:$0xff]  }
 0x4b7   : > { %6847 = vmatprep.subr.bf16.mxu0 %v7580_v37  ;;  %v7604_v37 = vld [vmem:[%s9332_s17 + $0x8] sm:$0xff]  }
 0x4b9   : > { %6826 = vmatpush3.bf16.msra.mxu1 %v7581_v38  ;;  %v5783_v38 = vld [vmem:[%s9329_s14] sm:$0x1] }
 0x4ba   : > { %6848 = vmatpush3.bf16.msra.mxu0 %v7582_v39  ;;  %6827 = vmatprep.subr.bf16.mxu1 %v7583_v40 }
 0x4bb   : > { %6849 = vmatprep.subr.bf16.mxu0 %v7584_v41 }
 0x4bd   : > { %6828 = vmatpush3.bf16.msra.mxu1 %v7585_v47 }
 0x4be   : > { %6850 = vmatpush3.bf16.msra.mxu0 %v7586_v14  ;;  %6829 = vmatprep.subr.bf16.mxu1 %v7587_v15 }
 0x4bf   : > { %6851 = vmatprep.subr.bf16.mxu0 %v7588_v4 }
 0x4c1   : > { %6830 = vmatpush3.bf16.msra.mxu1 %v7589_v20  ;;  %v7605_v20 = vld [vmem:[%s9332_s17 + $0x10] sm:$0xff]  }
 0x4c2   : > { %6852 = vmatpush3.bf16.msra.mxu0 %v7590_v48  ;;  %6878 = vmatprep.subr.bf16.mxu1 %v7725_v49  ;;  %v7606_v48 = vld [vmem:[%s9332_s17 + $0x18] sm:$0xff]  }
 0x4c3   : > { %6898 = vmatprep.subr.bf16.mxu0 %v7725_v49 }
 0x577   : > { %v5249_v57 = vpop.f32.mrb[16].mxu1 }
 0x578   : > { %v6938_v58 = vadd.f32 %v5249_v57, %v5075_v53  ;;  %v5413_v60 = vpop.f32.mrb[16].mxu0  ;;  %v5251_v61 = vpop.f32.mrb[17].mxu1 }
 0x579   : > { %v6940_v62 = vadd.f32 %v5413_v60, %v5083_v54  ;;  %v6939_v63 = vadd.f32 %v5251_v61, %v5079_v55  ;;  %v5415_v0 = vpop.f32.mrb[17].mxu0  ;;  %v5253_v59 = vpop.f32.mrb[18].mxu1 }
 0x57a   : > { %v5420_v1 = vmax.f32 %v6938_v58, 0.0  ;;  %v6941_v32 = vadd.f32 %v5415_v0, %v5087_v56  ;;  %v5417_v2 = vpop.f32.mrb[18].mxu0  ;;  %v5254_v3 = vpop.f32.mrb[19].mxu1 }
 0x57b   : > { %v5422_v5 = vmax.f32 %v6940_v62, 0.0  ;;  %v5421_v43 = vmax.f32 %v6939_v63, 0.0  ;;  %v5418_v6 = vpop.f32.mrb[19].mxu0 }
 0x57c   : > { %v5423_v10 = vmax.f32 %v6941_v32, 0.0  ;;  %v5424_v12 = vpack.c.bf16 %v5420_v1, %v5420_v1 }
 0x57d   : > { %v5425_v7 = vpack.c.bf16 %v5421_v43, %v5421_v43  ;;  %v5426_v9 = vpack.c.bf16 %v5422_v5, %v5422_v5 }
 0x57e   : > { %v5427_v8 = vpack.c.bf16 %v5423_v10, %v5423_v10 }
 0x57f   : > { %5717 = vmatprep.mubr.bf16.mxu1 %v5425_v7 }
 0x580   : > { %5757 = vmatprep.mubr.bf16.mxu0 %v5427_v8  ;;  %5718 = vmatmul.mubr.bf16.vlgmr.msra.gmra.mrb[20].mxu1 %v5424_v12 }
 0x581   : > { %5758 = vmatmul.mubr.bf16.vlgmr.msra.gmra.mrb[20].mxu0 %v5426_v9  ;;  %6879 = vmatpush3.bf16.msra.mxu1 %v7591_v45 }
 0x582   : > { %6880 = vmatprep.subr.bf16.mxu1 %v7725_v49  ;;  %6894 = vmatprep.mubr.msk.bf16.mxu1 %vm7726_vm3, %v7725_v49 }
 0x583   : > { %6906 = vmatprep.mubr.msk.bf16.mxu0 %vm7726_vm3, %v7725_v49  ;;  %6899 = vmatpush3.bf16.msra.mxu0 %v7599_v19 }
 0x584   : > { %6900 = vmatprep.subr.bf16.mxu0 %v7725_v49 }
 0x585   : > { %6881 = vmatpush3.bf16.msra.mxu1 %v7592_v11 }
 0x586   : > { %6882 = vmatprep.subr.bf16.mxu1 %v7725_v49 }
 0x587   : > { %6901 = vmatpush3.bf16.msra.mxu0 %v7600_v42 }
 0x588   : > { %6902 = vmatprep.subr.bf16.mxu0 %v7725_v49 }
 0x589   : > { %6883 = vmatpush3.bf16.msra.mxu1 %v7593_v13 }
 0x58a   : > { %6884 = vmatprep.subr.bf16.mxu1 %v7725_v49 }
 0x58b   : > { %6903 = vmatpush3.bf16.msra.mxu0 %v7601_v35 }
 0x58c   : > { %6904 = vmatprep.subr.bf16.mxu0 %v7725_v49 }
 0x58d   : > { %6885 = vmatpush3.bf16.msra.mxu1 %v7594_v30 }
 0x58e   : > { %6886 = vmatprep.subr.bf16.mxu1 %v7725_v49 }
 0x58f   : > { %6905 = vmatpush3.bf16.msra.mxu0 %v7602_v51 }
 0x591   : > { %6887 = vmatpush3.bf16.msra.mxu1 %v7595_v16 }
 0x592   : > { %6888 = vmatprep.subr.bf16.mxu1 %v7725_v49 }
 0x595   : > { %6889 = vmatpush3.bf16.msra.mxu1 %v7596_v17 }
 0x596   : > { %6890 = vmatprep.subr.bf16.mxu1 %v7725_v49 }
 0x599   : > { %6891 = vmatpush3.bf16.msra.mxu1 %v7597_v33 }
 0x59a   : > { %6892 = vmatprep.subr.bf16.mxu1 %v7725_v49 }
 0x59d   : > { %6893 = vmatpush3.bf16.msra.mxu1 %v7598_v18 }
 0x59e   : > { %6910 = vmatprep.subr.bf16.mxu1 %v7725_v49 }
 0x653   : > { %v6831_v31 = vpop.f32.mrb[20].mxu1 }
 0x654   : > { %v6853_v46 = vpop.f32.mrb[20].mxu0  ;;  %v6832_v21 = vpop.f32.mrb[21].mxu1 }
 0x655   : > { %v6833_v22 = vadd.f32 %v6832_v21, %v6831_v31  ;;  %v6854_v23 = vpop.f32.mrb[21].mxu0  ;;  %v6834_v24 = vpop.f32.mrb[22].mxu1 }
 0x656   : > { %v6855_v25 = vadd.f32 %v6854_v23, %v6853_v46  ;;  %v6856_v26 = vpop.f32.mrb[22].mxu0  ;;  %v6835_v27 = vpop.f32.mrb[23].mxu1 }
 0x657   : > { %v5720_v28 = vadd.f32 %v6833_v22, %v5492_v50  ;;  %v6857_v29 = vpop.f32.mrb[23].mxu0 }
 0x659   : > { %v5760_v34 = vadd.f32 %v6855_v25, %v5720_v28 }
 0x65b   : > { %v5766_v44 = vpack.c.bf16 %v5760_v34, %v5760_v34  ;;  %5765 = vst [vmem:[%s9225_s3] sm:$0x1] %v5760_v34 }
 0x65d   : > { %6895 = vmatmul.mubr.bf16.vlgmr.msra.gmra.mrb[24].mxu1 %v5766_v44 }
 0x65e   : > { %6918 = vmatprep.mubr.msk.bf16.mxu1 %vm7726_vm3, %v7725_v49  ;;  %6911 = vmatpush3.bf16.msra.mxu1 %v7603_v36 }
 0x65f   : > { %6912 = vmatprep.subr.bf16.mxu1 %v7725_v49 }
 0x662   : > { %6913 = vmatpush3.bf16.msra.mxu1 %v7604_v37 }
 0x663   : > { %6914 = vmatprep.subr.bf16.mxu1 %v7725_v49 }
 0x666   : > { %6915 = vmatpush3.bf16.msra.mxu1 %v7605_v20 }
 0x667   : > { %6916 = vmatprep.subr.bf16.mxu1 %v7725_v49 }
 0x66a   : > { %6917 = vmatpush3.bf16.msra.mxu1 %v7606_v48 }
 0x730   : > { %v5866_v39 = vpop.f32.mrb[24].mxu1 }
 0x731   : > { %v5867_v40 = vadd.f32 %v5866_v39, %v5783_v38  ;;  %v6896_v41 = vpop.f32.mrb[25].mxu1 }
 0x732   : > { %v5869_v47 = vpop.f32.mrb[26].mxu1 }
 0x733   : > { %v5872_v14 = vmax.f32 %v5867_v40, 0.0  ;;  %v6897_v15 = vpop.f32.mrb[27].mxu1 }
 0x735   : > { %v5873_v4 = vpack.c.bf16 %v5872_v14, %v5872_v14 }
 0x737   : > { %6907 = vmatmul.mubr.msk.bf16.vlgmr.msra.gmra.mrb[24].mxu0 %vm5907_vm4, %v5873_v4 }
 0x80a   : > { %v5945_v53 = vpop.f32.mrb[24].mxu0 }
 0x80b   : > { %v5946_v54 = vadd.f32 %v5945_v53, %v5882_v52  ;;  %v6908_v55 = vpop.f32.mrb[25].mxu0 }
 0x80c   : > { %v5948_v56 = vpop.f32.mrb[26].mxu0 }
 0x80d   : > { %v5951_v57 = vmax.f32 %v5946_v54, 0.0  ;;  %v6909_v58 = vpop.f32.mrb[27].mxu0 }
 0x80f   : > { %v5952_v60 = vpack.c.bf16 %v5951_v57, %v5951_v57 }
 0x811   : > { %6919 = vmatmul.mubr.msk.bf16.vlgmr.msra.gmra.mrb[28].mxu1 %vm5907_vm4, %v5952_v60 }
 0x812   : > { %7648 = shalt.err (!%p7645_p6)
}
 0x813   : > { %s7649_s24 = scalar_lea.hbm %s9264_s26, 16  ;;  %s7653_s9 = scalar_lea.hbm %s9378_s19, 32 }
 0x814   : > { %p7650_p7 = scmp.ne.s32.totalorder %s9264_s26, %s7649_s24  ;;  %p7654_p0 = scmp.lt.u32.totalorder %s9264_s26, %s9378_s19 }
 0x815   : > { %p7655_p2 = scmp.lt.u32.totalorder %s7653_s9, %s7649_s24  ;;  %p7657_p8 = scmp.lt.u32.totalorder %s7649_s24, %s9264_s26 }
 0x816   : > { %p7651_p9 = pnand %p7650_p7, %p9379_p10 }
 0x817   : > { %p7656_p4 = por %p7655_p2, %p7654_p0 }
 0x818   : > { %p7652_p12 = pneg %p7651_p9 }
 0x819   : > { %p7658_p11 = por %p7657_p8, %p7656_p4 }
 0x81b   : > { %p7659_p13 = pnand %p7658_p11, %p7652_p12 }
 0x81d   : > { %7662 = shalt.err (!%p7659_p13)
}
 0x81e   : > { %6986 = dma.vmem_to_hbm [thread:$0]  (%p9379_p10), %s6047_s23, 16, %s9264_s26, %s6031_s2  }
 0x81f   : > { %s9380_s0 = sld [smem:[#allocation22_spill]]  ;;  %s9381_s27 = sld [smem:[#allocation24_spill]] }
 0x825   : > { %v5961_v49 = vld [vmem:[%s9380_s0] sm:$0x1]  ;;  %s692_s3 = scalar_lea.vmem %s9381_s27, %s7934_s21 }
 0x8e4   : > { %v6023_v61 = vpop.f32.mrb[28].mxu1 }
 0x8e5   : > { %v6024_v62 = vadd.f32 %v6023_v61, %v5961_v49  ;;  %v6920_v63 = vpop.f32.mrb[29].mxu1 }
 0x8e6   : > { %v6026_v0 = vpop.f32.mrb[30].mxu1 }
 0x8e7   : > { %6029 = vst [vmem:[%s692_s3] sm:$0x1] %v6024_v62  ;;  %v6921_v59 = vpop.f32.mrb[31].mxu1 }
 0x8e8 PF: > { %s9382_s24 = sld [smem:[#allocation12_spill]]  ;;  %s9383_s4 = sld [smem:[#allocation9_spill]] }
 0x8e9   : > { %s9384_s9 = sld [smem:[#allocation14_spill]] }
 0x8ee   : > { %p6998_p1 = scmp.ge.s32.totalorder %s9382_s24, 2  ;;  %s6061_s26 = sand.u32 1, %s9383_s4  }
 0x8ef   : > { %p9385_p10 = scmp.ne.s32.totalorder %s9384_s9, 0  ;;  %s6062_s23 = scalar_lea.sflag [#allocation5], %s6061_s26 }
 0x8f1   : > { %p6993_p3 = pnand %p6998_p1, %p9385_p10 }
 0x8f3   : > { %7692 = dma.done.wait (!%p6993_p3), %s6062_s23, 16  }
 0x8f4   : > { %7694 = vsyncadd (!%p6993_p3), %s6062_s23, 4294967280  ;;  %s35_s25 = sadd.s32 1, %s9382_s24   ;;  %s9386_s21 = sld [smem:[#allocation10_spill]] }
 0x8f5   : > { %p32_p5 = scmp.ge.s32.totalorder %s35_s25, 4   ;;  %s9387_s23 = sld [smem:[#allocation15_spill]] }
 0x8f6   : > { %s9388_s24 = sld [smem:[#allocation11_spill]]  ;;  %s9389_s2 = sld [smem:[#allocation13_spill]] }
 0x8f7   : > { %s9390_s1 = smov %s7701_s22  ;;  %34 = sbr.rel (!%p32_p5) target bundleno = 15 (0xf), region = 159 }
 0x8fa   : > { %s9391_s22 = smov %s9386_s21 }
 0x8fe   :  { %6072 = vsyncpa [#allocation4], 1 }
 0x8ff   :  { %6074 = vsyncpa [#allocation4 + $0x1], 1 }
 0x900   :  { %6075 = vsyncpa [#allocation5], 1 }
 0x901   :  { %6077 = vsyncpa [#allocation5 + $0x1], 1 }

</bundles_post_ra>
